<compile_context>
chip_gen: v7x
topology: tpu7x:2x2x1
jax: 0.10.0
libtpu: 0.0.40
codegen_flags: <defaults>
</compile_context>

<pallas_src>
import numpy as np
import jax
import jax.numpy as jnp
from jax.experimental import pallas as pl
from jax.experimental.pallas import tpu as pltpu


def _round_up(n, m):
    return ((n + m - 1) // m) * m


# ------------------------------ fused kernel -------------------------------

def _symbol_classifier_kernel(xp_ref, w1_ref, b1_ref, w2_ref, b2_ref,
                              wf1_ref, bf1_ref, wf2_ref, bf2_ref, o_ref):
    f32, bf16 = jnp.float32, jnp.bfloat16
    tb = xp_ref.shape[0]

    # xp[b, p, q*28 + w] = x[b, 2p + q, w]  (rows 14..17 are zero padding)
    xp = xp_ref[...].astype(bf16)                                # (TB, 18, 56)

    # ---- conv1 (5x5, 1->10) as ONE fused matmul --------------------------
    # lhs1[b, t, m*28 + wi] = x[b, 2t + m, wi]   (t = pool1 row, m = j + kh)
    lhs1 = jnp.concatenate(
        [xp[:, (m // 2):(m // 2) + 16, (m % 2) * 28:(m % 2) * 28 + 28]
         for m in range(6)], axis=2)                             # (TB, 16, 168)
    lhs1 = lhs1.reshape(tb * 16, 168)
    y1 = jnp.dot(lhs1, w1_ref[...], preferred_element_type=f32)  # (TB*16, 512)
    y1 = jnp.maximum(y1 + b1_ref[...], 0.0)
    # y1[b*16 + t, j*256 + co*24 + wo] = relu(conv1)[b, co, 2t + j, wo]

    # ---- maxpool1 2x2: rows = max over the two 256-lane (j) halves,
    #      columns = shift-and-max; even-column selection is folded into W2b.
    r1 = jnp.maximum(y1[:, 0:256], y1[:, 256:512])               # (TB*16, 256)
    c1 = jnp.concatenate(
        [jnp.maximum(r1[:, 0:255], r1[:, 1:256]), r1[:, 255:256]],
        axis=1).astype(bf16)                                     # (TB*16, 256)
    # c1[b*16 + t, co*24 + 2s] = maxpool1[b, co, t, s]   (t<12, s<12 valid)

    # ---- conv2 (5x5, 10->20) as ONE fused matmul --------------------------
    c1 = c1.reshape(tb, 16, 256)
    lhs2 = jnp.concatenate([c1[:, kh:kh + 8, :] for kh in range(5)],
                           axis=2)                               # (TB, 8, 1280)
    lhs2 = lhs2.reshape(tb * 8, 1280)
    y2 = jnp.dot(lhs2, w2_ref[...], preferred_element_type=f32)  # (TB*8, 256)
    y2 = jnp.maximum(y2 + b2_ref[...], 0.0)
    # y2[b*8 + ho, d*8 + wo] = relu(conv2)[b, d, ho, wo]   (lanes >= 160 are 0)

    # ---- maxpool2 2x2: rows = adjacent-sublane max inside each 8-row slab,
    #      columns = shift-and-max; even row/col selection folded into fc1.
    y2 = y2.reshape(tb, 8, 256)
    rr = jnp.maximum(y2[:, 0:7, :], y2[:, 1:8, :])               # (TB, 7, 256)
    cc = jnp.concatenate(
        [jnp.maximum(rr[:, :, 0:255], rr[:, :, 1:256]), rr[:, :, 255:256]],
        axis=2).astype(bf16)                                     # (TB, 7, 256)
    # cc[b, 2v, d*8 + 2s] = maxpool2[b, d, v, s]

    # ---- fc1 (NO ReLU, matching the reference forward) --------------------
    h = bf1_ref[...]                                             # (1, 50) f32
    for v in range(4):
        h = h + jnp.dot(cc[:, 2 * v, :], wf1_ref[v],
                        preferred_element_type=f32)              # (TB, 50)

    # ---- fc2 + softmax(dim=1) ---------------------------------------------
    logits = jnp.dot(h.astype(bf16), wf2_ref[...],
                     preferred_element_type=f32) + bf2_ref[...]  # (TB, 10)
    z = logits - jnp.max(logits, axis=1, keepdims=True)
    e = jnp.exp(z)
    denom = jnp.sum(e, axis=1, keepdims=True)
    o_ref[...] = (e * pl.reciprocal(denom, approx=True)).astype(o_ref.dtype)


# -------------------- host-side one-time weight restructuring ---------------

def prepare_params(params):
    """Rebuild the torch weights as banded / permuted matrices matching the
    kernel's activation layouts.  Pure numpy, runs once at setup time."""
    w1 = np.asarray(params["conv1_w"], np.float32)   # (10, 1, 5, 5)
    b1 = np.asarray(params["conv1_b"], np.float32)   # (10,)
    w2 = np.asarray(params["conv2_w"], np.float32)   # (20, 10, 5, 5)
    b2 = np.asarray(params["conv2_b"], np.float32)   # (20,)
    fw1 = np.asarray(params["fc1_w"], np.float32)    # (50, 320)
    fb1 = np.asarray(params["fc1_b"], np.float32)    # (50,)
    fw2 = np.asarray(params["fc2_w"], np.float32)    # (10, 50)
    fb2 = np.asarray(params["fc2_b"], np.float32)    # (10,)

    # conv1: rows = m*28 + wi (m = j + kh), cols = j*256 + co*24 + wo.
    w1b = np.zeros((168, 512), np.float32)
    b1row = np.zeros((1, 512), np.float32)
    for j in range(2):
        for co in range(10):
            for wo in range(24):
                b1row[0, j * 256 + co * 24 + wo] = b1[co]
                for kh in range(5):
                    m = j + kh
                    for kw in range(5):
                        w1b[m * 28 + wo + kw, j * 256 + co * 24 + wo] = w1[co, 0, kh, kw]

    # conv2: rows = kh*256 + c*24 + 2*(wo+kw)  (even columns of pool1),
    #        cols = d*8 + wo.
    w2b = np.zeros((1280, 256), np.float32)
    b2row = np.zeros((1, 256), np.float32)
    for d in range(20):
        for wo in range(8):
            b2row[0, d * 8 + wo] = b2[d]
            for c in range(10):
                for kh in range(5):
                    for kw in range(5):
                        w2b[kh * 256 + c * 24 + 2 * (wo + kw), d * 8 + wo] = w2[d, c, kh, kw]

    # fc1: per pooled row v, rows = d*8 + 2s (even rows/cols of pool2),
    # matching torch.flatten order k = d*16 + v*4 + s.
    wf1 = np.zeros((4, 256, 50), np.float32)
    for v in range(4):
        for d in range(20):
            for s in range(4):
                wf1[v, d * 8 + 2 * s, :] = fw1[:, d * 16 + v * 4 + s]

    return {
        "w1b": jnp.asarray(w1b, jnp.bfloat16),
        "b1": jnp.asarray(b1row, jnp.float32),
        "w2b": jnp.asarray(w2b, jnp.bfloat16),
        "b2": jnp.asarray(b2row, jnp.float32),
        "wf1": jnp.asarray(wf1, jnp.bfloat16),
        "bf1": jnp.asarray(fb1[None, :], jnp.float32),
        "wf2": jnp.asarray(fw2.T, jnp.bfloat16),
        "bf2": jnp.asarray(fb2[None, :], jnp.float32),
    }


# -------------------------------- wrapper -----------------------------------

def symbol_classifier_forward(x, prepared, block_b=None):
    B = x.shape[0]
    assert x.shape[1:] == (1, 28, 28)

    # Pair consecutive image rows into lanes: xp[b, p, q*28 + w] = x[b, 0, 2p+q, w].
    xp = x.astype(jnp.float32).reshape(B, 14, 56)

    if block_b is None:
        block_b = min(64, _round_up(B, 8))
    tb = max(8, _round_up(block_b, 8))
    b_pad = _round_up(B, tb)
    # +4 zero rows so every in-kernel 16-row window slice stays in bounds.
    xp = jnp.pad(xp, ((0, b_pad - B), (0, 4), (0, 0)))           # (b_pad, 18, 56)

    def const_spec(a):
        zeros = (0,) * a.ndim
        return pl.BlockSpec(a.shape, lambda g, zeros=zeros: zeros)

    p = prepared
    out = pl.pallas_call(
        _symbol_classifier_kernel,
        out_shape=jax.ShapeDtypeStruct((b_pad, 10), jnp.float32),
        grid=(b_pad // tb,),
        in_specs=[
            pl.BlockSpec((tb, 18, 56), lambda g: (g, 0, 0)),
            const_spec(p["w1b"]), const_spec(p["b1"]),
            const_spec(p["w2b"]), const_spec(p["b2"]),
            const_spec(p["wf1"]), const_spec(p["bf1"]),
            const_spec(p["wf2"]), const_spec(p["bf2"]),
        ],
        out_specs=pl.BlockSpec((tb, 10), lambda g: (g, 0)),
        compiler_params=pltpu.CompilerParams(
            dimension_semantics=("parallel",),
            vmem_limit_bytes=32 * 1024 * 1024,
        ),
    )(xp, p["w1b"], p["b1"], p["w2b"], p["b2"],
      p["wf1"], p["bf1"], p["wf2"], p["bf2"])
    return out[:B]


# --------------------------- pure-JAX reference ------------------------------

def reference_forward(x, params):
    dn = ("NCHW", "OIHW", "NCHW")
    y = jax.lax.conv_general_dilated(x, params["conv1_w"], (1, 1), "VALID",
                                     dimension_numbers=dn)
    y = jnp.maximum(y + params["conv1_b"][None, :, None, None], 0.0)
    y = jax.lax.reduce_window(y, -jnp.inf, jax.lax.max, (1, 1, 2, 2),
                              (1, 1, 2, 2), "VALID")
    y = jax.lax.conv_general_dilated(y, params["conv2_w"], (1, 1), "VALID",
                                     dimension_numbers=dn)
    y = jnp.maximum(y + params["conv2_b"][None, :, None, None], 0.0)
    y = jax.lax.reduce_window(y, -jnp.inf, jax.lax.max, (1, 1, 2, 2),
                              (1, 1, 2, 2), "VALID")
    flat = y.reshape(y.shape[0], -1)
    h = flat @ params["fc1_w"].T + params["fc1_b"]
    logits = h @ params["fc2_w"].T + params["fc2_b"]
    return jax.nn.softmax(logits, axis=1)


# ----------------------------------- main ------------------------------------

if __name__ == "__main__":
    key = jax.random.PRNGKey(0)
    ks = jax.random.split(key, 9)
    params = {
        "conv1_w": 0.1 * jax.random.normal(ks[0], (10, 1, 5, 5), jnp.float32),
        "conv1_b": 0.1 * jax.random.normal(ks[1], (10,), jnp.float32),
        "conv2_w": 0.1 * jax.random.normal(ks[2], (20, 10, 5, 5), jnp.float32),
        "conv2_b": 0.1 * jax.random.normal(ks[3], (20,), jnp.float32),
        "fc1_w": 0.1 * jax.random.normal(ks[4], (50, 320), jnp.float32),
        "fc1_b": 0.1 * jax.random.normal(ks[5], (50,), jnp.float32),
        "fc2_w": 0.1 * jax.random.normal(ks[6], (10, 50), jnp.float32),
        "fc2_b": 0.1 * jax.random.normal(ks[7], (10,), jnp.float32),
    }
    # Input consistent with fc1(320): NCHW (B, 1, 28, 28).  B=32 with a batch
    # block of 16 exercises a 2-step "parallel" grid with resident weights.
    x = jax.random.normal(ks[8], (32, 1, 28, 28), jnp.float32)

    prepared = prepare_params(params)
    fwd = jax.jit(lambda xx, pp: symbol_classifier_forward(xx, pp, block_b=16))
    out = jax.block_until_ready(fwd(x, prepared))

    assert out.shape == (32, 10)
    # Rows sum to ~1 (approx-reciprocal softmax denominator -> loose check).
    assert bool(jnp.all(jnp.abs(jnp.sum(out, axis=1) - 1.0) < 1e-2))

    ref = jax.block_until_ready(jax.jit(reference_forward)(x, params))
    max_diff = float(jnp.max(jnp.abs(out - ref)))
    # bf16 matmul operands + approx reciprocal give O(1e-3) deviations; a
    # layout/indexing bug would show up as O(0.1) differences.
    assert max_diff < 2e-2, f"mismatch vs reference: {max_diff}"
    print("KERNEL_OK")
</pallas_src>

<mosaic_0001>
module attributes {stable_mosaic.version = 11 : i64} {
  func.func @_symbol_classifier_kernel(%arg0: i32, %arg1: memref<16x18x56xf32, #tpu.memory_space<vmem>>, %arg2: memref<168x512xbf16, #tpu.memory_space<vmem>>, %arg3: memref<1x512xf32, #tpu.memory_space<vmem>>, %arg4: memref<1280x256xbf16, #tpu.memory_space<vmem>>, %arg5: memref<1x256xf32, #tpu.memory_space<vmem>>, %arg6: memref<4x256x50xbf16, #tpu.memory_space<vmem>>, %arg7: memref<1x50xf32, #tpu.memory_space<vmem>>, %arg8: memref<50x10xbf16, #tpu.memory_space<vmem>>, %arg9: memref<1x10xf32, #tpu.memory_space<vmem>>, %arg10: memref<16x10xf32, #tpu.memory_space<vmem>>) attributes {dimension_semantics = [#tpu.dimension_semantics<parallel>], iteration_bounds = array<i64: 2>, scalar_prefetch = 0 : i64, scratch_operands = 0 : i64, tpu.core_type = #tpu.core_type<tc>, window_params = [{transform_indices = @transform_0, window_bounds = array<i64: 16, 18, 56>}, {pipeline_mode = #tpu.pipeline_mode<synchronous>, transform_indices = @transform_1, window_bounds = array<i64: 168, 512>}, {pipeline_mode = #tpu.pipeline_mode<synchronous>, transform_indices = @transform_2, window_bounds = array<i64: 1, 512>}, {pipeline_mode = #tpu.pipeline_mode<synchronous>, transform_indices = @transform_3, window_bounds = array<i64: 1280, 256>}, {pipeline_mode = #tpu.pipeline_mode<synchronous>, transform_indices = @transform_4, window_bounds = array<i64: 1, 256>}, {pipeline_mode = #tpu.pipeline_mode<synchronous>, transform_indices = @transform_5, window_bounds = array<i64: 4, 256, 50>}, {pipeline_mode = #tpu.pipeline_mode<synchronous>, transform_indices = @transform_6, window_bounds = array<i64: 1, 50>}, {pipeline_mode = #tpu.pipeline_mode<synchronous>, transform_indices = @transform_7, window_bounds = array<i64: 50, 10>}, {pipeline_mode = #tpu.pipeline_mode<synchronous>, transform_indices = @transform_8, window_bounds = array<i64: 1, 10>}, {transform_indices = @transform_9, window_bounds = array<i64: 16, 10>}]} {
    %c0 = arith.constant 0 : index
    %c0_0 = arith.constant 0 : index
    %c0_1 = arith.constant 0 : index
    %0 = vector.load %arg1[%c0, %c0_0, %c0_1] : memref<16x18x56xf32, #tpu.memory_space<vmem>>, vector<16x18x56xf32>
    %1 = arith.truncf %0 : vector<16x18x56xf32> to vector<16x18x56xbf16>
    %2 = vector.extract_strided_slice %1 {offsets = [0, 0, 0], sizes = [16, 16, 28], strides = [1, 1, 1]} : vector<16x18x56xbf16> to vector<16x16x28xbf16>
    %3 = vector.extract_strided_slice %1 {offsets = [0, 0, 28], sizes = [16, 16, 28], strides = [1, 1, 1]} : vector<16x18x56xbf16> to vector<16x16x28xbf16>
    %4 = vector.extract_strided_slice %1 {offsets = [0, 1, 0], sizes = [16, 16, 28], strides = [1, 1, 1]} : vector<16x18x56xbf16> to vector<16x16x28xbf16>
    %5 = vector.extract_strided_slice %1 {offsets = [0, 1, 28], sizes = [16, 16, 28], strides = [1, 1, 1]} : vector<16x18x56xbf16> to vector<16x16x28xbf16>
    %6 = vector.extract_strided_slice %1 {offsets = [0, 2, 0], sizes = [16, 16, 28], strides = [1, 1, 1]} : vector<16x18x56xbf16> to vector<16x16x28xbf16>
    %7 = vector.extract_strided_slice %1 {offsets = [0, 2, 28], sizes = [16, 16, 28], strides = [1, 1, 1]} : vector<16x18x56xbf16> to vector<16x16x28xbf16>
    %8 = tpu.concatenate %2, %3, %4, %5, %6, %7 in 2 : vector<16x16x28xbf16>, vector<16x16x28xbf16>, vector<16x16x28xbf16>, vector<16x16x28xbf16>, vector<16x16x28xbf16>, vector<16x16x28xbf16> -> vector<16x16x168xbf16>
    %9 = vector.shape_cast %8 : vector<16x16x168xbf16> to vector<256x168xbf16>
    %c0_2 = arith.constant 0 : index
    %c0_3 = arith.constant 0 : index
    %10 = vector.load %arg2[%c0_2, %c0_3] : memref<168x512xbf16, #tpu.memory_space<vmem>>, vector<168x512xbf16>
    %cst = arith.constant dense<0.000000e+00> : vector<256x512xf32>
    %11 = tpu.matmul %9, %10, %cst {dimension_numbers = #tpu.dot_dimension_numbers<[1], [0], [0], [1], [0, 0, 1, 1], [], []>} : vector<256x168xbf16>, vector<168x512xbf16>, vector<256x512xf32> -> vector<256x512xf32>
    %c0_4 = arith.constant 0 : index
    %c0_5 = arith.constant 0 : index
    %12 = vector.load %arg3[%c0_4, %c0_5] : memref<1x512xf32, #tpu.memory_space<vmem>>, vector<1x512xf32>
    %13 = vector.broadcast %12 : vector<1x512xf32> to vector<256x512xf32>
    %14 = arith.addf %11, %13 : vector<256x512xf32>
    %cst_6 = arith.constant 0.000000e+00 : f32
    %15 = vector.broadcast %cst_6 : f32 to vector<256x512xf32>
    %16 = arith.maximumf %14, %15 : vector<256x512xf32>
    %17 = vector.extract_strided_slice %16 {offsets = [0, 0], sizes = [256, 256], strides = [1, 1]} : vector<256x512xf32> to vector<256x256xf32>
    %18 = vector.extract_strided_slice %16 {offsets = [0, 256], sizes = [256, 256], strides = [1, 1]} : vector<256x512xf32> to vector<256x256xf32>
    %19 = arith.maximumf %17, %18 : vector<256x256xf32>
    %20 = vector.extract_strided_slice %19 {offsets = [0, 0], sizes = [256, 255], strides = [1, 1]} : vector<256x256xf32> to vector<256x255xf32>
    %21 = vector.extract_strided_slice %19 {offsets = [0, 1], sizes = [256, 255], strides = [1, 1]} : vector<256x256xf32> to vector<256x255xf32>
    %22 = arith.maximumf %20, %21 : vector<256x255xf32>
    %23 = vector.extract_strided_slice %19 {offsets = [0, 255], sizes = [256, 1], strides = [1, 1]} : vector<256x256xf32> to vector<256x1xf32>
    %24 = tpu.concatenate %22, %23 in 1 : vector<256x255xf32>, vector<256x1xf32> -> vector<256x256xf32>
    %25 = arith.truncf %24 : vector<256x256xf32> to vector<256x256xbf16>
    %26 = vector.shape_cast %25 : vector<256x256xbf16> to vector<16x16x256xbf16>
    %27 = vector.extract_strided_slice %26 {offsets = [0, 0, 0], sizes = [16, 8, 256], strides = [1, 1, 1]} : vector<16x16x256xbf16> to vector<16x8x256xbf16>
    %28 = vector.extract_strided_slice %26 {offsets = [0, 1, 0], sizes = [16, 8, 256], strides = [1, 1, 1]} : vector<16x16x256xbf16> to vector<16x8x256xbf16>
    %29 = vector.extract_strided_slice %26 {offsets = [0, 2, 0], sizes = [16, 8, 256], strides = [1, 1, 1]} : vector<16x16x256xbf16> to vector<16x8x256xbf16>
    %30 = vector.extract_strided_slice %26 {offsets = [0, 3, 0], sizes = [16, 8, 256], strides = [1, 1, 1]} : vector<16x16x256xbf16> to vector<16x8x256xbf16>
    %31 = vector.extract_strided_slice %26 {offsets = [0, 4, 0], sizes = [16, 8, 256], strides = [1, 1, 1]} : vector<16x16x256xbf16> to vector<16x8x256xbf16>
    %32 = tpu.concatenate %27, %28, %29, %30, %31 in 2 : vector<16x8x256xbf16>, vector<16x8x256xbf16>, vector<16x8x256xbf16>, vector<16x8x256xbf16>, vector<16x8x256xbf16> -> vector<16x8x1280xbf16>
    %33 = vector.shape_cast %32 : vector<16x8x1280xbf16> to vector<128x1280xbf16>
    %c0_7 = arith.constant 0 : index
    %c0_8 = arith.constant 0 : index
    %34 = vector.load %arg4[%c0_7, %c0_8] : memref<1280x256xbf16, #tpu.memory_space<vmem>>, vector<1280x256xbf16>
    %cst_9 = arith.constant dense<0.000000e+00> : vector<128x256xf32>
    %35 = tpu.matmul %33, %34, %cst_9 {dimension_numbers = #tpu.dot_dimension_numbers<[1], [0], [0], [1], [0, 0, 1, 1], [], []>} : vector<128x1280xbf16>, vector<1280x256xbf16>, vector<128x256xf32> -> vector<128x256xf32>
    %c0_10 = arith.constant 0 : index
    %c0_11 = arith.constant 0 : index
    %36 = vector.load %arg5[%c0_10, %c0_11] : memref<1x256xf32, #tpu.memory_space<vmem>>, vector<1x256xf32>
    %37 = vector.broadcast %36 : vector<1x256xf32> to vector<128x256xf32>
    %38 = arith.addf %35, %37 : vector<128x256xf32>
    %cst_12 = arith.constant 0.000000e+00 : f32
    %39 = vector.broadcast %cst_12 : f32 to vector<128x256xf32>
    %40 = arith.maximumf %38, %39 : vector<128x256xf32>
    %41 = vector.shape_cast %40 : vector<128x256xf32> to vector<16x8x256xf32>
    %42 = vector.extract_strided_slice %41 {offsets = [0, 0, 0], sizes = [16, 7, 256], strides = [1, 1, 1]} : vector<16x8x256xf32> to vector<16x7x256xf32>
    %43 = vector.extract_strided_slice %41 {offsets = [0, 1, 0], sizes = [16, 7, 256], strides = [1, 1, 1]} : vector<16x8x256xf32> to vector<16x7x256xf32>
    %44 = arith.maximumf %42, %43 : vector<16x7x256xf32>
    %45 = vector.extract_strided_slice %44 {offsets = [0, 0, 0], sizes = [16, 7, 255], strides = [1, 1, 1]} : vector<16x7x256xf32> to vector<16x7x255xf32>
    %46 = vector.extract_strided_slice %44 {offsets = [0, 0, 1], sizes = [16, 7, 255], strides = [1, 1, 1]} : vector<16x7x256xf32> to vector<16x7x255xf32>
    %47 = arith.maximumf %45, %46 : vector<16x7x255xf32>
    %48 = vector.extract_strided_slice %44 {offsets = [0, 0, 255], sizes = [16, 7, 1], strides = [1, 1, 1]} : vector<16x7x256xf32> to vector<16x7x1xf32>
    %49 = tpu.concatenate %47, %48 in 2 : vector<16x7x255xf32>, vector<16x7x1xf32> -> vector<16x7x256xf32>
    %50 = arith.truncf %49 : vector<16x7x256xf32> to vector<16x7x256xbf16>
    %c0_13 = arith.constant 0 : index
    %c0_14 = arith.constant 0 : index
    %51 = vector.load %arg7[%c0_13, %c0_14] : memref<1x50xf32, #tpu.memory_space<vmem>>, vector<1x50xf32>
    %52 = vector.extract_strided_slice %50 {offsets = [0, 0, 0], sizes = [16, 1, 256], strides = [1, 1, 1]} : vector<16x7x256xbf16> to vector<16x1x256xbf16>
    %53 = vector.shape_cast %52 : vector<16x1x256xbf16> to vector<16x256xbf16>
    %c0_15 = arith.constant 0 : index
    %c0_16 = arith.constant 0 : index
    %c0_17 = arith.constant 0 : index
    %54 = vector.load %arg6[%c0_15, %c0_16, %c0_17] : memref<4x256x50xbf16, #tpu.memory_space<vmem>>, vector<1x256x50xbf16>
    %55 = vector.shape_cast %54 : vector<1x256x50xbf16> to vector<256x50xbf16>
    %cst_18 = arith.constant dense<0.000000e+00> : vector<16x50xf32>
    %56 = tpu.matmul %53, %55, %cst_18 {dimension_numbers = #tpu.dot_dimension_numbers<[1], [0], [0], [1], [0, 0, 1, 1], [], []>} : vector<16x256xbf16>, vector<256x50xbf16>, vector<16x50xf32> -> vector<16x50xf32>
    %57 = vector.broadcast %51 : vector<1x50xf32> to vector<16x50xf32>
    %58 = arith.addf %57, %56 : vector<16x50xf32>
    %59 = vector.extract_strided_slice %50 {offsets = [0, 2, 0], sizes = [16, 1, 256], strides = [1, 1, 1]} : vector<16x7x256xbf16> to vector<16x1x256xbf16>
    %60 = vector.shape_cast %59 : vector<16x1x256xbf16> to vector<16x256xbf16>
    %c1 = arith.constant 1 : index
    %c0_19 = arith.constant 0 : index
    %c0_20 = arith.constant 0 : index
    %61 = vector.load %arg6[%c1, %c0_19, %c0_20] : memref<4x256x50xbf16, #tpu.memory_space<vmem>>, vector<1x256x50xbf16>
    %62 = vector.shape_cast %61 : vector<1x256x50xbf16> to vector<256x50xbf16>
    %cst_21 = arith.constant dense<0.000000e+00> : vector<16x50xf32>
    %63 = tpu.matmul %60, %62, %cst_21 {dimension_numbers = #tpu.dot_dimension_numbers<[1], [0], [0], [1], [0, 0, 1, 1], [], []>} : vector<16x256xbf16>, vector<256x50xbf16>, vector<16x50xf32> -> vector<16x50xf32>
    %64 = arith.addf %58, %63 : vector<16x50xf32>
    %65 = vector.extract_strided_slice %50 {offsets = [0, 4, 0], sizes = [16, 1, 256], strides = [1, 1, 1]} : vector<16x7x256xbf16> to vector<16x1x256xbf16>
    %66 = vector.shape_cast %65 : vector<16x1x256xbf16> to vector<16x256xbf16>
    %c2 = arith.constant 2 : index
    %c0_22 = arith.constant 0 : index
    %c0_23 = arith.constant 0 : index
    %67 = vector.load %arg6[%c2, %c0_22, %c0_23] : memref<4x256x50xbf16, #tpu.memory_space<vmem>>, vector<1x256x50xbf16>
    %68 = vector.shape_cast %67 : vector<1x256x50xbf16> to vector<256x50xbf16>
    %cst_24 = arith.constant dense<0.000000e+00> : vector<16x50xf32>
    %69 = tpu.matmul %66, %68, %cst_24 {dimension_numbers = #tpu.dot_dimension_numbers<[1], [0], [0], [1], [0, 0, 1, 1], [], []>} : vector<16x256xbf16>, vector<256x50xbf16>, vector<16x50xf32> -> vector<16x50xf32>
    %70 = arith.addf %64, %69 : vector<16x50xf32>
    %71 = vector.extract_strided_slice %50 {offsets = [0, 6, 0], sizes = [16, 1, 256], strides = [1, 1, 1]} : vector<16x7x256xbf16> to vector<16x1x256xbf16>
    %72 = vector.shape_cast %71 : vector<16x1x256xbf16> to vector<16x256xbf16>
    %c3 = arith.constant 3 : index
    %c0_25 = arith.constant 0 : index
    %c0_26 = arith.constant 0 : index
    %73 = vector.load %arg6[%c3, %c0_25, %c0_26] : memref<4x256x50xbf16, #tpu.memory_space<vmem>>, vector<1x256x50xbf16>
    %74 = vector.shape_cast %73 : vector<1x256x50xbf16> to vector<256x50xbf16>
    %cst_27 = arith.constant dense<0.000000e+00> : vector<16x50xf32>
    %75 = tpu.matmul %72, %74, %cst_27 {dimension_numbers = #tpu.dot_dimension_numbers<[1], [0], [0], [1], [0, 0, 1, 1], [], []>} : vector<16x256xbf16>, vector<256x50xbf16>, vector<16x50xf32> -> vector<16x50xf32>
    %76 = arith.addf %70, %75 : vector<16x50xf32>
    %77 = arith.truncf %76 : vector<16x50xf32> to vector<16x50xbf16>
    %c0_28 = arith.constant 0 : index
    %c0_29 = arith.constant 0 : index
    %78 = vector.load %arg8[%c0_28, %c0_29] : memref<50x10xbf16, #tpu.memory_space<vmem>>, vector<50x10xbf16>
    %cst_30 = arith.constant dense<0.000000e+00> : vector<16x10xf32>
    %79 = tpu.matmul %77, %78, %cst_30 {dimension_numbers = #tpu.dot_dimension_numbers<[1], [0], [0], [1], [0, 0, 1, 1], [], []>} : vector<16x50xbf16>, vector<50x10xbf16>, vector<16x10xf32> -> vector<16x10xf32>
    %c0_31 = arith.constant 0 : index
    %c0_32 = arith.constant 0 : index
    %80 = vector.load %arg9[%c0_31, %c0_32] : memref<1x10xf32, #tpu.memory_space<vmem>>, vector<1x10xf32>
    %81 = vector.broadcast %80 : vector<1x10xf32> to vector<16x10xf32>
    %82 = arith.addf %79, %81 : vector<16x10xf32>
    %cst_33 = arith.constant dense<0xFF800000> : vector<16xf32>
    %83 = vector.multi_reduction <maximumf>, %82, %cst_33 [1] : vector<16x10xf32> to vector<16xf32>
    %84 = vector.shape_cast %83 : vector<16xf32> to vector<16x1xf32>
    %85 = vector.broadcast %84 : vector<16x1xf32> to vector<16x10xf32>
    %86 = arith.subf %82, %85 : vector<16x10xf32>
    %87 = math.exp %86 : vector<16x10xf32>
    %cst_34 = arith.constant dense<0.000000e+00> : vector<16xf32>
    %88 = vector.multi_reduction <add>, %87, %cst_34 [1] : vector<16x10xf32> to vector<16xf32>
    %89 = vector.shape_cast %88 : vector<16xf32> to vector<16x1xf32>
    %90 = tpu.reciprocal %89 {approx = true} : vector<16x1xf32> -> vector<16x1xf32>
    %91 = vector.broadcast %90 : vector<16x1xf32> to vector<16x10xf32>
    %92 = arith.mulf %87, %91 : vector<16x10xf32>
    %c0_35 = arith.constant 0 : index
    %c0_36 = arith.constant 0 : index
    %93 = vector.load %arg10[%c0_35, %c0_36] : memref<16x10xf32, #tpu.memory_space<vmem>>, vector<16x10xf32>
    tpu.vector_store %arg10[%c0_35, %c0_36], %92 {strides = array<i32>} : memref<16x10xf32, #tpu.memory_space<vmem>>, vector<16x10xf32>,
    return
  }
  func.func @transform_0(%arg0: i32) -> (i32, i32, i32) {
    %c0_i32 = arith.constant 0 : i32
    %c0_i32_0 = arith.constant 0 : i32
    %c0_i32_1 = arith.constant 0 : i32
    return %arg0, %c0_i32, %c0_i32_0 : i32, i32, i32
  }
  func.func @transform_1(%arg0: i32) -> (i32, i32) {
    %c0_i32 = arith.constant 0 : i32
    %c0_i32_0 = arith.constant 0 : i32
    %c0_i32_1 = arith.constant 0 : i32
    return %c0_i32, %c0_i32_0 : i32, i32
  }
  func.func @transform_2(%arg0: i32) -> (i32, i32) {
    %c0_i32 = arith.constant 0 : i32
    %c0_i32_0 = arith.constant 0 : i32
    %c0_i32_1 = arith.constant 0 : i32
    return %c0_i32, %c0_i32_0 : i32, i32
  }
  func.func @transform_3(%arg0: i32) -> (i32, i32) {
    %c0_i32 = arith.constant 0 : i32
    %c0_i32_0 = arith.constant 0 : i32
    %c0_i32_1 = arith.constant 0 : i32
    return %c0_i32, %c0_i32_0 : i32, i32
  }
  func.func @transform_4(%arg0: i32) -> (i32, i32) {
    %c0_i32 = arith.constant 0 : i32
    %c0_i32_0 = arith.constant 0 : i32
    %c0_i32_1 = arith.constant 0 : i32
    return %c0_i32, %c0_i32_0 : i32, i32
  }
  func.func @transform_5(%arg0: i32) -> (i32, i32, i32) {
    %c0_i32 = arith.constant 0 : i32
    %c0_i32_0 = arith.constant 0 : i32
    %c0_i32_1 = arith.constant 0 : i32
    %c0_i32_2 = arith.constant 0 : i32
    return %c0_i32, %c0_i32_0, %c0_i32_1 : i32, i32, i32
  }
  func.func @transform_6(%arg0: i32) -> (i32, i32) {
    %c0_i32 = arith.constant 0 : i32
    %c0_i32_0 = arith.constant 0 : i32
    %c0_i32_1 = arith.constant 0 : i32
    return %c0_i32, %c0_i32_0 : i32, i32
  }
  func.func @transform_7(%arg0: i32) -> (i32, i32) {
    %c0_i32 = arith.constant 0 : i32
    %c0_i32_0 = arith.constant 0 : i32
    %c0_i32_1 = arith.constant 0 : i32
    return %c0_i32, %c0_i32_0 : i32, i32
  }
  func.func @transform_8(%arg0: i32) -> (i32, i32) {
    %c0_i32 = arith.constant 0 : i32
    %c0_i32_0 = arith.constant 0 : i32
    %c0_i32_1 = arith.constant 0 : i32
    return %c0_i32, %c0_i32_0 : i32, i32
  }
  func.func @transform_9(%arg0: i32) -> (i32, i32) {
    %c0_i32 = arith.constant 0 : i32
    %c0_i32_0 = arith.constant 0 : i32
    return %arg0, %c0_i32 : i32, i32
  }
}

</mosaic_0001>

<bundles_post_ra>
// kernel: _lambda_.1
= control target key start
LH: loop header
LB: loop body
LE: loop exit
PB: predicated region body
PF: predicated region fallthrough
CT: control target
= control target key end

     0   :  { %s7474_s30 = smov 0   ;;  %s10981_s0 = inlined_call_operand.vmem [shape: f32[32,18,56], index: 0, kind: input, shape index: {}]   ;;  %s10982_s1 = inlined_call_operand.vmem [shape: bf16[168,512], index: 1, kind: input, shape index: {}]   ;;  %s10983_s2 = inlined_call_operand.vmem [shape: f32[1,512], index: 2, kind: input, shape index: {}]   ;;  %s10984_s3 = inlined_call_operand.vmem [shape: bf16[1280,256], index: 3, kind: input, shape index: {}]   ;;  %s10985_s4 = inlined_call_operand.vmem [shape: f32[1,256], index: 4, kind: input, shape index: {}]   ;;  %s10986_s5 = inlined_call_operand.vmem [shape: bf16[4,256,50], index: 5, kind: input, shape index: {}]   ;;  %s10987_s6 = inlined_call_operand.vmem [shape: f32[1,50], index: 6, kind: input, shape index: {}]   ;;  %s10988_s7 = inlined_call_operand.vmem [shape: bf16[50,10], index: 7, kind: input, shape index: {}]   ;;  %s10989_s8 = inlined_call_operand.vmem [shape: f32[1,10], index: 8, kind: input, shape index: {}]   ;;  %s10990_s9 = inlined_call_operand.vmem [shape: f32[32,10], index: 9, kind: output, shape index: {}]  }
   0x1 LB: > { %s6000_s10 = sadd.s32 4294967295, %s7417_s30   ;;  %p6004_p0 = scmp.ge.s32.totalorder %s7417_s30, 1  ;;  %s7417_s30 = sphi %s7474_s30, %s19_s30  }
   0x2   : > { %p289_p1 = scmp.lt.s32.totalorder %s7417_s30, 3 }
   0x4   : > { %p290_p2 = pnand %p6004_p0, %p289_p1 }
   0x6   : > { %293 = sbr.rel (%p290_p2) target bundleno = 2227 (0x8b3), region = 56 }
   0xd   : > { %s6005_s11 = sshll.u32 %s6000_s10, 4  ;;  %v7031_v0 = vld [vmem:[%s10982_s1 + $0x4] ss:$16 sps:$4 sm:$0xff]   ;;  %v7033_v1 = vld [vmem:[%s10982_s1] ss:$16 sps:$4 sm:$0xff]   ;;  %vm677_vm1 = vcmask 1046528  }
   0xe   : > { %p327_p3 = scmp.lt.s32.totalorder %s6005_s11, 31  ;;  %v7034_v2 = vld [vmem:[%s10982_s1 + $0x24] ss:$16 sps:$4 sm:$0xff]   ;;  %1177 = vmatprep.subr.bf16.mxu1 %v7031_v0  ;;  %v7036_v3 = vld [vmem:[%s10982_s1 + $0x20] ss:$16 sps:$4 sm:$0xff]   ;;  %s7419_s17 = smov 56  }
   0xf   : > { %1178 = vmatpush1.bf16.msra.mxu1 %v7033_v1  ;;  %v7037_v4 = vld [vmem:[%s10982_s1 + $0x44] ss:$16 sps:$4 sm:$0xff]   ;;  %v7039_v5 = vld [vmem:[%s10982_s1 + $0x40] ss:$16 sps:$4 sm:$0xff]   ;;  %vm420_vm0 = vsmask.f32 7424 }
  0x10   : > { %s11361_s11 = smov (!%p327_p3, %s6005_s11), 31  ;;  %1179 = vmatprep.subr.bf16.mxu1 %v7034_v2  ;;  %v7040_v6 = vld [vmem:[%s10982_s1 + $0x64] ss:$16 sps:$4 sm:$0xff]   ;;  %v7042_v18 = vld [vmem:[%s10982_s1 + $0x60] ss:$16 sps:$4 sm:$0xff]   ;;  %s7420_s18 = smov 112  }
  0x11   : > { %s6777_s20 = smul.u32 24, %s11361_s11  ;;  %v7043_v33 = vld [vmem:[%s10982_s1 + $0x84] ss:$16 sps:$4 sm:$0xff]   ;;  %v7045_v47 = vld [vmem:[%s10982_s1 + $0x80] ss:$16 sps:$4 sm:$0xff]   ;;  %vm1164_vm2 = vcmask 1043456  }
  0x12   : > { %vm758_vm3 = vcmask 457728   ;;  %vm791_vm4 = vcmask 687104   ;;  %vm1131_vm5 = vcmask 326656   ;;  %vm808_vm6 = vcmask 916480   ;;  %s7421_s19 = smov 127   ;;  %s6007_s13 = sshll.u32 %s6000_s10, 1 }
  0x13   : > { %s7505_s27 = scalar_lea.vmem %s10981_s0, %s6777_s20  ;;  %1180 = vmatpush1.bf16.msra.mxu1 %v7036_v3  ;;  %vm1947_vm7 = vcmask 1039360   ;;  %vm4927_vm8 = vcmask 1041409   ;;  %vm4930_vm9 = vcmask 1042434   ;;  %vm4933_vm10 = vcmask 1043459   ;;  %p334_p4 = scmp.lt.s32.totalorder %s6007_s13, 3 }
  0x14   : > { %v340_v7 = vld [vmem:[%s7505_s27] sm:$0xff]  ;;  %v341_v8 = vld [vmem:[%s7505_s27 + $0x8] sm:$0xff]  ;;  %v342_v9 = vld [vmem:[%s7505_s27 + $0x10] sm:$0x3]  ;;  %1181 = vmatprep.subr.bf16.mxu1 %v7037_v4  ;;  %vm4936_vm11 = vcmask 1044484   ;;  %vm4939_vm12 = vcmask 1045509  }
  0x15   : > { %v7513_v10 = vpack.c.bf16 %v341_v8, %v340_v7  ;;  %v389_v11 = vpack.c.bf16 %v342_v9, %v342_v9  ;;  %v343_v12 = vld [vmem:[%s7505_s27 + $0x18] sm:$0xff]  ;;  %v344_v13 = vld [vmem:[%s7505_s27 + $0x20] sm:$0xff]  ;;  %v345_v14 = vld [vmem:[%s7505_s27 + $0x28] sm:$0x3]  ;;  %vm4942_vm13 = vcmask 1046534   ;;  %vm4945_vm14 = vcmask 1047559  }
  0x16   : > { %v7518_v15 = vpack.c.bf16 %v344_v13, %v343_v12  ;;  %v391_v16 = vpack.c.bf16 %v345_v14, %v345_v14  ;;  %v346_v17 = vld [vmem:[%s7505_s27 + $0x30] sm:$0xff]  ;;  %v347_v22 = vld [vmem:[%s7505_s27 + $0x38] sm:$0xff]  ;;  %v348_v23 = vld [vmem:[%s7505_s27 + $0x40] sm:$0x3]  ;;  %vm5874_vm15 = vcmask 1040384   ;;  %s11363_s13 = smov (!%p334_p4, %s6007_s13), 3 }
  0x17   : > { %v422_v19 = vshrl.u32 %v7513_v10, 16  ;;  %v424_v20 = vshll.u32 %v7513_v10, 16  ;;  %v429_v21 = vshll.u32 %v389_v11, 16  ;;  %v349_v27 = vld [vmem:[%s7505_s27 + $0x48] sm:$0xff]  ;;  %v350_v28 = vld [vmem:[%s7505_s27 + $0x50] sm:$0xff]  ;;  %1182 = vmatpush1.bf16.msra.mxu1 %v7039_v5  ;;  %v678_v31 = vrot.slane %v7513_v10, 1 }
  0x18   : > { %v434_v24 = vshrl.u32 %v7518_v15, 16  ;;  %v436_v25 = vshll.u32 %v7518_v15, 16  ;;  %v441_v26 = vshll.u32 %v391_v16, 16  ;;  %v679_v32 = vrot.slane %v389_v11, 1  ;;  %1183 = vmatprep.subr.bf16.mxu1 %v7040_v6  ;;  %v351_v38 = vld [vmem:[%s7505_s27 + $0x58] sm:$0x3] }
  0x19   : > { %v426_v29 = vrot.slane %v424_v20, 1  ;;  %v431_v30 = vrot.slane %v429_v21, 1  ;;  %v681_v36 = vrot.slane %v7518_v15, 1  ;;  %v7537_v37 = vpack.c.bf16 %v347_v22, %v346_v17  ;;  %v352_v46 = vld [vmem:[%s7505_s27 + $0x60] sm:$0xff]  ;;  %v353_v52 = vld [vmem:[%s7505_s27 + $0x68] sm:$0xff]  ;;  %v355_v54 = vld [vmem:[%s7505_s27 + $0x78] sm:$0xff] }
  0x1a   : > { %v438_v34 = vrot.slane %v436_v25, 1  ;;  %v443_v35 = vrot.slane %v441_v26, 1  ;;  %v682_v40 = vrot.slane %v391_v16, 1  ;;  %v393_v41 = vpack.c.bf16 %v348_v23, %v348_v23  ;;  %v354_v53 = vld [vmem:[%s7505_s27 + $0x70] sm:$0x3]  ;;  %v356_v59 = vld [vmem:[%s7505_s27 + $0x80] sm:$0xff] }
  0x1b   : > { %v427_v39 = vor.u32 %v426_v29, %v422_v19  ;;  %v7540_v42 = vpack.c.bf16 %v350_v28, %v349_v27  ;;  %v446_v44 = vshrl.u32 %v7537_v37, 16  ;;  %v448_v45 = vshll.u32 %v7537_v37, 16  ;;  %1184 = vmatpush1.bf16.msra.mxu1 %v7042_v18  ;;  %v357_v60 = vld [vmem:[%s7505_s27 + $0x88] sm:$0x3]  ;;  %v358_v8 = vld [vmem:[%s7505_s27 + $0x90] sm:$0xff]  ;;  %v359_v12 = vld [vmem:[%s7505_s27 + $0x98] sm:$0xff] }
  0x1c   : > { %v439_v43 = vor.u32 %v438_v34, %v434_v24  ;;  %v680_v49 = vsel %vm677_vm1, %v678_v31, %v679_v32  ;;  %v453_v50 = vshll.u32 %v393_v41, 16  ;;  %v7550_v51 = vpack.c.bf16 %v351_v38, %v351_v38  ;;  %1185 = vmatprep.subr.bf16.mxu1 %v7043_v33  ;;  %v7046_v13 = vld [vmem:[%s10982_s1 + $0xa4] ss:$16 sps:$4 sm:$0xff]   ;;  %v7048_v14 = vld [vmem:[%s10982_s1 + $0xa0] ss:$16 sps:$4 sm:$0xff]   ;;  %v361_v25 = vld [vmem:[%s7505_s27 + $0xa8] sm:$0xff] }
  0x1d   : > { %v432_v48 = vsel %vm420_vm0, %v427_v39, %v431_v30  ;;  %v450_v56 = vrot.slane %v448_v45, 1  ;;  %v458_v57 = vshrl.u32 %v7540_v42, 16  ;;  %v460_v58 = vshll.u32 %v7540_v42, 16  ;;  %v360_v20 = vld [vmem:[%s7505_s27 + $0xa0] sm:$0x3]  ;;  %v362_v26 = vld [vmem:[%s7505_s27 + $0xb0] sm:$0xff] }
  0x1e   : > { %613 = vrot.lane.b32.xlu0 %v432_v48, %s7419_s17  ;;  %v444_v55 = vsel %vm420_vm0, %v439_v43, %v443_v35  ;;  %v683_v61 = vsel %vm677_vm1, %v681_v36, %v682_v40  ;;  %v455_v62 = vrot.slane %v453_v50, 1  ;;  %v684_v63 = vrot.slane %v7537_v37, 1  ;;  %v7049_v30 = vld [vmem:[%s10982_s1 + $0xc4] ss:$16 sps:$4 sm:$0xff]   ;;  %v7051_v34 = vld [vmem:[%s10982_s1 + $0xc0] ss:$16 sps:$4 sm:$0xff]  }
  0x1f   : > { %615 = vrot.lane.b32.xlu1 %v444_v55, %s7419_s17  ;;  %v465_v0 = vshll.u32 %v7550_v51, 16  ;;  %v451_v1 = vor.u32 %v450_v56, %v446_v44  ;;  %v685_v2 = vrot.slane %v393_v41, 1  ;;  %v462_v3 = vrot.slane %v460_v58, 1  ;;  %1186 = vmatpush1.bf16.msra.mxu1 %v7045_v47  ;;  %v363_v39 = vld [vmem:[%s7505_s27 + $0xb8] sm:$0x3]  ;;  %v364_v47 = vld [vmem:[%s7505_s27 + $0xc0] sm:$0xff] }
  0x20   : > { %v7565_v4 = vpack.c.bf16 %v353_v52, %v352_v46  ;;  %v7567_v5 = vpack.c.bf16 %v354_v53, %v354_v53  ;;  %v7569_v6 = vpack.c.bf16 %v356_v59, %v355_v54  ;;  %v7571_v7 = vpack.c.bf16 %v357_v60, %v357_v60  ;;  %1187 = vmatprep.subr.bf16.mxu1 %v7046_v13  ;;  %v7052_v41 = vld [vmem:[%s10982_s1 + $0xe4] ss:$16 sps:$4 sm:$0xff]   ;;  %v365_v50 = vld [vmem:[%s7505_s27 + $0xc8] sm:$0xff]  ;;  %v367_v59 = vld [vmem:[%s7505_s27 + $0xd8] sm:$0xff]  ;;  %s6008_s14 = sshll.u32 %s11363_s13, 3 }
  0x21   : > { %v463_v9 = vor.u32 %v462_v3, %v458_v57  ;;  %v467_v11 = vrot.slane %v465_v0, 1  ;;  %v456_v16 = vsel %vm420_vm0, %v451_v1, %v455_v62  ;;  %v686_v21 = vsel %vm677_vm1, %v684_v63, %v685_v2  ;;  %v7055_v56 = vld [vmem:[%s10982_s1 + $0x104] ss:$16 sps:$4 sm:$0xff]   ;;  %v366_v0 = vld [vmem:[%s7505_s27 + $0xd0] sm:$0x3]  ;;  %s337_s20 = scalar_lea.vmem %s10990_s9, %s6008_s14 }
  0x22   : > { %726 = vrot.lane.b32.xlu0 %v680_v49, %s7420_s18  ;;  %v470_v17 = vshrl.u32 %v7565_v4, 16  ;;  %v472_v18 = vshll.u32 %v7565_v4, 16  ;;  %v477_v19 = vshll.u32 %v7567_v5, 16  ;;  %v687_v22 = vrot.slane %v7540_v42, 1  ;;  %v368_v60 = vld [vmem:[%s7505_s27 + $0xe0] sm:$0xff] }
  0x23   : > { %728 = vrot.lane.b32.xlu1 %v683_v61, %s7420_s18  ;;  %v688_v23 = vrot.slane %v7550_v51, 1  ;;  %v484_v24 = vshll.u32 %v7569_v6, 16  ;;  %v482_v28 = vshrl.u32 %v7569_v6, 16  ;;  %v489_v29 = vshll.u32 %v7571_v7, 16  ;;  %1188 = vmatpush1.bf16.msra.mxu1 %v7048_v14  ;;  %v7054_v51 = vld [vmem:[%s10982_s1 + $0xe0] ss:$16 sps:$4 sm:$0xff]  }
  0x24   : > { %v474_v27 = vrot.slane %v472_v18, 1  ;;  %v468_v31 = vsel %vm420_vm0, %v463_v9, %v467_v11  ;;  %v7601_v33 = vpack.c.bf16 %v359_v12, %v358_v8  ;;  %v479_v36 = vrot.slane %v477_v19, 1  ;;  %1189 = vmatprep.subr.bf16.mxu1 %v7049_v30  ;;  %v369_v3 = vld [vmem:[%s7505_s27 + $0xe8] sm:$0x3]  ;;  %v7058_v12 = vld [vmem:[%s10982_s1 + $0x124] ss:$16 sps:$4 sm:$0xff]  }
  0x25   : > { %v486_v32 = vrot.slane %v484_v24, 1  ;;  %v7607_v38 = vpack.c.bf16 %v360_v20, %v360_v20  ;;  %v7610_v40 = vpack.c.bf16 %v362_v26, %v361_v25  ;;  %v689_v43 = vsel %vm677_vm1, %v687_v22, %v688_v23  ;;  %v370_v18 = vld [vmem:[%s7505_s27 + $0xf0] sm:$0xff]  ;;  %v371_v19 = vld [vmem:[%s7505_s27 + $0xf8] sm:$0xff] }
  0x26   : > { %617 = vrot.lane.b32.xlu0 %v456_v16, %s7419_s17  ;;  %v475_v35 = vor.u32 %v474_v27, %v470_v17  ;;  %v690_v44 = vrot.slane %v7565_v4, 1  ;;  %v691_v45 = vrot.slane %v7567_v5, 1  ;;  %v496_v46 = vshll.u32 %v7601_v33, 16  ;;  %v7057_v5 = vld [vmem:[%s10982_s1 + $0x100] ss:$16 sps:$4 sm:$0xff]  }
  0x27   : > { %730 = vrot.lane.b32.xlu1 %v686_v21, %s7420_s18  ;;  %v487_v48 = vor.u32 %v486_v32, %v482_v28  ;;  %v491_v49 = vrot.slane %v489_v29, 1  ;;  %1190 = vmatpush1.bf16.msra.mxu1 %v7051_v34  ;;  %v494_v52 = vshrl.u32 %v7601_v33, 16  ;;  %v501_v54 = vshll.u32 %v7607_v38, 16  ;;  %v7060_v24 = vld [vmem:[%s10982_s1 + $0x120] ss:$16 sps:$4 sm:$0xff]   ;;  %v373_v29 = vld [vmem:[%s7505_s27 + $0x108] sm:$0xff] }
  0x28   : > { %v498_v53 = vrot.slane %v496_v46, 1  ;;  %v7627_v55 = vpack.c.bf16 %v363_v39, %v363_v39  ;;  %1191 = vmatprep.subr.bf16.mxu1 %v7052_v41  ;;  %v480_v57 = vsel %vm420_vm0, %v475_v35, %v479_v36  ;;  %v508_v58 = vshll.u32 %v7610_v40, 16  ;;  %v374_v30 = vld [vmem:[%s7505_s27 + $0x110] sm:$0xff]  ;;  %v372_v36 = vld [vmem:[%s7505_s27 + $0x100] sm:$0x3] }
  0x29   : > { %v692_v61 = vsel %vm677_vm1, %v690_v44, %v691_v45  ;;  %v693_v62 = vrot.slane %v7569_v6, 1  ;;  %v694_v63 = vrot.slane %v7571_v7, 1  ;;  %v7641_v1 = vpack.c.bf16 %v365_v50, %v364_v47 }
  0x2a   : > { %619 = vrot.lane.b32.xlu0 %v468_v31, %s7419_s17  ;;  %v492_v2 = vsel %vm420_vm0, %v487_v48, %v491_v49  ;;  %v499_v8 = vor.u32 %v498_v53, %v494_v52  ;;  %v503_v9 = vrot.slane %v501_v54, 1  ;;  %v513_v11 = vshll.u32 %v7627_v55, 16  ;;  %v375_v49 = vld [vmem:[%s7505_s27 + $0x118] sm:$0x3]  ;;  %v376_v53 = vld [vmem:[%s7505_s27 + $0x120] sm:$0xff]  ;;  %v377_v54 = vld [vmem:[%s7505_s27 + $0x128] sm:$0xff] }
  0x2b   : > { %732 = vrot.lane.b32.xlu1 %v689_v43, %s7420_s18  ;;  %1192 = vmatpush1.bf16.msra.mxu1 %v7054_v51  ;;  %v7650_v7 = vpack.c.bf16 %v368_v60, %v367_v59  ;;  %v506_v13 = vshrl.u32 %v7610_v40, 16  ;;  %v510_v14 = vrot.slane %v508_v58, 1  ;;  %v405_v16 = vpack.c.bf16 %v366_v0, %v366_v0 }
  0x2c   : > { %1193 = vmatprep.subr.bf16.mxu1 %v7055_v56  ;;  %v520_v17 = vshll.u32 %v7641_v1, 16  ;;  %v695_v20 = vsel %vm677_vm1, %v693_v62, %v694_v63  ;;  %v696_v21 = vrot.slane %v7601_v33, 1  ;;  %v697_v22 = vrot.slane %v7607_v38, 1  ;;  %v380_v62 = vld [vmem:[%s7505_s27 + $0x140] sm:$0xff] }
  0x2d   : > { %v7663_v23 = vpack.c.bf16 %v369_v3, %v369_v3  ;;  %v504_v25 = vsel %vm420_vm0, %v499_v8, %v503_v9  ;;  %v515_v26 = vrot.slane %v513_v11, 1  ;;  %v532_v27 = vshll.u32 %v7650_v7, 16  ;;  %v897_v11 = vld [vmem:[%s10982_s1 + $0x140] sm:$0xff] }
  0x2e   : > { %621 = vrot.lane.b32.xlu0 %v480_v57, %s7419_s17  ;;  %v7671_v28 = vpack.c.bf16 %v371_v19, %v370_v18  ;;  %v511_v31 = vor.u32 %v510_v14, %v506_v13  ;;  %v518_v32 = vshrl.u32 %v7641_v1, 16  ;;  %v522_v34 = vrot.slane %v520_v17, 1  ;;  %v381_v19 = vld [vmem:[%s7505_s27 + $0x148] sm:$0x3] }
  0x2f   : > { %734 = vrot.lane.b32.xlu1 %v692_v61, %s7420_s18  ;;  %1194 = vmatpush1.bf16.msra.mxu1 %v7057_v5  ;;  %v525_v35 = vshll.u32 %v405_v16, 16  ;;  %v698_v38 = vsel %vm677_vm1, %v696_v21, %v697_v22  ;;  %v699_v39 = vrot.slane %v7610_v40, 1  ;;  %v700_v41 = vrot.slane %v7627_v55, 1  ;;  %v379_v61 = vld [vmem:[%s7505_s27 + $0x138] sm:$0xff]  ;;  %v378_v5 = vld [vmem:[%s7505_s27 + $0x130] sm:$0x3] }
  0x30   : > { %1195 = vmatprep.subr.bf16.mxu1 %v7058_v12  ;;  %v537_v43 = vshll.u32 %v7663_v23, 16  ;;  %v7682_v44 = vpack.c.bf16 %v374_v30, %v373_v29  ;;  %v530_v45 = vshrl.u32 %v7650_v7, 16  ;;  %v534_v46 = vrot.slane %v532_v27, 1 }
  0x31   : > { %v7686_v47 = vpack.c.bf16 %v372_v36, %v372_v36  ;;  %v544_v48 = vshll.u32 %v7671_v28, 16  ;;  %v516_v50 = vsel %vm420_vm0, %v511_v31, %v515_v26  ;;  %v523_v51 = vor.u32 %v522_v34, %v518_v32  ;;  %v383_v26 = vld [vmem:[%s7505_s27 + $0x158] sm:$0xff] }
  0x32   : > { %623 = vrot.lane.b32.xlu0 %v492_v2, %s7419_s17  ;;  %v527_v52 = vrot.slane %v525_v35, 1  ;;  %v701_v55 = vsel %vm677_vm1, %v699_v39, %v700_v41  ;;  %v702_v56 = vrot.slane %v7641_v1, 1  ;;  %v703_v57 = vrot.slane %v405_v16, 1  ;;  %v7065_v31 = vld [vmem:[%s10982_s1 + $0xc] ss:$16 sps:$4 sm:$0xff]  }
  0x33   : > { %736 = vrot.lane.b32.xlu1 %v695_v20, %s7420_s18  ;;  %1196 = vmatpush1.bf16.msra.mxu1 %v7060_v24  ;;  %v539_v58 = vrot.slane %v537_v43, 1  ;;  %v7696_v59 = vpack.c.bf16 %v375_v49, %v375_v49  ;;  %v556_v60 = vshll.u32 %v7682_v44, 16  ;;  %v535_v63 = vor.u32 %v534_v46, %v530_v45  ;;  %v384_v39 = vld [vmem:[%s7505_s27 + $0x160] sm:$0x3]  ;;  %v386_v49 = vld [vmem:[%s7505_s27 + $0x170] sm:$0xff] }
  0x34   : > { %v542_v0 = vshrl.u32 %v7671_v28, 16  ;;  %v546_v2 = vrot.slane %v544_v48, 1  ;;  %v549_v3 = vshll.u32 %v7686_v47, 16  ;;  %v528_v8 = vsel %vm420_vm0, %v523_v51, %v527_v52  ;;  %v385_v48 = vld [vmem:[%s7505_s27 + $0x168] sm:$0xff] }
  0x35   : > { %v7707_v9 = vpack.c.bf16 %v377_v54, %v376_v53  ;;  %v704_v12 = vsel %vm677_vm1, %v702_v56, %v703_v57  ;;  %v705_v13 = vrot.slane %v7650_v7, 1  ;;  %v706_v14 = vrot.slane %v7663_v23, 1 }
  0x36   : > { %625 = vrot.lane.b32.xlu0 %v504_v25, %s7419_s17  ;;  %v554_v16 = vshrl.u32 %v7682_v44, 16  ;;  %v558_v17 = vrot.slane %v556_v60, 1  ;;  %v561_v18 = vshll.u32 %v7696_v59, 16  ;;  %v540_v20 = vsel %vm420_vm0, %v535_v63, %v539_v58  ;;  %v382_v25 = vld [vmem:[%s7505_s27 + $0x150] sm:$0xff] }
  0x37   : > { %738 = vrot.lane.b32.xlu1 %v698_v38, %s7420_s18  ;;  %v547_v21 = vor.u32 %v546_v2, %v542_v0  ;;  %v551_v22 = vrot.slane %v549_v3, 1  ;;  %v7720_v24 = vpack.c.bf16 %v380_v62, %v379_v61  ;;  %v413_v23 = vpack.c.bf16 %v378_v5, %v378_v5  ;;  %v387_v62 = vld [vmem:[%s7505_s27 + $0x178] sm:$0x3] }
  0x38   : > { %v568_v27 = vshll.u32 %v7707_v9, 16  ;;  %v6050_v29 = vcombine.high %v897_v11, %v897_v11  ;;  %v6049_v30 = vcombine.low %v897_v11, %v897_v11  ;;  %v707_v32 = vsel %vm677_vm1, %v705_v13, %v706_v14 }
  0x39   : > { %v708_v34 = vrot.slane %v7671_v28, 1  ;;  %v709_v35 = vrot.slane %v7686_v47, 1  ;;  %v559_v36 = vor.u32 %v558_v17, %v554_v16  ;;  %v563_v38 = vrot.slane %v561_v18, 1 }
  0x3a   : > { %627 = vrot.lane.b32.xlu0 %v516_v50, %s7419_s17  ;;  %6053 = vmatprep.subr.msk.bf16.mxu1 %vm1164_vm2, %v6050_v29  ;;  %v552_v41 = vsel %vm420_vm0, %v547_v21, %v551_v22  ;;  %v415_v43 = vpack.c.bf16 %v381_v19, %v381_v19  ;;  %v580_v45 = vshll.u32 %v7720_v24, 16  ;;  %v1166_v46 = vsel %vm1164_vm2, %v6049_v30, 0 }
  0x3b   : > { %740 = vrot.lane.b32.xlu1 %v701_v55, %s7420_s18  ;;  %v566_v47 = vshrl.u32 %v7707_v9, 16  ;;  %v570_v50 = vrot.slane %v568_v27, 1  ;;  %v573_v51 = vshll.u32 %v413_v23, 16  ;;  %v7742_v52 = vpack.c.bf16 %v383_v26, %v382_v25  ;;  %1198 = vmatpush1.bf16.msra.mxu1 %v1166_v46 }
  0x3c   : > { %v710_v53 = vsel %vm677_vm1, %v708_v34, %v709_v35  ;;  %v711_v54 = vrot.slane %v7682_v44, 1  ;;  %v712_v55 = vrot.slane %v7696_v59, 1  ;;  %1370 = vmatprep.subr.bf16.mxu1 %v7065_v31  ;;  %v564_v56 = vsel %vm420_vm0, %v559_v36, %v563_v38 }
  0x3d   : > { %v578_v57 = vshrl.u32 %v7720_v24, 16  ;;  %v582_v58 = vrot.slane %v580_v45, 1  ;;  %v585_v60 = vshll.u32 %v415_v43, 16  ;;  %v417_v61 = vpack.c.bf16 %v384_v39, %v384_v39 }
  0x3e   : > { %629 = vrot.lane.b32.xlu0 %v528_v8, %s7419_s17  ;;  %v571_v63 = vor.u32 %v570_v50, %v566_v47  ;;  %v575_v0 = vrot.slane %v573_v51, 1  ;;  %v592_v2 = vshll.u32 %v7742_v52, 16  ;;  %v7753_v3 = vpack.c.bf16 %v386_v49, %v385_v48  ;;  %v7063_v47 = vld [vmem:[%s10982_s1 + $0x8] ss:$16 sps:$4 sm:$0xff]   ;;  %v7068_v51 = vld [vmem:[%s10982_s1 + $0x2c] ss:$16 sps:$4 sm:$0xff]  }
  0x3f   : > { %742 = vrot.lane.b32.xlu1 %v704_v12, %s7420_s18  ;;  %v713_v59 = vsel %vm677_vm1, %v711_v54, %v712_v55  ;;  %v714_v5 = vrot.slane %v7707_v9, 1  ;;  %v715_v8 = vrot.slane %v413_v23, 1  ;;  %v583_v11 = vor.u32 %v582_v58, %v578_v57  ;;  %v7071_v57 = vld [vmem:[%s10982_s1 + $0x4c] ss:$16 sps:$4 sm:$0xff]  }
  0x40   : > { %v587_v12 = vrot.slane %v585_v60, 1  ;;  %v590_v13 = vshrl.u32 %v7742_v52, 16  ;;  %v597_v14 = vshll.u32 %v417_v61, 16  ;;  %v576_v16 = vsel %vm420_vm0, %v571_v63, %v575_v0  ;;  %v7074_v0 = vld [vmem:[%s10982_s1 + $0x6c] ss:$16 sps:$4 sm:$0xff]  }
  0x41   : > { %v594_v17 = vrot.slane %v592_v2, 1  ;;  %v419_v18 = vpack.c.bf16 %v387_v62, %v387_v62  ;;  %v604_v19 = vshll.u32 %v7753_v3, 16  ;;  %v717_v21 = vrot.slane %v7720_v24, 1  ;;  %v7069_v62 = vld [vmem:[%s10982_s1 + $0x48] ss:$16 sps:$4 sm:$0xff]  }
  0x42   : > { %631 = vrot.lane.b32.xlu0 %v540_v20, %s7419_s17  ;;  %v716_v20 = vsel %vm677_vm1, %v714_v5, %v715_v8  ;;  %v718_v22 = vrot.slane %v415_v43, 1  ;;  %v588_v25 = vsel %vm420_vm0, %v583_v11, %v587_v12  ;;  %v599_v26 = vrot.slane %v597_v14, 1  ;;  %v7072_v8 = vld [vmem:[%s10982_s1 + $0x68] ss:$16 sps:$4 sm:$0xff]   ;;  %v7077_v11 = vld [vmem:[%s10982_s1 + $0x8c] ss:$16 sps:$4 sm:$0xff]  }
  0x43   : > { %744 = vrot.lane.b32.xlu1 %v707_v32, %s7420_s18  ;;  %v595_v23 = vor.u32 %v594_v17, %v590_v13  ;;  %v602_v27 = vshrl.u32 %v7753_v3, 16  ;;  %v606_v29 = vrot.slane %v604_v19, 1  ;;  %v609_v30 = vshll.u32 %v419_v18, 16 }
  0x44   : > { %v719_v31 = vsel %vm677_vm1, %v717_v21, %v718_v22  ;;  %v720_v32 = vrot.slane %v7742_v52, 1  ;;  %v721_v34 = vrot.slane %v417_v61, 1  ;;  %v724_v43 = vrot.slane %v419_v18, 1  ;;  %v7080_v18 = vld [vmem:[%s10982_s1 + $0xac] ss:$16 sps:$4 sm:$0xff]  }
  0x45   : > { %v600_v35 = vsel %vm420_vm0, %v595_v23, %v599_v26  ;;  %v607_v36 = vor.u32 %v606_v29, %v602_v27  ;;  %v611_v38 = vrot.slane %v609_v30, 1  ;;  %v7078_v21 = vld [vmem:[%s10982_s1 + $0xa8] ss:$16 sps:$4 sm:$0xff]   ;;  %v7086_v30 = vld [vmem:[%s10982_s1 + $0xec] ss:$16 sps:$4 sm:$0xff]  }
  0x46   : > { %633 = vrot.lane.b32.xlu0 %v552_v41, %s7419_s17  ;;  %v722_v39 = vsel %vm677_vm1, %v720_v32, %v721_v34  ;;  %v723_v41 = vrot.slane %v7753_v3, 1  ;;  %v7081_v27 = vld [vmem:[%s10982_s1 + $0xc8] ss:$16 sps:$4 sm:$0xff]  }
  0x47   : > { %746 = vrot.lane.b32.xlu1 %v710_v53, %s7420_s18  ;;  %v612_v45 = vsel %vm420_vm0, %v607_v36, %v611_v38  ;;  %v7084_v34 = vld [vmem:[%s10982_s1 + $0xe8] ss:$16 sps:$4 sm:$0xff]   ;;  %vm7423_vm0 = vmmov 0  }
  0x48   : > { %v725_v46 = vsel %vm677_vm1, %v723_v41, %v724_v43  ;;  %vm5870_vm1 = vcmask 408576  }
  0x4a   : > { %635 = vrot.lane.b32.xlu0 %v564_v56, %s7419_s17  ;;  %v7066_v56 = vld [vmem:[%s10982_s1 + $0x28] ss:$16 sps:$4 sm:$0xff]  }
  0x4b   : > { %748 = vrot.lane.b32.xlu1 %v713_v59, %s7420_s18 }
  0x4e   : > { %637 = vrot.lane.b32.xlu0 %v576_v16, %s7419_s17  ;;  %v7075_v16 = vld [vmem:[%s10982_s1 + $0x88] ss:$16 sps:$4 sm:$0xff]  }
  0x4f   : > { %750 = vrot.lane.b32.xlu1 %v716_v20, %s7420_s18 }
  0x52   : > { %639 = vrot.lane.b32.xlu0 %v588_v25, %s7419_s17 }
  0x53   : > { %752 = vrot.lane.b32.xlu1 %v719_v31, %s7420_s18 }
  0x56   : > { %641 = vrot.lane.b32.xlu0 %v600_v35, %s7419_s17 }
  0x57   : > { %754 = vrot.lane.b32.xlu1 %v722_v39, %s7420_s18 }
  0x5a   : > { %643 = vrot.lane.b32.xlu0 %v612_v45, %s7419_s17 }
  0x5b   : > { %756 = vrot.lane.b32.xlu1 %v725_v46, %s7420_s18  ;;  %v7087_v46 = vld [vmem:[%s10982_s1 + $0x108] ss:$16 sps:$4 sm:$0xff]  }
  0x90   : > { %v614_v48 = vpop.permute.xlu0 %613 }
  0x91   : > { %v760_v49 = vsel %vm758_vm3, %v7513_v10, %v614_v48  ;;  %v616_v50 = vpop.permute.xlu1 %615 }
  0x92   : > { %v792_v53 = vsel %vm791_vm4, %v760_v49, %v614_v48  ;;  %v762_v58 = vsel %vm758_vm3, %v7518_v15, %v616_v50 }
  0x93   : > { %v793_v63 = vsel %vm791_vm4, %v762_v58, %v616_v50 }
  0x94   : > { %v7790_v54 = vpop.permute.xlu0 %726 }
  0x95   : > { %6054 = vmatprep.mubr.msk.bf16.mxu1 %vm1131_vm5, %v7790_v54  ;;  %v7796_v55 = vsel %vm808_vm6, %v792_v53, %v7790_v54  ;;  %v7798_v10 = vpop.permute.xlu1 %728 }
  0x96   : > { %1210 = vmatmul.mubr.bf16.vlgmr.msra.gmra.mrb[0].mxu1 %v7796_v55  ;;  %v7822_v2 = vsel %vm808_vm6, %v793_v63, %v7798_v10 }
  0x97   : > { %1371 = vmatpush1.bf16.msra.mxu1 %v7063_v47  ;;  %6055 = vmatprep.mubr.msk.bf16.mxu1 %vm1131_vm5, %v7798_v10 }
  0x98   : > { %1372 = vmatprep.subr.bf16.mxu1 %v7068_v51  ;;  %v618_v60 = vpop.permute.xlu0 %617  ;;  %v898_v51 = vld [vmem:[%s10982_s1 + $0x148] sm:$0xff] }
  0x99   : > { %v7811_v61 = vpop.permute.xlu1 %730  ;;  %v764_v59 = vsel %vm758_vm3, %v7537_v37, %v618_v60  ;;  %v6052_v58 = vcombine.high %v898_v51, %v898_v51 }
  0x9a   : > { %v794_v12 = vsel %vm791_vm4, %v764_v59, %v618_v60  ;;  %v6051_v60 = vcombine.low %v898_v51, %v898_v51 }
  0x9b   : > { %1373 = vmatpush1.bf16.msra.mxu1 %v7066_v56  ;;  %v7842_v14 = vsel %vm808_vm6, %v794_v12, %v7811_v61 }
  0x9c   : > { %v620_v15 = vpop.permute.xlu0 %619  ;;  %1374 = vmatprep.subr.bf16.mxu1 %v7071_v57 }
  0x9d   : > { %v7826_v5 = vpop.permute.xlu1 %732  ;;  %v766_v19 = vsel %vm758_vm3, %v7540_v42, %v620_v15  ;;  %v7083_v42 = vld [vmem:[%s10982_s1 + $0xcc] ss:$16 sps:$4 sm:$0xff]  }
  0x9e   : > { %1220 = vmatmul.mubr.bf16.gmra.mrb[4].mxu1 %v7822_v2  ;;  %v795_v22 = vsel %vm791_vm4, %v766_v19, %v620_v15 }
  0x9f   : > { %6056 = vmatprep.mubr.msk.bf16.mxu1 %vm1131_vm5, %v7811_v61  ;;  %1375 = vmatpush1.bf16.msra.mxu1 %v7069_v62  ;;  %v7870_v23 = vsel %vm808_vm6, %v795_v22, %v7826_v5 }
  0xa0   : > { %v622_v13 = vpop.permute.xlu0 %621  ;;  %1376 = vmatprep.subr.bf16.mxu1 %v7074_v0 }
  0xa1   : > { %v7838_v37 = vpop.permute.xlu1 %734  ;;  %v768_v31 = vsel %vm758_vm3, %v7565_v4, %v622_v13  ;;  %v7089_v4 = vld [vmem:[%s10982_s1 + $0x10c] ss:$16 sps:$4 sm:$0xff]  }
  0xa2   : > { %v796_v35 = vsel %vm791_vm4, %v768_v31, %v622_v13 }
  0xa3   : > { %1377 = vmatpush1.bf16.msra.mxu1 %v7072_v8  ;;  %v7901_v43 = vsel %vm808_vm6, %v796_v35, %v7838_v37 }
  0xa4   : > { %v624_v17 = vpop.permute.xlu0 %623  ;;  %1378 = vmatprep.subr.bf16.mxu1 %v7077_v11  ;;  %v1172_v11 = vsel %vm1164_vm2, %v6051_v60, 0 }
  0xa5   : > { %v7852_v20 = vpop.permute.xlu1 %736  ;;  %v770_v49 = vsel %vm758_vm3, %v7569_v6, %v624_v17  ;;  %v7090_v6 = vld [vmem:[%s10982_s1 + $0x128] ss:$16 sps:$4 sm:$0xff]  }
  0xa6   : > { %1230 = vmatmul.mubr.bf16.gmra.mrb[8].mxu1 %v7842_v14 }
  0xa7   : > { %6057 = vmatprep.mubr.msk.bf16.mxu1 %vm1131_vm5, %v7826_v5  ;;  %1379 = vmatpush1.bf16.msra.mxu1 %v7075_v16 }
  0xa8   : > { %v7861_v25 = vpop.permute.xlu0 %625  ;;  %1380 = vmatprep.subr.bf16.mxu1 %v7080_v18 }
  0xa9   : > { %v7866_v26 = vpop.permute.xlu1 %738 }
  0xab   : > { %1381 = vmatpush1.bf16.msra.mxu1 %v7078_v21 }
  0xac   : > { %v7875_v29 = vpop.permute.xlu0 %627  ;;  %1382 = vmatprep.subr.bf16.mxu1 %v7083_v42 }
  0xad   : > { %v7882_v32 = vpop.permute.xlu1 %740 }
  0xae   : > { %1240 = vmatmul.mubr.bf16.gmra.mrb[12].mxu1 %v7870_v23 }
  0xaf   : > { %6058 = vmatprep.mubr.msk.bf16.mxu1 %vm1131_vm5, %v7838_v37  ;;  %1383 = vmatpush1.bf16.msra.mxu1 %v7081_v27 }
  0xb0   : > { %v630_v36 = vpop.permute.xlu0 %629  ;;  %1384 = vmatprep.subr.bf16.mxu1 %v7086_v30 }
  0xb1   : > { %v776_v38 = vsel %vm758_vm3, %v7641_v1, %v630_v36  ;;  %v7896_v39 = vpop.permute.xlu1 %742  ;;  %v7092_v1 = vld [vmem:[%s10982_s1 + $0x12c] ss:$16 sps:$4 sm:$0xff]  }
  0xb2   : > { %v800_v41 = vsel %vm791_vm4, %v776_v38, %v630_v36 }
  0xb3   : > { %v7905_v45 = vsel %vm808_vm6, %v800_v41, %v7896_v39  ;;  %1385 = vmatpush1.bf16.msra.mxu1 %v7084_v34 }
  0xb4   : > { %v632_v48 = vpop.permute.xlu0 %631  ;;  %1386 = vmatprep.subr.bf16.mxu1 %v7089_v4 }
  0xb5   : > { %v778_v47 = vsel %vm758_vm3, %v7650_v7, %v632_v48  ;;  %v7917_v50 = vpop.permute.xlu1 %744  ;;  %v797_v7 = vsel %vm791_vm4, %v770_v49, %v624_v17 }
  0xb6   : > { %1250 = vmatmul.mubr.bf16.gmra.mrb[16].mxu1 %v7901_v43  ;;  %v801_v53 = vsel %vm791_vm4, %v778_v47, %v632_v48  ;;  %v7941_v15 = vsel %vm808_vm6, %v797_v7, %v7852_v20 }
  0xb7   : > { %6059 = vmatprep.mubr.msk.bf16.mxu1 %vm1131_vm5, %v7852_v20  ;;  %v7928_v56 = vsel %vm808_vm6, %v801_v53, %v7917_v50  ;;  %1387 = vmatpush1.bf16.msra.mxu1 %v7087_v46 }
  0xb8   : > { %v634_v57 = vpop.permute.xlu0 %633  ;;  %1388 = vmatprep.subr.bf16.mxu1 %v7092_v1 }
  0xb9   : > { %v780_v62 = vsel %vm758_vm3, %v7671_v28, %v634_v57  ;;  %v7936_v63 = vpop.permute.xlu1 %746  ;;  %v772_v28 = vsel %vm758_vm3, %v7601_v33, %v7861_v25 }
  0xba   : > { %v802_v0 = vsel %vm791_vm4, %v780_v62, %v634_v57  ;;  %v798_v33 = vsel %vm791_vm4, %v772_v28, %v7861_v25  ;;  %v774_v25 = vsel %vm758_vm3, %v7610_v40, %v7875_v29 }
  0xbb   : > { %v7945_v59 = vsel %vm808_vm6, %v802_v0, %v7936_v63  ;;  %1389 = vmatpush1.bf16.msra.mxu1 %v7090_v6  ;;  %v828_v22 = vsel %vm808_vm6, %v798_v33, %v7866_v26  ;;  %v799_v35 = vsel %vm791_vm4, %v774_v25, %v7875_v29 }
  0xbc   : > { %v636_v8 = vpop.permute.xlu0 %635  ;;  %6070 = vmatprep.subr.msk.bf16.mxu1 %vm1164_vm2, %v6052_v58  ;;  %v831_v38 = vsel %vm808_vm6, %v799_v35, %v7882_v32  ;;  %v7106_v35 = vld [vmem:[%s10984_s3 + $0x30] ss:$8 sps:$4 sm:$0xff]   ;;  %vm5919_vm2 = vcmask 80896  }
  0xbd   : > { %v782_v12 = vsel %vm758_vm3, %v7682_v44, %v636_v8  ;;  %v7954_v13 = vpop.permute.xlu1 %748 }
  0xbe   : > { %1260 = vmatmul.mubr.bf16.gmra.mrb[20].mxu1 %v7941_v15  ;;  %v803_v16 = vsel %vm791_vm4, %v782_v12, %v636_v8 }
  0xbf   : > { %6060 = vmatprep.mubr.msk.bf16.mxu1 %vm1131_vm5, %v7866_v26  ;;  %v7962_v17 = vsel %vm808_vm6, %v803_v16, %v7954_v13  ;;  %1391 = vmatpush1.bf16.msra.mxu1 %v1172_v11 }
  0xc0   : > { %v638_v18 = vpop.permute.xlu0 %637 }
  0xc1   : > { %v784_v44 = vsel %vm758_vm3, %v7707_v9, %v638_v18  ;;  %v7968_v19 = vpop.permute.xlu1 %750 }
  0xc2   : > { %v804_v21 = vsel %vm791_vm4, %v784_v44, %v638_v18  ;;  %v7095_v18 = vld [vmem:[%s10984_s3 + $0x4] ss:$8 sps:$4 sm:$0xff]   ;;  %v7097_v44 = vld [vmem:[%s10984_s3] ss:$8 sps:$4 sm:$0xff]  }
  0xc3   : > { %v7975_v42 = vsel %vm808_vm6, %v804_v21, %v7968_v19  ;;  %3880 = vmatprep.subr.bf16.mxu0 %v7095_v18  ;;  %v7113_v18 = vld [vmem:[%s10984_s3 + $0x64] ss:$8 sps:$4 sm:$0xff]  }
  0xc4   : > { %v640_v27 = vpop.permute.xlu0 %639  ;;  %3881 = vmatpush1.bf16.msra.mxu0 %v7097_v44  ;;  %v7115_v44 = vld [vmem:[%s10984_s3 + $0x60] ss:$8 sps:$4 sm:$0xff]  }
  0xc5   : > { %v786_v30 = vsel %vm758_vm3, %v7720_v24, %v640_v27  ;;  %v7982_v9 = vpop.permute.xlu1 %752 }
  0xc6   : > { %1270 = vmatmul.mubr.bf16.gmra.mrb[24].mxu1 %v828_v22  ;;  %v805_v31 = vsel %vm791_vm4, %v786_v30, %v640_v27  ;;  %v7101_v30 = vld [vmem:[%s10984_s3 + $0x24] ss:$8 sps:$4 sm:$0xff]  }
  0xc7   : > { %6061 = vmatprep.mubr.msk.bf16.mxu1 %vm1131_vm5, %v7882_v32  ;;  %v7989_v34 = vsel %vm808_vm6, %v805_v31, %v7982_v9  ;;  %v7104_v31 = vld [vmem:[%s10984_s3 + $0x34] ss:$8 sps:$4 sm:$0xff]  }
  0xc8   : > { %v642_v36 = vpop.permute.xlu0 %641 }
  0xc9   : > { %v788_v40 = vsel %vm758_vm3, %v7742_v52, %v642_v36  ;;  %v7995_v24 = vpop.permute.xlu1 %754 }
  0xca   : > { %v806_v4 = vsel %vm791_vm4, %v788_v40, %v642_v36 }
  0xcb   : > { %v8002_v41 = vsel %vm808_vm6, %v806_v4, %v7995_v24  ;;  %v7107_v4 = vld [vmem:[%s10984_s3 + $0x44] ss:$8 sps:$4 sm:$0xff]  }
  0xcc   : > { %v644_v46 = vpop.permute.xlu0 %643 }
  0xcd   : > { %v790_v48 = vsel %vm758_vm3, %v7753_v3, %v644_v46  ;;  %v8006_v29 = vpop.permute.xlu1 %756 }
  0xce   : > { %1280 = vmatmul.mubr.bf16.gmra.mrb[28].mxu1 %v831_v38  ;;  %v807_v52 = vsel %vm791_vm4, %v790_v48, %v644_v46  ;;  %v7112_v48 = vld [vmem:[%s10984_s3 + $0x50] ss:$8 sps:$4 sm:$0xff]  }
  0xcf   : > { %6062 = vmatprep.mubr.msk.bf16.mxu1 %vm1131_vm5, %v7896_v39  ;;  %v8013_v1 = vsel %vm808_vm6, %v807_v52, %v8006_v29 }
  0xd6   : > { %1290 = vmatmul.mubr.bf16.gmra.mrb[32].mxu1 %v7905_v45 }
  0xd7   : > { %6063 = vmatprep.mubr.msk.bf16.mxu1 %vm1131_vm5, %v7917_v50 }
  0xde   : > { %1300 = vmatmul.mubr.bf16.gmra.mrb[36].mxu1 %v7928_v56 }
  0xdf   : > { %6064 = vmatprep.mubr.msk.bf16.mxu1 %vm1131_vm5, %v7936_v63 }
  0xe6   : > { %1310 = vmatmul.mubr.bf16.gmra.mrb[40].mxu1 %v7945_v59 }
  0xe7   : > { %6065 = vmatprep.mubr.msk.bf16.mxu1 %vm1131_vm5, %v7954_v13 }
  0xee   : > { %1320 = vmatmul.mubr.bf16.gmra.mrb[44].mxu1 %v7962_v17 }
  0xef   : > { %6066 = vmatprep.mubr.msk.bf16.mxu1 %vm1131_vm5, %v7968_v19 }
  0xf6   : > { %1330 = vmatmul.mubr.bf16.gmra.mrb[48].mxu1 %v7975_v42 }
  0xf7   : > { %6067 = vmatprep.mubr.msk.bf16.mxu1 %vm1131_vm5, %v7982_v9 }
  0xfe   : > { %1340 = vmatmul.mubr.bf16.gmra.mrb[52].mxu1 %v7989_v34 }
  0xff   : > { %6068 = vmatprep.mubr.msk.bf16.mxu1 %vm1131_vm5, %v7995_v24 }
 0x106   : > { %1350 = vmatmul.mubr.bf16.gmra.mrb[56].mxu1 %v8002_v41 }
 0x107   : > { %6069 = vmatprep.mubr.msk.bf16.mxu1 %vm1131_vm5, %v8006_v29 }
 0x10e   : > { %1360 = vmatmul.mubr.bf16.gmra.mrb[60].mxu1 %v8013_v1 }
 0x10f   : > { %6071 = vmatprep.mubr.msk.bf16.mxu1 %vm1131_vm5, %v7790_v54 }
 0x116   : > { %1403 = vmatmul.mubr.bf16.vlgmr.msra.gmra.mrb[64].mxu1 %v7796_v55 }
 0x117   : > { %6072 = vmatprep.mubr.msk.bf16.mxu1 %vm1131_vm5, %v7798_v10 }
 0x11e   : > { %1413 = vmatmul.mubr.bf16.gmra.mrb[68].mxu1 %v7822_v2 }
 0x11f   : > { %6073 = vmatprep.mubr.msk.bf16.mxu1 %vm1131_vm5, %v7811_v61 }
 0x126   : > { %1423 = vmatmul.mubr.bf16.gmra.mrb[72].mxu1 %v7842_v14 }
 0x127   : > { %6074 = vmatprep.mubr.msk.bf16.mxu1 %vm1131_vm5, %v7826_v5 }
 0x12e   : > { %1433 = vmatmul.mubr.bf16.gmra.mrb[76].mxu1 %v7870_v23 }
 0x12f   : > { %6075 = vmatprep.mubr.msk.bf16.mxu1 %vm1131_vm5, %v7838_v37 }
 0x136   : > { %1443 = vmatmul.mubr.bf16.gmra.mrb[80].mxu1 %v7901_v43 }
 0x137   : > { %6076 = vmatprep.mubr.msk.bf16.mxu1 %vm1131_vm5, %v7852_v20 }
 0x13e   : > { %1453 = vmatmul.mubr.bf16.gmra.mrb[84].mxu1 %v7941_v15 }
 0x13f   : > { %6077 = vmatprep.mubr.msk.bf16.mxu1 %vm1131_vm5, %v7866_v26 }
 0x146   : > { %1463 = vmatmul.mubr.bf16.gmra.mrb[88].mxu1 %v828_v22  ;;  %v7100_v22 = vld [vmem:[%s10984_s3 + $0x10] ss:$8 sps:$4 sm:$0xff]  }
 0x147   : > { %6078 = vmatprep.mubr.msk.bf16.mxu1 %vm1131_vm5, %v7882_v32 }
 0x14e   : > { %1473 = vmatmul.mubr.bf16.gmra.mrb[92].mxu1 %v831_v38  ;;  %v7109_v38 = vld [vmem:[%s10984_s3 + $0x40] ss:$8 sps:$4 sm:$0xff]  }
 0x14f   : > { %6079 = vmatprep.mubr.msk.bf16.mxu1 %vm1131_vm5, %v7896_v39 }
 0x156   : > { %1483 = vmatmul.mubr.bf16.gmra.mrb[96].mxu1 %v7905_v45 }
 0x157   : > { %6080 = vmatprep.mubr.msk.bf16.mxu1 %vm1131_vm5, %v7917_v50 }
 0x15e   : > { %1493 = vmatmul.mubr.bf16.gmra.mrb[100].mxu1 %v7928_v56 }
 0x15f   : > { %6081 = vmatprep.mubr.msk.bf16.mxu1 %vm1131_vm5, %v7936_v63 }
 0x166   : > { %1503 = vmatmul.mubr.bf16.gmra.mrb[104].mxu1 %v7945_v59 }
 0x167   : > { %6082 = vmatprep.mubr.msk.bf16.mxu1 %vm1131_vm5, %v7954_v13 }
 0x169   : > { %v8070_v3 = vpop.f32.mrb[0].mxu1 }
 0x16a   : > { %v8072_v54 = vpop.f32.mrb[1].mxu1 }
 0x16b   : > { %v8074_v55 = vpop.f32.mrb[2].mxu1 }
 0x16c   : > { %v8076_v10 = vpop.f32.mrb[3].mxu1 }
 0x16e   : > { %1513 = vmatmul.mubr.bf16.gmra.mrb[108].mxu1 %v7962_v17 }
 0x16f   : > { %6083 = vmatprep.mubr.msk.bf16.mxu1 %vm1131_vm5, %v7968_v19  ;;  %v7098_v19 = vld [vmem:[%s10984_s3 + $0x14] ss:$8 sps:$4 sm:$0xff]  }
 0x170   : > { %3882 = vmatprep.subr.bf16.mxu0 %v7098_v19  ;;  %v7116_v19 = vld [vmem:[%s10984_s3 + $0x74] ss:$8 sps:$4 sm:$0xff]  }
 0x171   : > { %v8081_v61 = vpop.f32.mrb[4].mxu1  ;;  %3883 = vmatpush1.bf16.msra.mxu0 %v7100_v22 }
 0x172   : > { %v8083_v2 = vpop.f32.mrb[5].mxu1  ;;  %3884 = vmatprep.subr.bf16.mxu0 %v7101_v30  ;;  %v7118_v30 = vld [vmem:[%s10984_s3 + $0x70] ss:$8 sps:$4 sm:$0xff]  }
 0x173   : > { %v8085_v5 = vpop.f32.mrb[6].mxu1 }
 0x174   : > { %v8087_v37 = vpop.f32.mrb[7].mxu1 }
 0x176   : > { %1523 = vmatmul.mubr.bf16.gmra.mrb[112].mxu1 %v7975_v42 }
 0x177   : > { %6084 = vmatprep.mubr.msk.bf16.mxu1 %vm1131_vm5, %v7982_v9  ;;  %v7103_v9 = vld [vmem:[%s10984_s3 + $0x20] ss:$8 sps:$4 sm:$0xff]  }
 0x178   : > { %3885 = vmatpush1.bf16.msra.mxu0 %v7103_v9 }
 0x179   : > { %v8092_v14 = vpop.f32.mrb[8].mxu1  ;;  %3886 = vmatprep.subr.bf16.mxu0 %v7104_v31 }
 0x17a   : > { %v8094_v20 = vpop.f32.mrb[9].mxu1 }
 0x17b   : > { %v8096_v26 = vpop.f32.mrb[10].mxu1 }
 0x17c   : > { %v8098_v23 = vpop.f32.mrb[11].mxu1  ;;  %3887 = vmatpush1.bf16.msra.mxu0 %v7106_v35 }
 0x17d   : > { %3888 = vmatprep.subr.bf16.mxu0 %v7107_v4  ;;  %v7119_v4 = vld [vmem:[%s10984_s3 + $0x84] ss:$8 sps:$4 sm:$0xff]  }
 0x17e   : > { %1533 = vmatmul.mubr.bf16.gmra.mrb[116].mxu1 %v7989_v34 }
 0x17f   : > { %6085 = vmatprep.mubr.msk.bf16.mxu1 %vm1131_vm5, %v7995_v24 }
 0x180   : > { %3889 = vmatpush1.bf16.msra.mxu0 %v7109_v38  ;;  %v7121_v38 = vld [vmem:[%s10984_s3 + $0x80] ss:$8 sps:$4 sm:$0xff]  }
 0x181   : > { %v8103_v32 = vpop.f32.mrb[12].mxu1 }
 0x182   : > { %v8105_v39 = vpop.f32.mrb[13].mxu1 }
 0x183   : > { %v8107_v43 = vpop.f32.mrb[14].mxu1 }
 0x184   : > { %v8109_v45 = vpop.f32.mrb[15].mxu1 }
 0x186   : > { %1543 = vmatmul.mubr.bf16.gmra.mrb[120].mxu1 %v8002_v41  ;;  %v7110_v41 = vld [vmem:[%s10984_s3 + $0x54] ss:$8 sps:$4 sm:$0xff]  }
 0x187   : > { %6086 = vmatprep.mubr.msk.bf16.mxu1 %vm1131_vm5, %v8006_v29  ;;  %3890 = vmatprep.subr.bf16.mxu0 %v7110_v41  ;;  %v901_v41 = vlaneseq }
 0x188   : > { %3891 = vmatpush1.bf16.msra.mxu0 %v7112_v48  ;;  %v7122_v48 = vld [vmem:[%s10984_s3 + $0x94] ss:$8 sps:$4 sm:$0xff]  }
 0x189   : > { %v8114_v49 = vpop.f32.mrb[16].mxu1  ;;  %3892 = vmatprep.subr.bf16.mxu0 %v7113_v18 }
 0x18a   : > { %v8116_v47 = vpop.f32.mrb[17].mxu1 }
 0x18b   : > { %v8118_v50 = vpop.f32.mrb[18].mxu1 }
 0x18c   : > { %v8120_v51 = vpop.f32.mrb[19].mxu1  ;;  %3893 = vmatpush1.bf16.msra.mxu0 %v7115_v44  ;;  %v7124_v44 = vld [vmem:[%s10984_s3 + $0x90] ss:$8 sps:$4 sm:$0xff]  }
 0x18d   : > { %3894 = vmatprep.subr.bf16.mxu0 %v7116_v19 }
 0x18e   : > { %1553 = vmatmul.mubr.bf16.gmra.mrb[124].mxu1 %v8013_v1 }
 0x190   : > { %3895 = vmatpush1.bf16.msra.mxu0 %v7118_v30 }
 0x191   : > { %v8123_v53 = vpop.f32.mrb[20].mxu1  ;;  %3896 = vmatprep.subr.bf16.mxu0 %v7119_v4 }
 0x192   : > { %v8125_v56 = vpop.f32.mrb[21].mxu1 }
 0x193   : > { %v8127_v6 = vpop.f32.mrb[22].mxu1 }
 0x194   : > { %v8129_v7 = vpop.f32.mrb[23].mxu1  ;;  %3897 = vmatpush1.bf16.msra.mxu0 %v7121_v38  ;;  %v7125_v38 = vld [vmem:[%s10984_s3 + $0xa4] ss:$8 sps:$4 sm:$0xff]  }
 0x195   : > { %3898 = vmatprep.subr.bf16.mxu0 %v7122_v48  ;;  %v7128_v48 = vld [vmem:[%s10984_s3 + $0xb4] ss:$8 sps:$4 sm:$0xff]  }
 0x198   : > { %3899 = vmatpush1.bf16.msra.mxu0 %v7124_v44 }
 0x199   : > { %v8131_v57 = vpop.f32.mrb[24].mxu1  ;;  %3900 = vmatprep.subr.bf16.mxu0 %v7125_v38 }
 0x19a   : > { %v8133_v58 = vpop.f32.mrb[25].mxu1 }
 0x19b   : > { %v8135_v60 = vpop.f32.mrb[26].mxu1 }
 0x19c   : > { %v8137_v62 = vpop.f32.mrb[27].mxu1 }
 0x1a1   : > { %v8139_v63 = vpop.f32.mrb[28].mxu1 }
 0x1a2   : > { %v8141_v0 = vpop.f32.mrb[29].mxu1 }
 0x1a3   : > { %v8143_v15 = vpop.f32.mrb[30].mxu1 }
 0x1a4   : > { %v8145_v59 = vpop.f32.mrb[31].mxu1 }
 0x1a9   : > { %v8147_v8 = vpop.f32.mrb[32].mxu1 }
 0x1aa   : > { %v8149_v11 = vpop.f32.mrb[33].mxu1 }
 0x1ab   : > { %v8151_v28 = vpop.f32.mrb[34].mxu1 }
 0x1ac   : > { %v8153_v12 = vpop.f32.mrb[35].mxu1 }
 0x1b1   : > { %v8155_v13 = vpop.f32.mrb[36].mxu1 }
 0x1b2   : > { %v8157_v16 = vpop.f32.mrb[37].mxu1 }
 0x1b3   : > { %v8159_v17 = vpop.f32.mrb[38].mxu1 }
 0x1b4   : > { %v8161_v33 = vpop.f32.mrb[39].mxu1 }
 0x1b9   : > { %v8172_v21 = vpop.f32.mrb[40].mxu1 }
 0x1ba   : > { %v8177_v42 = vpop.f32.mrb[41].mxu1 }
 0x1bb   : > { %v8179_v27 = vpop.f32.mrb[42].mxu1 }
 0x1bc   : > { %v8181_v25 = vpop.f32.mrb[43].mxu1 }
 0x1c1   : > { %v8192_v34 = vpop.f32.mrb[44].mxu1 }
 0x1c2   : > { %11114 = vst [vmem:[#allocation2_spill] sm:$0xff] %v8192_v34  ;;  %v8197_v36 = vpop.f32.mrb[45].mxu1 }
 0x1c3   : > { %11115 = vst [vmem:[#allocation3_spill] sm:$0xff] %v8197_v36  ;;  %v8199_v40 = vpop.f32.mrb[46].mxu1 }
 0x1c4   : > { %11116 = vst [vmem:[#allocation4_spill] sm:$0xff] %v8199_v40  ;;  %v8201_v24 = vpop.f32.mrb[47].mxu1 }
 0x1c5   : > { %11117 = vst [vmem:[#allocation5_spill] sm:$0xff] %v8201_v24 }
 0x1c9   : > { %v8212_v46 = vpop.f32.mrb[48].mxu1 }
 0x1ca   : > { %11118 = vst [vmem:[#allocation6_spill] sm:$0xff] %v8212_v46  ;;  %v8217_v29 = vpop.f32.mrb[49].mxu1 }
 0x1cb   : > { %11119 = vst [vmem:[#allocation7_spill] sm:$0xff] %v8217_v29  ;;  %v8219_v52 = vpop.f32.mrb[50].mxu1 }
 0x1cc   : > { %11120 = vst [vmem:[#allocation8_spill] sm:$0xff] %v8219_v52  ;;  %v8221_v1 = vpop.f32.mrb[51].mxu1 }
 0x1cd   : > { %11121 = vst [vmem:[#allocation9_spill] sm:$0xff] %v8221_v1 }
 0x1d1   : > { %v8232_v22 = vpop.f32.mrb[52].mxu1 }
 0x1d2   : > { %11122 = vst [vmem:[#allocation10_spill] sm:$0xff] %v8232_v22  ;;  %v8237_v9 = vpop.f32.mrb[53].mxu1 }
 0x1d3   : > { %11123 = vst [vmem:[#allocation11_spill] sm:$0xff] %v8237_v9  ;;  %v8239_v31 = vpop.f32.mrb[54].mxu1 }
 0x1d4   : > { %11124 = vst [vmem:[#allocation12_spill] sm:$0xff] %v8239_v31  ;;  %v8241_v35 = vpop.f32.mrb[55].mxu1 }
 0x1d5   : > { %11125 = vst [vmem:[#allocation13_spill] sm:$0xff] %v8241_v35  ;;  %v8261_v35 = vshrl.u32 %v901_v41, 7  ;;  %v899_v41 = vld [vmem:[%s10983_s2] sm:$0xf] }
 0x1d7   : > { %11129 = vst [vmem:[#allocation17_spill] sm:$0xff] %v8261_v35  ;;  %v915_v31 = vsub.s32 3, %v8261_v35  ;;  %v11134_v9 = vsub.s32 0, %v8261_v35 }
 0x1d9   : > { %v8252_v18 = vpop.f32.mrb[56].mxu1  ;;  %v8292_v22 = vrot.slane %v899_v41, %v11134_v9 }
 0x1da   : > { %11126 = vst [vmem:[#allocation14_spill] sm:$0xff] %v8252_v18  ;;  %v8257_v19 = vpop.f32.mrb[57].mxu1  ;;  %v7127_v18 = vld [vmem:[%s10984_s3 + $0xa0] ss:$8 sps:$4 sm:$0xff]  }
 0x1db   : > { %11127 = vst [vmem:[#allocation15_spill] sm:$0xff] %v8257_v19  ;;  %v8259_v30 = vpop.f32.mrb[58].mxu1  ;;  %3901 = vmatpush1.bf16.msra.mxu0 %v7127_v18  ;;  %v911_v18 = vsub.s32 2, %v8261_v35  ;;  %v1212_v9 = vadd.f32 %v8070_v3, %v8292_v22 }
 0x1dc   : > { %11128 = vst [vmem:[#allocation16_spill] sm:$0xff] %v8259_v30  ;;  %v8263_v4 = vpop.f32.mrb[59].mxu1  ;;  %v7130_v30 = vld [vmem:[%s10984_s3 + $0xb0] ss:$8 sps:$4 sm:$0xff]   ;;  %3902 = vmatprep.subr.bf16.mxu0 %v7128_v48  ;;  %v7133_v48 = vld [vmem:[%s10984_s3 + $0xc0] ss:$8 sps:$4 sm:$0xff]  }
 0x1dd   : > { %11130 = vst [vmem:[#allocation18_spill] sm:$0xff] %v8263_v4 }
 0x1df   : > { %3903 = vmatpush1.bf16.msra.mxu0 %v7130_v30  ;;  %v8308_v30 = vrot.slane %v899_v41, %v915_v31  ;;  %v1216_v31 = vadd.f32 %v8074_v55, %v8292_v22  ;;  %v7137_v55 = vld [vmem:[%s10984_s3 + $0xe4] ss:$8 sps:$4 sm:$0xff]  }
 0x1e1   : > { %v8279_v4 = vpop.f32.mrb[60].mxu1 }
 0x1e2   : > { %11131 = vst [vmem:[#allocation19_spill] sm:$0xff] %v8279_v4  ;;  %v8284_v38 = vpop.f32.mrb[61].mxu1  ;;  %v7131_v4 = vld [vmem:[%s10984_s3 + $0xc4] ss:$8 sps:$4 sm:$0xff]  }
 0x1e3   : > { %11132 = vst [vmem:[#allocation20_spill] sm:$0xff] %v8284_v38  ;;  %v8287_v19 = vpop.f32.mrb[62].mxu1  ;;  %v11136_v38 = vsub.s32 1, %v8261_v35  ;;  %3904 = vmatprep.subr.bf16.mxu0 %v7131_v4 }
 0x1e4   : > { %11133 = vst [vmem:[#allocation21_spill] sm:$0xff] %v8287_v19  ;;  %v8294_v44 = vpop.f32.mrb[63].mxu1  ;;  %v8306_v19 = vrot.slane %v899_v41, %v911_v18  ;;  %3905 = vmatpush1.bf16.msra.mxu0 %v7133_v48  ;;  %v7136_v18 = vld [vmem:[%s10984_s3 + $0xd0] ss:$8 sps:$4 sm:$0xff]  }
 0x1e5   : > { %11135 = vst [vmem:[#allocation22_spill] sm:$0xff] %v8294_v44  ;;  %v8301_v1 = vrot.slane %v899_v41, %v11136_v38  ;;  %v7134_v44 = vld [vmem:[%s10984_s3 + $0xd4] ss:$8 sps:$4 sm:$0xff]  }
 0x1e6   : > { %3906 = vmatprep.subr.bf16.mxu0 %v7134_v44 }
 0x1e7   : > { %v1214_v38 = vadd.f32 %v8072_v54, %v8301_v1  ;;  %v1218_v3 = vadd.f32 %v8076_v10, %v8301_v1  ;;  %v1563_v54 = vmax.f32 %v1212_v9, 0.0  ;;  %v7139_v10 = vld [vmem:[%s10984_s3 + $0xe0] ss:$8 sps:$4 sm:$0xff]  }
 0x1e8   : > { %3907 = vmatpush1.bf16.msra.mxu0 %v7136_v18 }
 0x1e9   : > { %v1404_v35 = vpop.f32.mrb[64].mxu1  ;;  %v1564_v40 = vmax.f32 %v1214_v38, 0.0  ;;  %3908 = vmatprep.subr.bf16.mxu0 %v7137_v55  ;;  %v1568_v18 = vmax.f32 %v1218_v3, 0.0  ;;  %v1222_v38 = vadd.f32 %v8081_v61, %v8292_v22  ;;  %v1226_v3 = vadd.f32 %v8085_v5, %v8292_v22 }
 0x1ea   : > { %v1405_v4 = vadd.f32 %v1404_v35, %v8306_v19  ;;  %v1406_v41 = vpop.f32.mrb[65].mxu1  ;;  %v1228_v55 = vadd.f32 %v8087_v37, %v8301_v1 }
 0x1eb   : > { %v1407_v48 = vadd.f32 %v1406_v41, %v8308_v30  ;;  %v1408_v52 = vpop.f32.mrb[66].mxu1  ;;  %v1567_v41 = vmax.f32 %v1216_v31, 0.0 }
 0x1ec   : > { %v1565_v29 = vmax.f32 %v1405_v4, 0.0  ;;  %v1409_v46 = vadd.f32 %v1408_v52, %v8306_v19  ;;  %v1410_v24 = vpop.f32.mrb[67].mxu1  ;;  %3909 = vmatpush1.bf16.msra.mxu0 %v7139_v10  ;;  %v1571_v10 = vmax.f32 %v1222_v38, 0.0 }
 0x1ed   : > { %v1566_v35 = vmax.f32 %v1407_v48, 0.0  ;;  %v1411_v44 = vadd.f32 %v1410_v24, %v8308_v30  ;;  %v7140_v24 = vld [vmem:[%s10984_s3 + $0xf4] ss:$8 sps:$4 sm:$0xff]  }
 0x1ee   : > { %v8334_v36 = vmax.f32 %v1563_v54, %v1565_v29  ;;  %v1569_v9 = vmax.f32 %v1409_v46, 0.0  ;;  %v7142_v29 = vld [vmem:[%s10984_s3 + $0xf0] ss:$8 sps:$4 sm:$0xff]   ;;  %v1224_v46 = vadd.f32 %v8083_v2, %v8301_v1  ;;  %3910 = vmatprep.subr.bf16.mxu0 %v7140_v24 }
 0x1ef   : > { %v8336_v52 = vmax.f32 %v1564_v40, %v1566_v35  ;;  %v1570_v4 = vmax.f32 %v1411_v44, 0.0 }
 0x1f0   : > { %v8340_v48 = vmax.f32 %v1567_v41, %v1569_v9  ;;  %3911 = vmatpush1.bf16.msra.mxu0 %v7142_v29  ;;  %v1232_v29 = vadd.f32 %v8092_v14, %v8292_v22 }
 0x1f1   : > { %v8350_v40 = vmax.f32 %v1568_v18, %v1570_v4  ;;  %v1414_v31 = vpop.f32.mrb[68].mxu1  ;;  %v1572_v18 = vmax.f32 %v1224_v46, 0.0  ;;  %v1234_v46 = vadd.f32 %v8094_v20, %v8301_v1 }
 0x1f2   : > { %11137 = vst [vmem:[#allocation23_spill] sm:$0xff] %v8340_v48  ;;  %v1415_v61 = vadd.f32 %v1414_v31, %v8306_v19  ;;  %v1416_v54 = vpop.f32.mrb[69].mxu1  ;;  %v1575_v48 = vmax.f32 %v1226_v3, 0.0 }
 0x1f3   : > { %11138 = vst [vmem:[#allocation24_spill] sm:$0xff] %v8350_v40  ;;  %v1417_v35 = vadd.f32 %v1416_v54, %v8308_v30  ;;  %v1418_v44 = vpop.f32.mrb[70].mxu1  ;;  %v1576_v40 = vmax.f32 %v1228_v55, 0.0 }
 0x1f4   : > { %v1573_v41 = vmax.f32 %v1415_v61, 0.0  ;;  %v1419_v2 = vadd.f32 %v1418_v44, %v8306_v19  ;;  %v1420_v9 = vpop.f32.mrb[71].mxu1 }
 0x1f5   : > { %v1574_v4 = vmax.f32 %v1417_v35, 0.0  ;;  %v1421_v5 = vadd.f32 %v1420_v9, %v8308_v30  ;;  %v1236_v35 = vadd.f32 %v8096_v26, %v8292_v22  ;;  %v1580_v26 = vmax.f32 %v1234_v46, 0.0 }
 0x1f6   : > { %v8360_v31 = vmax.f32 %v1571_v10, %v1573_v41  ;;  %v1577_v24 = vmax.f32 %v1419_v2, 0.0  ;;  %v1579_v10 = vmax.f32 %v1232_v29, 0.0 }
 0x1f7   : > { %v8362_v34 = vmax.f32 %v1572_v18, %v1574_v4  ;;  %v1578_v37 = vmax.f32 %v1421_v5, 0.0  ;;  %v1583_v5 = vmax.f32 %v1236_v35, 0.0  ;;  %v1246_v35 = vadd.f32 %v8107_v43, %v8292_v22 }
 0x1f8   : > { %v8366_v38 = vmax.f32 %v1575_v48, %v1577_v24  ;;  %v6796_v61 = vpack.i.bf16 %v8360_v31, %v8334_v36  ;;  %v1238_v48 = vadd.f32 %v8098_v23, %v8301_v1 }
 0x1f9   : > { %v8372_v54 = vmax.f32 %v1576_v40, %v1578_v37  ;;  %v1424_v3 = vpop.f32.mrb[72].mxu1  ;;  %v6791_v55 = vpack.i.bf16 %v8362_v34, %v8336_v52 }
 0x1fa   : > { %11139 = vst [vmem:[#allocation25_spill] sm:$0xff] %v8366_v38  ;;  %v1425_v44 = vadd.f32 %v1424_v3, %v8306_v19  ;;  %v1426_v14 = vpop.f32.mrb[73].mxu1  ;;  %6797 = vrot.lane.b32.xlu1 %v6796_v61, %s7421_s19  ;;  %v1584_v61 = vmax.f32 %v1238_v48, 0.0 }
 0x1fb   : > { %v1427_v20 = vadd.f32 %v1426_v14, %v8308_v30  ;;  %v1428_v40 = vpop.f32.mrb[74].mxu1  ;;  %6792 = vrot.lane.b32.xlu0 %v6791_v55, %s7421_s19  ;;  %v1242_v55 = vadd.f32 %v8103_v32, %v8292_v22 }
 0x1fc   : > { %v1581_v41 = vmax.f32 %v1425_v44, 0.0  ;;  %v1429_v2 = vadd.f32 %v1428_v40, %v8306_v19  ;;  %v1430_v9 = vpop.f32.mrb[75].mxu1  ;;  %v1244_v44 = vadd.f32 %v8105_v39, %v8301_v1  ;;  %v1248_v40 = vadd.f32 %v8109_v45, %v8301_v1 }
 0x1fd   : > { %v1582_v18 = vmax.f32 %v1427_v20, 0.0  ;;  %v1431_v4 = vadd.f32 %v1430_v9, %v8308_v30 }
 0x1fe   : > { %v8386_v24 = vmax.f32 %v1579_v10, %v1581_v41  ;;  %v1585_v37 = vmax.f32 %v1429_v2, 0.0  ;;  %v1587_v41 = vmax.f32 %v1242_v55, 0.0 }
 0x1ff   : > { %v8388_v23 = vmax.f32 %v1580_v26, %v1582_v18  ;;  %v1586_v3 = vmax.f32 %v1431_v4, 0.0  ;;  %v1588_v26 = vmax.f32 %v1244_v44, 0.0  ;;  %v1254_v44 = vadd.f32 %v8116_v47, %v8301_v1 }
 0x200   : > { %v8392_v29 = vmax.f32 %v1583_v5, %v1585_v37  ;;  %v1591_v5 = vmax.f32 %v1246_v35, 0.0 }
 0x201   : > { %v8396_v46 = vmax.f32 %v1584_v61, %v1586_v3  ;;  %v1434_v14 = vpop.f32.mrb[76].mxu1  ;;  %v1592_v61 = vmax.f32 %v1248_v40, 0.0 }
 0x202   : > { %v1435_v20 = vadd.f32 %v1434_v14, %v8306_v19  ;;  %v1436_v48 = vpop.f32.mrb[77].mxu1  ;;  %v1252_v14 = vadd.f32 %v8114_v49, %v8292_v22 }
 0x203   : > { %v1437_v10 = vadd.f32 %v1436_v48, %v8308_v30  ;;  %v1438_v32 = vpop.f32.mrb[78].mxu1 }
 0x204   : > { %v1589_v2 = vmax.f32 %v1435_v20, 0.0  ;;  %v1439_v9 = vadd.f32 %v1438_v32, %v8306_v19  ;;  %v1440_v39 = vpop.f32.mrb[79].mxu1 }
 0x205   : > { %v1590_v18 = vmax.f32 %v1437_v10, 0.0  ;;  %v1441_v4 = vadd.f32 %v1440_v39, %v8308_v30  ;;  %v1256_v10 = vadd.f32 %v8118_v50, %v8292_v22 }
 0x206   : > { %v8406_v43 = vmax.f32 %v1587_v41, %v1589_v2  ;;  %v1593_v37 = vmax.f32 %v1439_v9, 0.0  ;;  %v1258_v41 = vadd.f32 %v8120_v51, %v8301_v1  ;;  %v1595_v9 = vmax.f32 %v1252_v14, 0.0 }
 0x207   : > { %v8408_v3 = vmax.f32 %v1588_v26, %v1590_v18  ;;  %v1594_v45 = vmax.f32 %v1441_v4, 0.0  ;;  %v1596_v4 = vmax.f32 %v1254_v44, 0.0 }
 0x208   : > { %v8412_v55 = vmax.f32 %v1591_v5, %v1593_v37  ;;  %v6806_v20 = vpack.i.bf16 %v8406_v43, %v8386_v24  ;;  %v1599_v37 = vmax.f32 %v1256_v10, 0.0  ;;  %v1266_v10 = vadd.f32 %v8127_v6, %v8292_v22 }
 0x209   : > { %v8418_v48 = vmax.f32 %v1592_v61, %v1594_v45  ;;  %v1444_v35 = vpop.f32.mrb[80].mxu1  ;;  %v6801_v40 = vpack.i.bf16 %v8408_v3, %v8388_v23 }
 0x20a   : > { %v1445_v32 = vadd.f32 %v1444_v35, %v8306_v19  ;;  %v1446_v49 = vpop.f32.mrb[81].mxu1  ;;  %6807 = vrot.lane.b32.xlu1 %v6806_v20, %s7421_s19  ;;  %v1600_v20 = vmax.f32 %v1258_v41, 0.0 }
 0x20b   : > { %v1447_v2 = vadd.f32 %v1446_v49, %v8308_v30  ;;  %v1448_v47 = vpop.f32.mrb[82].mxu1  ;;  %6802 = vrot.lane.b32.xlu0 %v6801_v40, %s7421_s19  ;;  %v1262_v40 = vadd.f32 %v8123_v53, %v8292_v22 }
 0x20c   : > { %v1597_v39 = vmax.f32 %v1445_v32, 0.0  ;;  %v1449_v26 = vadd.f32 %v1448_v47, %v8306_v19  ;;  %v1450_v18 = vpop.f32.mrb[83].mxu1  ;;  %v1264_v32 = vadd.f32 %v8125_v56, %v8301_v1  ;;  %v1268_v47 = vadd.f32 %v8129_v7, %v8301_v1 }
 0x20d   : > { %v1598_v50 = vmax.f32 %v1447_v2, 0.0  ;;  %v1451_v5 = vadd.f32 %v1450_v18, %v8308_v30 }
 0x20e   : > { %v8432_v61 = vmax.f32 %v1595_v9, %v1597_v39  ;;  %v1601_v45 = vmax.f32 %v1449_v26, 0.0  ;;  %v1603_v39 = vmax.f32 %v1262_v40, 0.0 }
 0x20f   : > { %v8434_v51 = vmax.f32 %v1596_v4, %v1598_v50  ;;  %v1602_v35 = vmax.f32 %v1451_v5, 0.0  ;;  %v1604_v4 = vmax.f32 %v1264_v32, 0.0  ;;  %v1274_v32 = vadd.f32 %v8133_v58, %v8301_v1 }
 0x210   : > { %v8438_v14 = vmax.f32 %v1599_v37, %v1601_v45  ;;  %v1607_v37 = vmax.f32 %v1266_v10, 0.0 }
 0x211   : > { %v8442_v44 = vmax.f32 %v1600_v20, %v1602_v35  ;;  %v1454_v49 = vpop.f32.mrb[84].mxu1  ;;  %v1608_v20 = vmax.f32 %v1268_v47, 0.0 }
 0x212   : > { %v1455_v2 = vadd.f32 %v1454_v49, %v8306_v19  ;;  %v1456_v41 = vpop.f32.mrb[85].mxu1  ;;  %v1272_v49 = vadd.f32 %v8131_v57, %v8292_v22 }
 0x213   : > { %v1457_v9 = vadd.f32 %v1456_v41, %v8308_v30  ;;  %v1458_v53 = vpop.f32.mrb[86].mxu1 }
 0x214   : > { %v1605_v26 = vmax.f32 %v1455_v2, 0.0  ;;  %v1459_v18 = vadd.f32 %v1458_v53, %v8306_v19  ;;  %v1460_v56 = vpop.f32.mrb[87].mxu1 }
 0x215   : > { %v1606_v50 = vmax.f32 %v1457_v9, 0.0  ;;  %v1461_v5 = vadd.f32 %v1460_v56, %v8308_v30  ;;  %v1276_v9 = vadd.f32 %v8135_v60, %v8292_v22 }
 0x216   : > { %v8452_v6 = vmax.f32 %v1603_v39, %v1605_v26  ;;  %v1609_v45 = vmax.f32 %v1459_v18, 0.0  ;;  %v1278_v39 = vadd.f32 %v8137_v62, %v8301_v1  ;;  %v1611_v18 = vmax.f32 %v1272_v49, 0.0 }
 0x217   : > { %v8454_v35 = vmax.f32 %v1604_v4, %v1606_v50  ;;  %v1610_v7 = vmax.f32 %v1461_v5, 0.0  ;;  %v1612_v5 = vmax.f32 %v1274_v32, 0.0 }
 0x218   : > { %v8458_v40 = vmax.f32 %v1607_v37, %v1609_v45  ;;  %v6816_v2 = vpack.i.bf16 %v8452_v6, %v8432_v61  ;;  %v1615_v45 = vmax.f32 %v1276_v9, 0.0  ;;  %v1286_v9 = vadd.f32 %v8143_v15, %v8292_v22 }
 0x219   : > { %v8464_v41 = vmax.f32 %v1608_v20, %v1610_v7  ;;  %v1464_v10 = vpop.f32.mrb[88].mxu1  ;;  %v6811_v47 = vpack.i.bf16 %v8454_v35, %v8434_v51 }
 0x21a   : > { %v1465_v53 = vadd.f32 %v1464_v10, %v8306_v19  ;;  %v1466_v57 = vpop.f32.mrb[89].mxu1  ;;  %6817 = vrot.lane.b32.xlu1 %v6816_v2, %s7421_s19  ;;  %v1616_v2 = vmax.f32 %v1278_v39, 0.0 }
 0x21b   : > { %v1467_v26 = vadd.f32 %v1466_v57, %v8308_v30  ;;  %v1468_v58 = vpop.f32.mrb[90].mxu1  ;;  %6812 = vrot.lane.b32.xlu0 %v6811_v47, %s7421_s19  ;;  %v1282_v47 = vadd.f32 %v8139_v63, %v8292_v22 }
 0x21c   : > { %v1613_v56 = vmax.f32 %v1465_v53, 0.0  ;;  %v1469_v4 = vadd.f32 %v1468_v58, %v8306_v19  ;;  %v1470_v50 = vpop.f32.mrb[91].mxu1  ;;  %v1284_v53 = vadd.f32 %v8141_v0, %v8301_v1  ;;  %v1288_v58 = vadd.f32 %v8145_v59, %v8301_v1 }
 0x21d   : > { %v1614_v60 = vmax.f32 %v1467_v26, 0.0  ;;  %v1471_v37 = vadd.f32 %v1470_v50, %v8308_v30 }
 0x21e   : > { %v8478_v20 = vmax.f32 %v1611_v18, %v1613_v56  ;;  %v1617_v7 = vmax.f32 %v1469_v4, 0.0  ;;  %v1619_v56 = vmax.f32 %v1282_v47, 0.0 }
 0x21f   : > { %v8480_v62 = vmax.f32 %v1612_v5, %v1614_v60  ;;  %v1618_v10 = vmax.f32 %v1471_v37, 0.0  ;;  %v1620_v5 = vmax.f32 %v1284_v53, 0.0  ;;  %v1294_v53 = vadd.f32 %v8149_v11, %v8301_v1 }
 0x220   : > { %11140 = vst [vmem:[#allocation26_spill] sm:$0xff] %v8478_v20  ;;  %v8484_v49 = vmax.f32 %v1615_v45, %v1617_v7  ;;  %v1623_v45 = vmax.f32 %v1286_v9, 0.0 }
 0x221   : > { %11141 = vst [vmem:[#allocation27_spill] sm:$0xff] %v8480_v62  ;;  %v8488_v32 = vmax.f32 %v1616_v2, %v1618_v10  ;;  %v1474_v57 = vpop.f32.mrb[92].mxu1  ;;  %v1624_v2 = vmax.f32 %v1288_v58, 0.0 }
 0x222   : > { %v1475_v26 = vadd.f32 %v1474_v57, %v8306_v19  ;;  %v1476_v39 = vpop.f32.mrb[93].mxu1  ;;  %v1292_v57 = vadd.f32 %v8147_v8, %v8292_v22 }
 0x223   : > { %v1477_v18 = vadd.f32 %v1476_v39, %v8308_v30  ;;  %v1478_v63 = vpop.f32.mrb[94].mxu1 }
 0x224   : > { %v1621_v4 = vmax.f32 %v1475_v26, 0.0  ;;  %v1479_v50 = vadd.f32 %v1478_v63, %v8306_v19  ;;  %v1480_v0 = vpop.f32.mrb[95].mxu1 }
 0x225   : > { %v1622_v60 = vmax.f32 %v1477_v18, 0.0  ;;  %v1481_v37 = vadd.f32 %v1480_v0, %v8308_v30  ;;  %v1296_v18 = vadd.f32 %v8151_v28, %v8292_v22 }
 0x226   : > { %v8498_v15 = vmax.f32 %v1619_v56, %v1621_v4  ;;  %v1625_v7 = vmax.f32 %v1479_v50, 0.0  ;;  %v1298_v56 = vadd.f32 %v8153_v12, %v8301_v1  ;;  %v1627_v50 = vmax.f32 %v1292_v57, 0.0  ;;  %v7145_v57 = vld [vmem:[%s10984_s3 + $0x104] ss:$8 sps:$4 sm:$0xff]  }
 0x227   : > { %v8500_v10 = vmax.f32 %v1620_v5, %v1622_v60  ;;  %v1626_v59 = vmax.f32 %v1481_v37, 0.0  ;;  %v1628_v37 = vmax.f32 %v1294_v53, 0.0  ;;  %v1304_v53 = vadd.f32 %v8157_v16, %v8301_v1  ;;  %3993 = vmatprep.subr.bf16.mxu0 %v7145_v57 }
 0x228   : > { %11142 = vst [vmem:[#allocation28_spill] sm:$0xff] %v8498_v15  ;;  %v8504_v47 = vmax.f32 %v1623_v45, %v1625_v7  ;;  %v6826_v26 = vpack.i.bf16 %v8498_v15, %v8478_v20  ;;  %v1631_v7 = vmax.f32 %v1296_v18, 0.0 }
 0x229   : > { %11143 = vst [vmem:[#allocation29_spill] sm:$0xff] %v8500_v10  ;;  %v8510_v39 = vmax.f32 %v1624_v2, %v1626_v59  ;;  %v1484_v9 = vpop.f32.mrb[96].mxu1  ;;  %v6821_v58 = vpack.i.bf16 %v8500_v10, %v8480_v62 }
 0x22a   : > { %v1485_v63 = vadd.f32 %v1484_v9, %v8306_v19  ;;  %v1486_v8 = vpop.f32.mrb[97].mxu1  ;;  %6827 = vrot.lane.b32.xlu1 %v6826_v26, %s7421_s19  ;;  %v1632_v26 = vmax.f32 %v1298_v56, 0.0  ;;  %v1306_v56 = vadd.f32 %v8159_v17, %v8292_v22 }
 0x22b   : > { %v1487_v4 = vadd.f32 %v1486_v8, %v8308_v30  ;;  %v1488_v11 = vpop.f32.mrb[98].mxu1  ;;  %6822 = vrot.lane.b32.xlu0 %v6821_v58, %s7421_s19  ;;  %v1302_v58 = vadd.f32 %v8155_v13, %v8292_v22 }
 0x22c   : > { %v1629_v0 = vmax.f32 %v1485_v63, 0.0  ;;  %v1489_v5 = vadd.f32 %v1488_v11, %v8306_v19  ;;  %v1490_v60 = vpop.f32.mrb[99].mxu1 }
 0x22d   : > { %v1630_v28 = vmax.f32 %v1487_v4, 0.0  ;;  %v1491_v45 = vadd.f32 %v1490_v60, %v8308_v30 }
 0x22e   : > { %v8524_v2 = vmax.f32 %v1627_v50, %v1629_v0  ;;  %v1633_v59 = vmax.f32 %v1489_v5, 0.0  ;;  %v1308_v50 = vadd.f32 %v8161_v33, %v8301_v1  ;;  %v1635_v5 = vmax.f32 %v1302_v58, 0.0 }
 0x22f   : > { %v8526_v12 = vmax.f32 %v1628_v37, %v1630_v28  ;;  %v1634_v9 = vmax.f32 %v1491_v45, 0.0  ;;  %v1636_v28 = vmax.f32 %v1304_v53, 0.0  ;;  %v1314_v53 = vadd.f32 %v8177_v42, %v8301_v1 }
 0x230   : > { %11144 = vst [vmem:[#allocation30_spill] sm:$0xff] %v8524_v2  ;;  %v8533_v63 = vmax.f32 %v1631_v7, %v1633_v59  ;;  %v1639_v59 = vmax.f32 %v1306_v56, 0.0 }
 0x231   : > { %11145 = vst [vmem:[#allocation31_spill] sm:$0xff] %v8526_v12  ;;  %v8537_v18 = vmax.f32 %v1632_v26, %v1634_v9  ;;  %v1494_v8 = vpop.f32.mrb[100].mxu1  ;;  %v1640_v9 = vmax.f32 %v1308_v50, 0.0 }
 0x232   : > { %11146 = vst [vmem:[#allocation32_spill] sm:$0xff] %v8533_v63  ;;  %v1495_v4 = vadd.f32 %v1494_v8, %v8306_v19  ;;  %v1496_v11 = vpop.f32.mrb[101].mxu1  ;;  %v1312_v8 = vadd.f32 %v8172_v21, %v8292_v22 }
 0x233   : > { %v1497_v13 = vadd.f32 %v1496_v11, %v8308_v30  ;;  %v1498_v0 = vpop.f32.mrb[102].mxu1 }
 0x234   : > { %v1637_v60 = vmax.f32 %v1495_v4, 0.0  ;;  %v1499_v16 = vadd.f32 %v1498_v0, %v8306_v19  ;;  %v1500_v37 = vpop.f32.mrb[103].mxu1 }
 0x235   : > { %v1638_v45 = vmax.f32 %v1497_v13, 0.0  ;;  %v1501_v7 = vadd.f32 %v1500_v37, %v8308_v30  ;;  %v1316_v13 = vadd.f32 %v8179_v27, %v8292_v22 }
 0x236   : > { %v8547_v17 = vmax.f32 %v1635_v5, %v1637_v60  ;;  %v1641_v26 = vmax.f32 %v1499_v16, 0.0  ;;  %v1318_v5 = vadd.f32 %v8181_v25, %v8301_v1  ;;  %v1643_v16 = vmax.f32 %v1312_v8, 0.0 }
 0x237   : > { %v8549_v57 = vmax.f32 %v1636_v28, %v1638_v45  ;;  %v1642_v33 = vmax.f32 %v1501_v7, 0.0  ;;  %v1644_v7 = vmax.f32 %v1314_v53, 0.0 }
 0x238   : > { %11147 = vst [vmem:[#allocation33_spill] sm:$0xff] %v8547_v17  ;;  %v8553_v58 = vmax.f32 %v1639_v59, %v1641_v26  ;;  %v6836_v4 = vpack.i.bf16 %v8547_v17, %v8524_v2  ;;  %v1647_v26 = vmax.f32 %v1316_v13, 0.0  ;;  %v11155_v13 = vld [vmem:[#allocation4_spill] sm:$0xff] }
 0x239   : > { %11148 = vst [vmem:[#allocation34_spill] sm:$0xff] %v8549_v57  ;;  %v8559_v11 = vmax.f32 %v1640_v9, %v1642_v33  ;;  %v1504_v56 = vpop.f32.mrb[104].mxu1  ;;  %v6831_v50 = vpack.i.bf16 %v8549_v57, %v8526_v12 }
 0x23a   : > { %11149 = vst [vmem:[#allocation35_spill] sm:$0xff] %v8553_v58  ;;  %v1505_v0 = vadd.f32 %v1504_v56, %v8306_v19  ;;  %v1506_v21 = vpop.f32.mrb[105].mxu1  ;;  %6837 = vrot.lane.b32.xlu1 %v6836_v4, %s7421_s19  ;;  %v1648_v4 = vmax.f32 %v1318_v5, 0.0 }
 0x23b   : > { %v1507_v60 = vadd.f32 %v1506_v21, %v8308_v30  ;;  %v1508_v42 = vpop.f32.mrb[106].mxu1  ;;  %6832 = vrot.lane.b32.xlu0 %v6831_v50, %s7421_s19  ;;  %v11152_v21 = vld [vmem:[#allocation2_spill] sm:$0xff] }
 0x23c   : > { %v1645_v37 = vmax.f32 %v1505_v0, 0.0  ;;  %v1509_v28 = vadd.f32 %v1508_v42, %v8306_v19  ;;  %v1510_v45 = vpop.f32.mrb[107].mxu1  ;;  %v1322_v50 = vadd.f32 %v11152_v21, %v8292_v22  ;;  %v11154_v0 = vld [vmem:[#allocation3_spill] sm:$0xff] }
 0x23d   : > { %v1646_v27 = vmax.f32 %v1507_v60, 0.0  ;;  %v1511_v59 = vadd.f32 %v1510_v45, %v8308_v30  ;;  %v1324_v42 = vadd.f32 %v11154_v0, %v8301_v1 }
 0x23e   : > { %v8573_v9 = vmax.f32 %v1643_v16, %v1645_v37  ;;  %v1649_v33 = vmax.f32 %v1509_v28, 0.0  ;;  %v1326_v16 = vadd.f32 %v11155_v13, %v8292_v22  ;;  %v11156_v28 = vld [vmem:[#allocation5_spill] sm:$0xff] }
 0x23f   : > { %v8575_v25 = vmax.f32 %v1644_v7, %v1646_v27  ;;  %v1650_v56 = vmax.f32 %v1511_v59, 0.0  ;;  %v1328_v45 = vadd.f32 %v11156_v28, %v8301_v1  ;;  %v1651_v59 = vmax.f32 %v1322_v50, 0.0 }
 0x240   : > { %11150 = vst [vmem:[#allocation36_spill] sm:$0xff] %v8573_v9  ;;  %v8579_v8 = vmax.f32 %v1647_v26, %v1649_v33  ;;  %v1655_v17 = vmax.f32 %v1326_v16, 0.0 }
 0x241   : > { %11151 = vst [vmem:[#allocation37_spill] sm:$0xff] %v8575_v25  ;;  %v8583_v53 = vmax.f32 %v1648_v4, %v1650_v56  ;;  %v1514_v60 = vpop.f32.mrb[108].mxu1  ;;  %v1652_v4 = vmax.f32 %v1324_v42, 0.0  ;;  %v1656_v2 = vmax.f32 %v1328_v45, 0.0  ;;  %v11161_v42 = vld [vmem:[#allocation7_spill] sm:$0xff] }
 0x242   : > { %11153 = vst [vmem:[#allocation2_spill] sm:$0xff] %v8579_v8  ;;  %v1515_v37 = vadd.f32 %v1514_v60, %v8306_v19  ;;  %v1516_v5 = vpop.f32.mrb[109].mxu1 }
 0x243   : > { %v1517_v7 = vadd.f32 %v1516_v5, %v8308_v30  ;;  %v1518_v27 = vpop.f32.mrb[110].mxu1  ;;  %v11159_v5 = vld [vmem:[#allocation6_spill] sm:$0xff] }
 0x244   : > { %v1653_v26 = vmax.f32 %v1515_v37, 0.0  ;;  %v1519_v33 = vadd.f32 %v1518_v27, %v8306_v19  ;;  %v1520_v21 = vpop.f32.mrb[111].mxu1  ;;  %v1332_v57 = vadd.f32 %v11159_v5, %v8292_v22 }
 0x245   : > { %v1654_v56 = vmax.f32 %v1517_v7, 0.0  ;;  %v1521_v0 = vadd.f32 %v1520_v21, %v8308_v30  ;;  %v1334_v7 = vadd.f32 %v11161_v42, %v8301_v1 }
 0x246   : > { %v8593_v13 = vmax.f32 %v1651_v59, %v1653_v26  ;;  %v1657_v60 = vmax.f32 %v1519_v33, 0.0  ;;  %v11162_v59 = vld [vmem:[#allocation8_spill] sm:$0xff] }
 0x247   : > { %v8595_v12 = vmax.f32 %v1652_v4, %v1654_v56  ;;  %v1658_v28 = vmax.f32 %v1521_v0, 0.0  ;;  %v1336_v26 = vadd.f32 %v11162_v59, %v8292_v22  ;;  %v1660_v42 = vmax.f32 %v1334_v7, 0.0 }
 0x248   : > { %11157 = vst [vmem:[#allocation3_spill] sm:$0xff] %v8593_v13  ;;  %v8599_v50 = vmax.f32 %v1655_v17, %v1657_v60  ;;  %v6846_v37 = vpack.i.bf16 %v8593_v13, %v8573_v9  ;;  %v11163_v17 = vld [vmem:[#allocation9_spill] sm:$0xff] }
 0x249   : > { %11158 = vst [vmem:[#allocation4_spill] sm:$0xff] %v8595_v12  ;;  %v8605_v27 = vmax.f32 %v1656_v2, %v1658_v28  ;;  %v1524_v16 = vpop.f32.mrb[112].mxu1  ;;  %v6841_v45 = vpack.i.bf16 %v8595_v12, %v8575_v25  ;;  %v1338_v4 = vadd.f32 %v11163_v17, %v8301_v1  ;;  %v1659_v2 = vmax.f32 %v1332_v57, 0.0  ;;  %v11166_v12 = vld [vmem:[#allocation10_spill] sm:$0xff] }
 0x24a   : > { %11160 = vst [vmem:[#allocation5_spill] sm:$0xff] %v8599_v50  ;;  %v1525_v33 = vadd.f32 %v1524_v16, %v8306_v19  ;;  %v1526_v21 = vpop.f32.mrb[113].mxu1  ;;  %6847 = vrot.lane.b32.xlu1 %v6846_v37, %s7421_s19  ;;  %v1663_v13 = vmax.f32 %v1336_v26, 0.0  ;;  %v11169_v26 = vld [vmem:[#allocation12_spill] sm:$0xff] }
 0x24b   : > { %v1527_v56 = vadd.f32 %v1526_v21, %v8308_v30  ;;  %v1528_v0 = vpop.f32.mrb[114].mxu1  ;;  %6842 = vrot.lane.b32.xlu0 %v6841_v45, %s7421_s19  ;;  %v1664_v25 = vmax.f32 %v1338_v4, 0.0  ;;  %v1342_v45 = vadd.f32 %v11166_v12, %v8292_v22 }
 0x24c   : > { %v1661_v60 = vmax.f32 %v1525_v33, 0.0  ;;  %v1529_v28 = vadd.f32 %v1528_v0, %v8306_v19  ;;  %v1530_v5 = vpop.f32.mrb[115].mxu1  ;;  %v11168_v33 = vld [vmem:[#allocation11_spill] sm:$0xff] }
 0x24d   : > { %v1662_v59 = vmax.f32 %v1527_v56, 0.0  ;;  %v1531_v16 = vadd.f32 %v1530_v5, %v8308_v30  ;;  %v1344_v0 = vadd.f32 %v11168_v33, %v8301_v1 }
 0x24e   : > { %v8619_v9 = vmax.f32 %v1659_v2, %v1661_v60  ;;  %v1665_v37 = vmax.f32 %v1529_v28, 0.0  ;;  %v1346_v2 = vadd.f32 %v11169_v26, %v8292_v22  ;;  %v11170_v28 = vld [vmem:[#allocation13_spill] sm:$0xff] }
 0x24f   : > { %v8621_v17 = vmax.f32 %v1660_v42, %v1662_v59  ;;  %v1666_v21 = vmax.f32 %v1531_v16, 0.0  ;;  %v1348_v5 = vadd.f32 %v11170_v28, %v8301_v1 }
 0x250   : > { %11164 = vst [vmem:[#allocation6_spill] sm:$0xff] %v8619_v9  ;;  %v8625_v57 = vmax.f32 %v1663_v13, %v1665_v37  ;;  %v1667_v13 = vmax.f32 %v1342_v45, 0.0  ;;  %v1671_v15 = vmax.f32 %v1346_v2, 0.0 }
 0x251   : > { %11165 = vst [vmem:[#allocation7_spill] sm:$0xff] %v8621_v17  ;;  %v8629_v7 = vmax.f32 %v1664_v25, %v1666_v21  ;;  %v1534_v56 = vpop.f32.mrb[116].mxu1  ;;  %v1668_v25 = vmax.f32 %v1344_v0, 0.0  ;;  %v1672_v20 = vmax.f32 %v1348_v5, 0.0  ;;  %v11175_v0 = vld [vmem:[#allocation15_spill] sm:$0xff] }
 0x252   : > { %11167 = vst [vmem:[#allocation8_spill] sm:$0xff] %v8625_v57  ;;  %v1535_v60 = vadd.f32 %v1534_v56, %v8306_v19  ;;  %v1536_v4 = vpop.f32.mrb[117].mxu1 }
 0x253   : > { %v1537_v42 = vadd.f32 %v1536_v4, %v8308_v30  ;;  %v1538_v12 = vpop.f32.mrb[118].mxu1  ;;  %v11173_v4 = vld [vmem:[#allocation14_spill] sm:$0xff] }
 0x254   : > { %v1669_v59 = vmax.f32 %v1535_v60, 0.0  ;;  %v1539_v16 = vadd.f32 %v1538_v12, %v8306_v19  ;;  %v1540_v37 = vpop.f32.mrb[119].mxu1  ;;  %v1352_v10 = vadd.f32 %v11173_v4, %v8292_v22 }
 0x255   : > { %v1670_v21 = vmax.f32 %v1537_v42, 0.0  ;;  %v1541_v33 = vadd.f32 %v1540_v37, %v8308_v30  ;;  %v1354_v42 = vadd.f32 %v11175_v0, %v8301_v1 }
 0x256   : > { %v8639_v26 = vmax.f32 %v1667_v13, %v1669_v59  ;;  %v1673_v56 = vmax.f32 %v1539_v16, 0.0  ;;  %v11176_v13 = vld [vmem:[#allocation16_spill] sm:$0xff] }
 0x257   : > { %v8641_v62 = vmax.f32 %v1668_v25, %v1670_v21  ;;  %v1674_v28 = vmax.f32 %v1541_v33, 0.0  ;;  %v1356_v59 = vadd.f32 %v11176_v13, %v8292_v22  ;;  %v1676_v0 = vmax.f32 %v1354_v42, 0.0 }
 0x258   : > { %11171 = vst [vmem:[#allocation9_spill] sm:$0xff] %v8639_v26  ;;  %v8645_v45 = vmax.f32 %v1671_v15, %v1673_v56  ;;  %v6856_v60 = vpack.i.bf16 %v8639_v26, %v8619_v9  ;;  %v11177_v15 = vld [vmem:[#allocation18_spill] sm:$0xff]  ;;  %v11178_v26 = vld [vmem:[#allocation24_spill] sm:$0xff] }
 0x259   : > { %11172 = vst [vmem:[#allocation10_spill] sm:$0xff] %v8641_v62  ;;  %v8651_v12 = vmax.f32 %v1672_v20, %v1674_v28  ;;  %v1544_v2 = vpop.f32.mrb[120].mxu1  ;;  %v6851_v5 = vpack.i.bf16 %v8641_v62, %v8621_v17  ;;  %v1358_v25 = vadd.f32 %v11177_v15, %v8301_v1  ;;  %v1675_v20 = vmax.f32 %v1352_v10, 0.0  ;;  %v11179_v10 = vld [vmem:[#allocation19_spill] sm:$0xff] }
 0x25a   : > { %11174 = vst [vmem:[#allocation11_spill] sm:$0xff] %v8645_v45  ;;  %v1545_v16 = vadd.f32 %v1544_v2, %v8306_v19  ;;  %v1546_v37 = vpop.f32.mrb[121].mxu1  ;;  %6857 = vrot.lane.b32.xlu1 %v6856_v60, %s7421_s19  ;;  %v6861_v60 = vpack.i.bf16 %v8372_v54, %v11178_v26  ;;  %v1679_v9 = vmax.f32 %v1356_v59, 0.0 }
 0x25b   : > { %v1547_v21 = vadd.f32 %v1546_v37, %v8308_v30  ;;  %v1548_v33 = vpop.f32.mrb[122].mxu1  ;;  %6852 = vrot.lane.b32.xlu0 %v6851_v5, %s7421_s19  ;;  %v1680_v37 = vmax.f32 %v1358_v25, 0.0  ;;  %v11183_v25 = vld [vmem:[#allocation21_spill] sm:$0xff] }
 0x25c   : > { %v1677_v56 = vmax.f32 %v1545_v16, 0.0  ;;  %v1549_v28 = vadd.f32 %v1548_v33, %v8306_v19  ;;  %v1550_v4 = vpop.f32.mrb[123].mxu1  ;;  %v1362_v16 = vadd.f32 %v11179_v10, %v8292_v22 }
 0x25d   : > { %v1678_v13 = vmax.f32 %v1547_v21, 0.0  ;;  %v1551_v2 = vadd.f32 %v1550_v4, %v8308_v30  ;;  %v11181_v21 = vld [vmem:[#allocation20_spill] sm:$0xff] }
 0x25e   : > { %v8667_v17 = vmax.f32 %v1675_v20, %v1677_v56  ;;  %v1681_v15 = vmax.f32 %v1549_v28, 0.0  ;;  %v1364_v33 = vadd.f32 %v11181_v21, %v8301_v1  ;;  %v11182_v20 = vld [vmem:[#allocation23_spill] sm:$0xff]  ;;  %v1366_v28 = vadd.f32 %v11183_v25, %v8292_v22 }
 0x25f   : > { %v8669_v62 = vmax.f32 %v1676_v0, %v1678_v13  ;;  %v1682_v5 = vmax.f32 %v1551_v2, 0.0  ;;  %6862 = vrot.lane.b32.xlu0 %v6861_v60, %s7421_s19  ;;  %v6866_v56 = vpack.i.bf16 %v8366_v38, %v11182_v20  ;;  %v11184_v2 = vld [vmem:[#allocation22_spill] sm:$0xff] }
 0x260   : > { %v8674_v42 = vmax.f32 %v1679_v9, %v1681_v15  ;;  %v1368_v60 = vadd.f32 %v11184_v2, %v8301_v1  ;;  %v1684_v38 = vmax.f32 %v1364_v33, 0.0  ;;  %v1687_v25 = vmax.f32 %v1366_v28, 0.0 }
 0x261   : > { %v8678_v4 = vmax.f32 %v1680_v37, %v1682_v5  ;;  %v1554_v59 = vpop.f32.mrb[124].mxu1  ;;  %v1683_v37 = vmax.f32 %v1362_v16, 0.0 }
 0x262   : > { %11180 = vst [vmem:[#allocation12_spill] sm:$0xff] %v8674_v42  ;;  %v1555_v0 = vadd.f32 %v1554_v59, %v8306_v19  ;;  %v1556_v13 = vpop.f32.mrb[125].mxu1  ;;  %v6881_v59 = vpack.i.bf16 %v8418_v48, %v8396_v46 }
 0x263   : > { %v1557_v9 = vadd.f32 %v1556_v13, %v8308_v30  ;;  %v1558_v15 = vpop.f32.mrb[126].mxu1  ;;  %6867 = vrot.lane.b32.xlu0 %v6866_v56, %s7421_s19  ;;  %v1688_v13 = vmax.f32 %v1368_v60, 0.0  ;;  %v6901_v60 = vpack.i.bf16 %v8510_v39, %v8488_v32 }
 0x264   : > { %v1685_v5 = vmax.f32 %v1555_v0, 0.0  ;;  %v1559_v10 = vadd.f32 %v1558_v15, %v8306_v19  ;;  %v1560_v21 = vpop.f32.mrb[127].mxu1 }
 0x265   : > { %v1686_v20 = vmax.f32 %v1557_v9, 0.0  ;;  %v1561_v22 = vadd.f32 %v1560_v21, %v8308_v30  ;;  %v6891_v30 = vpack.i.bf16 %v8464_v41, %v8442_v44 }
 0x266   : > { %v8693_v26 = vmax.f32 %v1683_v37, %v1685_v5  ;;  %v1689_v1 = vmax.f32 %v1559_v10, 0.0 }
 0x267   : > { %v8695_v2 = vmax.f32 %v1684_v38, %v1686_v20  ;;  %v1690_v56 = vmax.f32 %v1561_v22, 0.0  ;;  %6882 = vrot.lane.b32.xlu0 %v6881_v59, %s7421_s19  ;;  %v6911_v59 = vpack.i.bf16 %v8559_v11, %v8537_v18 }
 0x268   : > { %v8698_v16 = vmax.f32 %v1687_v25, %v1689_v1  ;;  %v6876_v9 = vpack.i.bf16 %v8693_v26, %v8667_v17  ;;  %v6886_v25 = vpack.i.bf16 %v8412_v55, %v8392_v29 }
 0x269   : > { %v8700_v19 = vmax.f32 %v1688_v13, %v1690_v56  ;;  %v6871_v33 = vpack.i.bf16 %v8695_v2, %v8669_v62 }
 0x26a   : > { %11185 = vst [vmem:[#allocation13_spill] sm:$0xff] %v8698_v16 }
 0x26b   : > { %6892 = vrot.lane.b32.xlu0 %v6891_v30, %s7421_s19  ;;  %6872 = vrot.lane.b32.xlu1 %v6871_v33, %s7421_s19 }
 0x26c   : > { %v6798_v28 = vpop.permute.xlu1 %6797 }
 0x26d   : > { %v6800_v38 = vunpack.i.h.bf16 %v6798_v28  ;;  %v6799_v20 = vunpack.i.l.bf16 %v6798_v28  ;;  %v6793_v0 = vpop.permute.xlu0 %6792  ;;  %v7148_v28 = vld [vmem:[%s10984_s3 + $0x114] ss:$8 sps:$4 sm:$0xff]  }
 0x26e   : > { %v6795_v15 = vunpack.i.h.bf16 %v6793_v0  ;;  %v6794_v37 = vunpack.i.l.bf16 %v6793_v0  ;;  %v6906_v0 = vpack.i.bf16 %v8504_v47, %v8484_v49 }
 0x26f   : > { %6902 = vrot.lane.b32.xlu0 %v6901_v60, %s7421_s19  ;;  %6877 = vrot.lane.b32.xlu1 %v6876_v9, %s7421_s19  ;;  %v7151_v60 = vld [vmem:[%s10984_s3 + $0x124] ss:$8 sps:$4 sm:$0xff]  }
 0x270   : > { %v2049_v5 = vmax.f32 %v8362_v34, %v6795_v15  ;;  %v1948_v10 = vsel %vm1947_vm7, %v6799_v20, %v6794_v37  ;;  %v1950_v21 = vsel %vm1947_vm7, %v6800_v38, %v6795_v15  ;;  %v2045_v22 = vmax.f32 %v8336_v52, %v6794_v37  ;;  %v7146_v38 = vld [vmem:[%s10984_s3 + $0x110] ss:$8 sps:$4 sm:$0xff]   ;;  %v7149_v15 = vld [vmem:[%s10984_s3 + $0x120] ss:$8 sps:$4 sm:$0xff]  }
 0x271   : > { %v8723_v1 = vmax.f32 %v8334_v36, %v1948_v10  ;;  %v8726_v13 = vmax.f32 %v8360_v31, %v1950_v21  ;;  %v7143_v31 = vld [vmem:[%s10984_s3 + $0x100] ss:$8 sps:$4 sm:$0xff]   ;;  %v6931_v20 = vpack.i.bf16 %v8651_v12, %v8629_v7  ;;  %v6941_v21 = vpack.i.bf16 %v8700_v19, %v8678_v4 }
 0x272   : > { %v8730_v56 = vsel %vm1947_vm7, %v2045_v22, %v8336_v52  ;;  %v8734_v30 = vsel %vm1947_vm7, %v2049_v5, %v8362_v34  ;;  %v6921_v52 = vpack.i.bf16 %v8605_v27, %v8583_v53  ;;  %v6896_v34 = vpack.i.bf16 %v8458_v40, %v8438_v14 }
 0x273   : > { %6912 = vrot.lane.b32.xlu0 %v6911_v59, %s7421_s19  ;;  %6887 = vrot.lane.b32.xlu1 %v6886_v25, %s7421_s19  ;;  %v6497_v33 = vpack.c.bf16 %v8734_v30, %v8730_v56  ;;  %v6496_v36 = vpack.c.bf16 %v8726_v13, %v8723_v1  ;;  %v6916_v22 = vpack.i.bf16 %v8553_v58, %v8533_v63  ;;  %v7154_v59 = vld [vmem:[%s10984_s3 + $0x134] ss:$8 sps:$4 sm:$0xff]   ;;  %v11205_v63 = vld [vmem:[#allocation6_spill] sm:$0xff] }
 0x275   : > { %3912 = vmatprep.mubr.bf16.mxu0 %v6497_v33 }
 0x276   : > { %3913 = vmatmul.mubr.bf16.vlgmr.msra.gmra.mrb[0].mxu0 %v6496_v36 }
 0x277   : > { %6922 = vrot.lane.b32.xlu0 %v6921_v52, %s7421_s19  ;;  %6897 = vrot.lane.b32.xlu1 %v6896_v34, %s7421_s19 }
 0x278   : > { %3994 = vmatpush1.bf16.msra.mxu0 %v7143_v31 }
 0x279   : > { %3995 = vmatprep.subr.bf16.mxu0 %v7148_v28  ;;  %v7152_v28 = vld [vmem:[%s10984_s3 + $0x130] ss:$8 sps:$4 sm:$0xff]  }
 0x27b   : > { %6932 = vrot.lane.b32.xlu0 %v6931_v20, %s7421_s19  ;;  %6907 = vrot.lane.b32.xlu1 %v6906_v0, %s7421_s19 }
 0x27c   : > { %v6808_v9 = vpop.permute.xlu1 %6807  ;;  %3996 = vmatpush1.bf16.msra.mxu0 %v7146_v38  ;;  %v6926_v38 = vpack.i.bf16 %v8599_v50, %v8579_v8  ;;  %v11199_v50 = vld [vmem:[#allocation36_spill] sm:$0xff] }
 0x27d   : > { %v6810_v37 = vunpack.i.h.bf16 %v6808_v9  ;;  %v6809_v5 = vunpack.i.l.bf16 %v6808_v9  ;;  %v6803_v10 = vpop.permute.xlu0 %6802  ;;  %3997 = vmatprep.subr.bf16.mxu0 %v7151_v60  ;;  %v7157_v60 = vld [vmem:[%s10984_s3 + $0x144] ss:$8 sps:$4 sm:$0xff]  }
 0x27e   : > { %v6805_v25 = vunpack.i.h.bf16 %v6803_v10  ;;  %v6804_v33 = vunpack.i.l.bf16 %v6803_v10  ;;  %v6946_v10 = vpack.i.bf16 %v8698_v16, %v8674_v42  ;;  %v11195_v42 = vld [vmem:[#allocation33_spill] sm:$0xff] }
 0x27f   : > { %6942 = vrot.lane.b32.xlu0 %v6941_v21, %s7421_s19  ;;  %6917 = vrot.lane.b32.xlu1 %v6916_v22, %s7421_s19  ;;  %v7163_v21 = vld [vmem:[%s10984_s3 + $0x164] ss:$8 sps:$4 sm:$0xff]  }
 0x280   : > { %v2057_v36 = vmax.f32 %v8408_v3, %v6805_v25  ;;  %v1952_v31 = vsel %vm1947_vm7, %v6809_v5, %v6804_v33  ;;  %v1954_v52 = vsel %vm1947_vm7, %v6810_v37, %v6805_v25  ;;  %v2053_v34 = vmax.f32 %v8388_v23, %v6804_v33  ;;  %3998 = vmatpush1.bf16.msra.mxu0 %v7149_v15  ;;  %v7155_v37 = vld [vmem:[%s10984_s3 + $0x140] ss:$8 sps:$4 sm:$0xff]   ;;  %v7158_v5 = vld [vmem:[%s10984_s3 + $0x150] ss:$8 sps:$4 sm:$0xff]  }
 0x281   : > { %v8788_v20 = vmax.f32 %v8386_v24, %v1952_v31  ;;  %v8791_v0 = vmax.f32 %v8406_v43, %v1954_v52  ;;  %3999 = vmatprep.subr.bf16.mxu0 %v7154_v59  ;;  %v7161_v59 = vld [vmem:[%s10984_s3 + $0x160] ss:$8 sps:$4 sm:$0xff]   ;;  %v7166_v31 = vld [vmem:[%s10984_s3 + $0x174] ss:$8 sps:$4 sm:$0xff]  }
 0x282   : > { %v8798_v9 = vsel %vm1947_vm7, %v2053_v34, %v8388_v23  ;;  %v8802_v15 = vsel %vm1947_vm7, %v2057_v36, %v8408_v3  ;;  %v6936_v23 = vpack.i.bf16 %v8645_v45, %v8625_v57  ;;  %v7160_v3 = vld [vmem:[%s10984_s3 + $0x154] ss:$8 sps:$4 sm:$0xff]  }
 0x283   : > { %6927 = vrot.lane.b32.xlu1 %v6926_v38, %s7421_s19  ;;  %v6499_v24 = vpack.c.bf16 %v8802_v15, %v8798_v9  ;;  %v6498_v43 = vpack.c.bf16 %v8791_v0, %v8788_v20  ;;  %v11198_v45 = vld [vmem:[#allocation37_spill] sm:$0xff] }
 0x284   : > { %4000 = vmatpush1.bf16.msra.mxu0 %v7152_v28 }
 0x285   : > { %3922 = vmatprep.mubr.bf16.mxu0 %v6499_v24  ;;  %4001 = vmatprep.subr.bf16.mxu0 %v7157_v60 }
 0x286   : > { %3923 = vmatmul.mubr.bf16.gmra.mrb[4].mxu0 %v6498_v43  ;;  %v7164_v43 = vld [vmem:[%s10984_s3 + $0x170] ss:$8 sps:$4 sm:$0xff]  }
 0x287   : > { %6937 = vrot.lane.b32.xlu1 %v6936_v23, %s7421_s19 }
 0x288   : > { %4002 = vmatpush1.bf16.msra.mxu0 %v7155_v37 }
 0x289   : > { %4003 = vmatprep.subr.bf16.mxu0 %v7160_v3  ;;  %v7169_v3 = vld [vmem:[%s10984_s3 + $0x184] ss:$8 sps:$4 sm:$0xff]  }
 0x28b   : > { %6947 = vrot.lane.b32.xlu1 %v6946_v10, %s7421_s19 }
 0x28c   : > { %v6818_v22 = vpop.permute.xlu1 %6817  ;;  %4004 = vmatpush1.bf16.msra.mxu0 %v7158_v5 }
 0x28d   : > { %v6820_v25 = vunpack.i.h.bf16 %v6818_v22  ;;  %v6819_v33 = vunpack.i.l.bf16 %v6818_v22  ;;  %v6813_v36 = vpop.permute.xlu0 %6812  ;;  %4005 = vmatprep.subr.bf16.mxu0 %v7163_v21  ;;  %v7167_v21 = vld [vmem:[%s10984_s3 + $0x180] ss:$8 sps:$4 sm:$0xff]   ;;  %v7175_v22 = vld [vmem:[%s10984_s3 + $0x1a4] ss:$8 sps:$4 sm:$0xff]  }
 0x28e   : > { %v6815_v52 = vunpack.i.h.bf16 %v6813_v36  ;;  %v6814_v34 = vunpack.i.l.bf16 %v6813_v36 }
 0x290   : > { %v2065_v28 = vmax.f32 %v8454_v35, %v6815_v52  ;;  %v1956_v38 = vsel %vm1947_vm7, %v6819_v33, %v6814_v34  ;;  %v1958_v60 = vsel %vm1947_vm7, %v6820_v25, %v6815_v52  ;;  %v2061_v24 = vmax.f32 %v8434_v51, %v6814_v34  ;;  %4006 = vmatpush1.bf16.msra.mxu0 %v7161_v59  ;;  %v7173_v25 = vld [vmem:[%s10984_s3 + $0x1a0] ss:$8 sps:$4 sm:$0xff]   ;;  %v7178_v52 = vld [vmem:[%s10984_s3 + $0x1b4] ss:$8 sps:$4 sm:$0xff]  }
 0x291   : > { %v8841_v37 = vmax.f32 %v8432_v61, %v1956_v38  ;;  %v8844_v23 = vmax.f32 %v8452_v6, %v1958_v60  ;;  %4007 = vmatprep.subr.bf16.mxu0 %v7166_v31  ;;  %v11186_v38 = vld [vmem:[#allocation29_spill] sm:$0xff] }
 0x292   : > { %v8851_v5 = vsel %vm1947_vm7, %v2061_v24, %v8434_v51  ;;  %v8855_v10 = vsel %vm1947_vm7, %v2065_v28, %v8454_v35  ;;  %v7172_v51 = vld [vmem:[%s10984_s3 + $0x194] ss:$8 sps:$4 sm:$0xff]   ;;  %v7170_v35 = vld [vmem:[%s10984_s3 + $0x190] ss:$8 sps:$4 sm:$0xff]  }
 0x293   : > { %v6501_v61 = vpack.c.bf16 %v8855_v10, %v8851_v5  ;;  %v6500_v6 = vpack.c.bf16 %v8844_v23, %v8841_v37 }
 0x294   : > { %4008 = vmatpush1.bf16.msra.mxu0 %v7164_v43 }
 0x295   : > { %3932 = vmatprep.mubr.bf16.mxu0 %v6501_v61  ;;  %4009 = vmatprep.subr.bf16.mxu0 %v7169_v3  ;;  %v11187_v3 = vld [vmem:[#allocation27_spill] sm:$0xff] }
 0x296   : > { %3933 = vmatmul.mubr.bf16.gmra.mrb[8].mxu0 %v6500_v6  ;;  %v7176_v6 = vld [vmem:[%s10984_s3 + $0x1b0] ss:$8 sps:$4 sm:$0xff]  }
 0x298   : > { %4010 = vmatpush1.bf16.msra.mxu0 %v7167_v21  ;;  %v11188_v21 = vld [vmem:[#allocation26_spill] sm:$0xff] }
 0x299   : > { %4011 = vmatprep.subr.bf16.mxu0 %v7172_v51 }
 0x29c   : > { %v6828_v59 = vpop.permute.xlu1 %6827  ;;  %4012 = vmatpush1.bf16.msra.mxu0 %v7170_v35  ;;  %v11190_v35 = vld [vmem:[#allocation28_spill] sm:$0xff] }
 0x29d   : > { %v6830_v33 = vunpack.i.h.bf16 %v6828_v59  ;;  %v6829_v36 = vunpack.i.l.bf16 %v6828_v59  ;;  %v6823_v31 = vpop.permute.xlu0 %6822  ;;  %4013 = vmatprep.subr.bf16.mxu0 %v7175_v22  ;;  %v7181_v59 = vld [vmem:[%s10984_s3 + $0x1c4] ss:$8 sps:$4 sm:$0xff]  }
 0x29e   : > { %v6825_v34 = vunpack.i.h.bf16 %v6823_v31  ;;  %v6824_v28 = vunpack.i.l.bf16 %v6823_v31 }
 0x2a0   : > { %v2073_v60 = vmax.f32 %v11186_v38, %v6825_v34  ;;  %v1960_v24 = vsel %vm1947_vm7, %v6829_v36, %v6824_v28  ;;  %v1962_v43 = vsel %vm1947_vm7, %v6830_v33, %v6825_v34  ;;  %v2069_v61 = vmax.f32 %v11187_v3, %v6824_v28  ;;  %4014 = vmatpush1.bf16.msra.mxu0 %v7173_v25  ;;  %v7184_v34 = vld [vmem:[%s10984_s3 + $0x1d4] ss:$8 sps:$4 sm:$0xff]   ;;  %v7182_v28 = vld [vmem:[%s10984_s3 + $0x1d0] ss:$8 sps:$4 sm:$0xff]  }
 0x2a1   : > { %v8887_v51 = vmax.f32 %v11188_v21, %v1960_v24  ;;  %v8890_v22 = vmax.f32 %v11190_v35, %v1962_v43  ;;  %4015 = vmatprep.subr.bf16.mxu0 %v7178_v52  ;;  %v7179_v52 = vld [vmem:[%s10984_s3 + $0x1c0] ss:$8 sps:$4 sm:$0xff]  }
 0x2a2   : > { %v8897_v33 = vsel %vm1947_vm7, %v2069_v61, %v11187_v3  ;;  %v8901_v25 = vsel %vm1947_vm7, %v2073_v60, %v11186_v38  ;;  %v7187_v38 = vld [vmem:[%s10984_s3 + $0x1e4] ss:$8 sps:$4 sm:$0xff]   ;;  %v7185_v24 = vld [vmem:[%s10984_s3 + $0x1e0] ss:$8 sps:$4 sm:$0xff]  }
 0x2a3   : > { %11189 = vst [vmem:[#allocation14_spill] sm:$0xff] %v8887_v51  ;;  %v6503_v36 = vpack.c.bf16 %v8901_v25, %v8897_v33  ;;  %v6502_v31 = vpack.c.bf16 %v8890_v22, %v8887_v51  ;;  %v11213_v51 = vld [vmem:[#allocation25_spill] sm:$0xff] }
 0x2a4   : > { %4016 = vmatpush1.bf16.msra.mxu0 %v7176_v6  ;;  %v7190_v6 = vld [vmem:[%s10984_s3 + $0x1f4] ss:$8 sps:$4 sm:$0xff]  }
 0x2a5   : > { %3942 = vmatprep.mubr.bf16.mxu0 %v6503_v36  ;;  %4017 = vmatprep.subr.bf16.mxu0 %v7181_v59  ;;  %v11191_v59 = vld [vmem:[#allocation34_spill] sm:$0xff] }
 0x2a6   : > { %3943 = vmatmul.mubr.bf16.gmra.mrb[12].mxu0 %v6502_v31 }
 0x2a8   : > { %4018 = vmatpush1.bf16.msra.mxu0 %v7179_v52 }
 0x2a9   : > { %4019 = vmatprep.subr.bf16.mxu0 %v7184_v34  ;;  %v11192_v34 = vld [vmem:[#allocation31_spill] sm:$0xff] }
 0x2ac   : > { %v6838_v60 = vpop.permute.xlu1 %6837  ;;  %4020 = vmatpush1.bf16.msra.mxu0 %v7182_v28 }
 0x2ad   : > { %v6840_v43 = vunpack.i.h.bf16 %v6838_v60  ;;  %v6839_v3 = vunpack.i.l.bf16 %v6838_v60  ;;  %v6833_v61 = vpop.permute.xlu0 %6832  ;;  %4021 = vmatprep.subr.bf16.mxu0 %v7187_v38  ;;  %v7188_v60 = vld [vmem:[%s10984_s3 + $0x1f0] ss:$8 sps:$4 sm:$0xff]   ;;  %v11193_v38 = vld [vmem:[#allocation30_spill] sm:$0xff] }
 0x2ae   : > { %v6835_v21 = vunpack.i.h.bf16 %v6833_v61  ;;  %v6834_v35 = vunpack.i.l.bf16 %v6833_v61 }
 0x2b0   : > { %v2081_v36 = vmax.f32 %v11191_v59, %v6835_v21  ;;  %v1964_v31 = vsel %vm1947_vm7, %v6839_v3, %v6834_v35  ;;  %v1966_v52 = vsel %vm1947_vm7, %v6840_v43, %v6835_v21  ;;  %v2077_v28 = vmax.f32 %v11192_v34, %v6834_v35  ;;  %4022 = vmatpush1.bf16.msra.mxu0 %v7185_v24  ;;  %v7193_v3 = vld [vmem:[%s10984_s3 + $0x204] ss:$8 sps:$4 sm:$0xff]  }
 0x2b1   : > { %v8933_v16 = vmax.f32 %v11193_v38, %v1964_v31  ;;  %v8936_v57 = vmax.f32 %v11195_v42, %v1966_v52  ;;  %4023 = vmatprep.subr.bf16.mxu0 %v7190_v6 }
 0x2b2   : > { %v8943_v43 = vsel %vm1947_vm7, %v2077_v28, %v11192_v34  ;;  %v8947_v24 = vsel %vm1947_vm7, %v2081_v36, %v11191_v59  ;;  %v11197_v28 = vld [vmem:[#allocation4_spill] sm:$0xff] }
 0x2b3   : > { %11194 = vst [vmem:[#allocation15_spill] sm:$0xff] %v8933_v16  ;;  %11196 = vst [vmem:[#allocation16_spill] sm:$0xff] %v8936_v57  ;;  %v6505_v61 = vpack.c.bf16 %v8947_v24, %v8943_v43  ;;  %v6504_v42 = vpack.c.bf16 %v8936_v57, %v8933_v16 }
 0x2b4   : > { %4024 = vmatpush1.bf16.msra.mxu0 %v7188_v60  ;;  %v11201_v60 = vld [vmem:[#allocation3_spill] sm:$0xff] }
 0x2b5   : > { %3952 = vmatprep.mubr.bf16.mxu0 %v6505_v61  ;;  %4106 = vmatprep.subr.bf16.mxu0 %v7193_v3 }
 0x2b6   : > { %3953 = vmatmul.mubr.bf16.gmra.mrb[16].mxu0 %v6504_v42 }
 0x2bc   : > { %v6848_v6 = vpop.permute.xlu1 %6847 }
 0x2bd   : > { %v6850_v21 = vunpack.i.h.bf16 %v6848_v6  ;;  %v6849_v35 = vunpack.i.l.bf16 %v6848_v6  ;;  %v6843_v31 = vpop.permute.xlu0 %6842 }
 0x2be   : > { %v6845_v52 = vunpack.i.h.bf16 %v6843_v31  ;;  %v6844_v34 = vunpack.i.l.bf16 %v6843_v31 }
 0x2c0   : > { %v2089_v38 = vmax.f32 %v11197_v28, %v6845_v52  ;;  %v1968_v59 = vsel %vm1947_vm7, %v6849_v35, %v6844_v34  ;;  %v1970_v36 = vsel %vm1947_vm7, %v6850_v21, %v6845_v52  ;;  %v2085_v8 = vmax.f32 %v11198_v45, %v6844_v34 }
 0x2c1   : > { %v8958_v16 = vmax.f32 %v11199_v50, %v1968_v59  ;;  %v8961_v3 = vmax.f32 %v11201_v60, %v1970_v36 }
 0x2c2   : > { %v8965_v61 = vsel %vm1947_vm7, %v2085_v8, %v11198_v45  ;;  %v8969_v42 = vsel %vm1947_vm7, %v2089_v38, %v11197_v28  ;;  %v11203_v8 = vld [vmem:[#allocation10_spill] sm:$0xff]  ;;  %v11204_v38 = vld [vmem:[#allocation7_spill] sm:$0xff] }
 0x2c3   : > { %11200 = vst [vmem:[#allocation18_spill] sm:$0xff] %v8958_v16  ;;  %11202 = vst [vmem:[#allocation19_spill] sm:$0xff] %v8961_v3  ;;  %v6507_v6 = vpack.c.bf16 %v8969_v42, %v8965_v61  ;;  %v6506_v21 = vpack.c.bf16 %v8961_v3, %v8958_v16 }
 0x2c5   : > { %3962 = vmatprep.mubr.bf16.mxu0 %v6507_v6  ;;  %v11207_v6 = vld [vmem:[#allocation9_spill] sm:$0xff] }
 0x2c6   : > { %3963 = vmatmul.mubr.bf16.gmra.mrb[20].mxu0 %v6506_v21 }
 0x2cc   : > { %v6858_v50 = vpop.permute.xlu1 %6857 }
 0x2cd   : > { %v6860_v35 = vunpack.i.h.bf16 %v6858_v50  ;;  %v6859_v31 = vunpack.i.l.bf16 %v6858_v50  ;;  %v6853_v52 = vpop.permute.xlu0 %6852 }
 0x2ce   : > { %v6855_v34 = vunpack.i.h.bf16 %v6853_v52  ;;  %v6854_v59 = vunpack.i.l.bf16 %v6853_v52 }
 0x2d0   : > { %v2097_v45 = vmax.f32 %v11203_v8, %v6855_v34  ;;  %v1972_v36 = vsel %vm1947_vm7, %v6859_v31, %v6854_v59  ;;  %v1974_v28 = vsel %vm1947_vm7, %v6860_v35, %v6855_v34  ;;  %v2093_v60 = vmax.f32 %v11204_v38, %v6854_v59  ;;  %v11209_v59 = vld [vmem:[#allocation24_spill] sm:$0xff] }
 0x2d1   : > { %v6863_v57 = vpop.permute.xlu0 %6862  ;;  %v8980_v58 = vmax.f32 %v11205_v63, %v1972_v36  ;;  %v8983_v21 = vmax.f32 %v11207_v6, %v1974_v28 }
 0x2d2   : > { %v6865_v16 = vunpack.i.h.bf16 %v6863_v57  ;;  %v6864_v50 = vunpack.i.l.bf16 %v6863_v57  ;;  %v8987_v52 = vsel %vm1947_vm7, %v2093_v60, %v11204_v38  ;;  %v8991_v31 = vsel %vm1947_vm7, %v2097_v45, %v11203_v8 }
 0x2d3   : > { %11206 = vst [vmem:[#allocation20_spill] sm:$0xff] %v8980_v58  ;;  %11208 = vst [vmem:[#allocation21_spill] sm:$0xff] %v8983_v21  ;;  %v6509_v35 = vpack.c.bf16 %v8991_v31, %v8987_v52  ;;  %v6508_v63 = vpack.c.bf16 %v8983_v21, %v8980_v58 }
 0x2d4   : > { %v2051_v34 = vmax.f32 %v8372_v54, %v6865_v16  ;;  %v2047_v36 = vmax.f32 %v11209_v59, %v6864_v50 }
 0x2d5   : > { %v6868_v28 = vpop.permute.xlu0 %6867  ;;  %3972 = vmatprep.mubr.bf16.mxu0 %v6509_v35  ;;  %v11212_v35 = vld [vmem:[#allocation23_spill] sm:$0xff] }
 0x2d6   : > { %v2111_v57 = vsel %vm1947_vm7, %v2051_v34, %v8372_v54  ;;  %v2109_v38 = vsel %vm1947_vm7, %v2047_v36, %v11209_v59  ;;  %v6870_v8 = vunpack.i.h.bf16 %v6868_v28  ;;  %v6869_v45 = vunpack.i.l.bf16 %v6868_v28  ;;  %3973 = vmatmul.mubr.bf16.gmra.mrb[24].mxu0 %v6508_v63 }
 0x2d7   : > { %v9004_v60 = vpack.c.bf16 %v2109_v38, %v8730_v56  ;;  %v9007_v6 = vpack.c.bf16 %v2111_v57, %v8734_v30 }
 0x2d8   : > { %v1949_v58 = vsel %vm1947_vm7, %v6869_v45, %v6864_v50  ;;  %v1951_v21 = vsel %vm1947_vm7, %v6870_v8, %v6865_v16 }
 0x2d9   : > { %11210 = vst [vmem:[#allocation22_spill] sm:$0xff] %v9004_v60  ;;  %11211 = vst [vmem:[#allocation29_spill] sm:$0xff] %v9007_v6  ;;  %v2046_v3 = vmax.f32 %v11212_v35, %v1949_v58  ;;  %v2050_v54 = vmax.f32 %v11213_v51, %v1951_v21  ;;  %v9013_v34 = vpop.permute.xlu0 %6882  ;;  %v11035_v59 = vshll.u32 %v9004_v60, 16  ;;  %v11038_v36 = vshll.u32 %v9007_v6, 16 }
 0x2da   : > { %v11037_v63 = vunpack.i.h.bf16 %v9013_v34  ;;  %v11036_v56 = vunpack.i.l.bf16 %v9013_v34 }
 0x2db   : > { %v9020_v30 = vpack.c.bf16 %v2046_v3, %v8723_v1  ;;  %v9023_v50 = vpack.c.bf16 %v2050_v54, %v8726_v13  ;;  %v2184_v51 = vrot.slane %v11035_v59, 1  ;;  %v11040_v1 = vshrl.u32 %v9004_v60, 16 }
 0x2dc   : > { %v2059_v58 = vmax.f32 %v8418_v48, %v11037_v63  ;;  %v2055_v16 = vmax.f32 %v8396_v46, %v11036_v56  ;;  %v11046_v3 = vshrl.u32 %v9007_v6, 16  ;;  %v2198_v13 = vrot.slane %v11038_v36, 1 }
 0x2dd   : > { %11214 = vst [vmem:[#allocation27_spill] sm:$0xff] %v9020_v30  ;;  %11215 = vst [vmem:[#allocation26_spill] sm:$0xff] %v9023_v50  ;;  %v9033_v21 = vpop.permute.xlu0 %6892  ;;  %v6873_v28 = vpop.permute.xlu1 %6872  ;;  %v11045_v35 = vshll.u32 %v9020_v30, 16  ;;  %v11219_v60 = vshll.u32 %v9023_v50, 16 }
 0x2de   : > { %v2115_v57 = vsel %vm1947_vm7, %v2059_v58, %v8418_v48  ;;  %v2113_v38 = vsel %vm1947_vm7, %v2055_v16, %v8396_v46  ;;  %v11041_v8 = vunpack.i.h.bf16 %v9033_v21  ;;  %v11039_v45 = vunpack.i.l.bf16 %v9033_v21 }
 0x2df   : > { %v6875_v59 = vunpack.i.h.bf16 %v6873_v28  ;;  %v6874_v56 = vunpack.i.l.bf16 %v6873_v28  ;;  %v9048_v63 = vpack.c.bf16 %v2113_v38, %v8798_v9  ;;  %v9055_v46 = vor.u32 %v2184_v51, %v11040_v1 }
 0x2e0   : > { %v2063_v48 = vmax.f32 %v8442_v44, %v11039_v45  ;;  %v9059_v16 = vpack.c.bf16 %v2115_v57, %v8802_v15  ;;  %v2067_v28 = vmax.f32 %v8464_v41, %v11041_v8  ;;  %v2199_v15 = vor.u32 %v2198_v13, %v11046_v3 }
 0x2e1   : > { %11216 = vst [vmem:[#allocation28_spill] sm:$0xff] %v9048_v63  ;;  %v2105_v9 = vmax.f32 %v8695_v2, %v6875_v59  ;;  %v2101_v38 = vmax.f32 %v8669_v62, %v6874_v56  ;;  %v9066_v36 = vpop.permute.xlu0 %6902  ;;  %v6878_v45 = vpop.permute.xlu1 %6877  ;;  %v2177_v8 = vrot.slane %v11045_v35, 1 }
 0x2e2   : > { %11217 = vst [vmem:[#allocation34_spill] sm:$0xff] %v9059_v16  ;;  %v2117_v51 = vsel %vm1947_vm7, %v2063_v48, %v8442_v44  ;;  %v11047_v1 = vunpack.i.h.bf16 %v9066_v36  ;;  %v11048_v58 = vunpack.i.l.bf16 %v9066_v36  ;;  %v6880_v57 = vunpack.i.h.bf16 %v6878_v45 }
 0x2e3   : > { %v6879_v54 = vunpack.i.l.bf16 %v6878_v45  ;;  %v9085_v48 = vsel %vm1947_vm7, %v2101_v38, %v8669_v62  ;;  %v9089_v13 = vsel %vm1947_vm7, %v2105_v9, %v8695_v2  ;;  %v2119_v45 = vsel %vm1947_vm7, %v2067_v28, %v8464_v41 }
 0x2e4   : > { %v2075_v16 = vmax.f32 %v8510_v39, %v11047_v1  ;;  %v2071_v44 = vmax.f32 %v8488_v32, %v11048_v58  ;;  %v9094_v35 = vpack.c.bf16 %v2117_v51, %v8851_v5  ;;  %v6511_v1 = vpack.c.bf16 %v9089_v13, %v9085_v48 }
 0x2e5   : > { %v9096_v3 = vpop.permute.xlu0 %6912  ;;  %v6888_v58 = vpop.permute.xlu1 %6887  ;;  %v2191_v62 = vrot.slane %v11219_v60, 1  ;;  %v1978_v38 = vsel %vm1947_vm7, %v6880_v57, %v6875_v59  ;;  %v1976_v2 = vsel %vm1947_vm7, %v6879_v54, %v6874_v56  ;;  %v6090_v56 = vcombine.low %v9055_v46, %v2199_v15 }
 0x2e6   : > { %11218 = vst [vmem:[#allocation31_spill] sm:$0xff] %v9094_v35  ;;  %v6915_v9 = vunpack.i.h.bf16 %v9096_v3  ;;  %v6914_v41 = vunpack.i.l.bf16 %v9096_v3  ;;  %v2123_v5 = vsel %vm1947_vm7, %v2075_v16, %v8510_v39  ;;  %v2121_v28 = vsel %vm1947_vm7, %v2071_v44, %v8488_v32  ;;  %3982 = vmatprep.mubr.bf16.mxu0 %v6511_v1  ;;  %v7194_v3 = vld [vmem:[%s10984_s3 + $0x210] ss:$8 sps:$4 sm:$0xff]  }
 0x2e7   : > { %v6890_v51 = vunpack.i.h.bf16 %v6888_v58  ;;  %v6889_v6 = vunpack.i.l.bf16 %v6888_v58  ;;  %v9111_v35 = vpack.c.bf16 %v2119_v45, %v8855_v10  ;;  %v11220_v39 = vunpack.i.h.bf16 %v9013_v34 }
 0x2e8   : > { %v2083_v60 = vmax.f32 %v8559_v11, %v6915_v9  ;;  %v2079_v59 = vmax.f32 %v8537_v18, %v6914_v41  ;;  %v11221_v1 = vunpack.i.l.bf16 %v9013_v34  ;;  %v9129_v16 = vmax.f32 %v8667_v17, %v1976_v2 }
 0x2e9   : > { %v1955_v32 = vsel %vm1947_vm7, %v6890_v51, %v11220_v39  ;;  %v9126_v10 = vpop.permute.xlu0 %6922  ;;  %v6898_v58 = vpop.permute.xlu1 %6897  ;;  %v9132_v57 = vmax.f32 %v8693_v26, %v1978_v38  ;;  %v9135_v44 = vpack.c.bf16 %v2121_v28, %v8897_v33  ;;  %v9138_v46 = vpack.c.bf16 %v2123_v5, %v8901_v25 }
 0x2ea   : > { %v1953_v54 = vsel %vm1947_vm7, %v6889_v6, %v11221_v1  ;;  %v2125_v34 = vsel %vm1947_vm7, %v2079_v59, %v8537_v18  ;;  %v11222_v6 = vshrl.u32 %v9020_v30, 16  ;;  %v2058_v45 = vmax.f32 %v8412_v55, %v1955_v32 }
 0x2eb   : > { %v6925_v17 = vunpack.i.h.bf16 %v9126_v10  ;;  %v6924_v2 = vunpack.i.l.bf16 %v9126_v10  ;;  %v11223_v26 = vshrl.u32 %v9023_v50, 16  ;;  %v2127_v33 = vsel %vm1947_vm7, %v2083_v60, %v8559_v11 }
 0x2ec   : > { %v2178_v15 = vor.u32 %v2177_v8, %v11222_v6  ;;  %v2054_v25 = vmax.f32 %v8392_v29, %v1953_v54  ;;  %v6900_v5 = vunpack.i.h.bf16 %v6898_v58  ;;  %v6899_v28 = vunpack.i.l.bf16 %v6898_v58 }
 0x2ed   : > { %v2192_v38 = vor.u32 %v2191_v62, %v11223_v26  ;;  %v9153_v18 = vpack.c.bf16 %v2125_v34, %v8943_v43  ;;  %v2091_v55 = vmax.f32 %v8605_v27, %v6925_v17  ;;  %v2087_v8 = vmax.f32 %v8583_v53, %v6924_v2  ;;  %v9163_v51 = vpop.permute.xlu0 %6932  ;;  %v6908_v11 = vpop.permute.xlu1 %6907 }
 0x2ee   : > { %v6510_v62 = vpack.c.bf16 %v9132_v57, %v9129_v16  ;;  %v11224_v29 = vunpack.i.h.bf16 %v9033_v21  ;;  %v11225_v43 = vunpack.i.l.bf16 %v9033_v21  ;;  %v6935_v39 = vunpack.i.h.bf16 %v9163_v51 }
 0x2ef   : > { %v6934_v32 = vunpack.i.l.bf16 %v9163_v51  ;;  %v9174_v1 = vpack.c.bf16 %v2127_v33, %v8947_v24  ;;  %v9177_v54 = vpack.c.bf16 %v2058_v45, %v8791_v0  ;;  %v2131_v58 = vsel %vm1947_vm7, %v2091_v55, %v8605_v27 }
 0x2f0   : > { %v1959_v60 = vsel %vm1947_vm7, %v6900_v5, %v11224_v29  ;;  %v1957_v59 = vsel %vm1947_vm7, %v6899_v28, %v11225_v43  ;;  %v2129_v34 = vsel %vm1947_vm7, %v2087_v8, %v8583_v53  ;;  %3983 = vmatmul.mubr.bf16.gmra.mrb[28].mxu0 %v6510_v62  ;;  %v9184_v21 = vpack.c.bf16 %v2054_v25, %v8788_v20  ;;  %v7191_v62 = vld [vmem:[%s10984_s3 + $0x200] ss:$8 sps:$4 sm:$0xff]  }
 0x2f1   : > { %4025 = vmatprep.mubr.bf16.mxu0 %v6090_v56  ;;  %v2099_v6 = vmax.f32 %v8651_v12, %v6935_v39  ;;  %v2095_v0 = vmax.f32 %v8629_v7, %v6934_v32  ;;  %v6089_v24 = vcombine.low %v2178_v15, %v2192_v38  ;;  %v2066_v45 = vmax.f32 %v8458_v40, %v1959_v60  ;;  %v9194_v33 = vpop.permute.xlu0 %6942  ;;  %v6918_v20 = vpop.permute.xlu1 %6917 }
 0x2f2   : > { %v2062_v27 = vmax.f32 %v8438_v14, %v1957_v59  ;;  %v6910_v26 = vunpack.i.h.bf16 %v6908_v11  ;;  %v6909_v53 = vunpack.i.l.bf16 %v6908_v11  ;;  %v9197_v56 = vpack.c.bf16 %v2129_v34, %v8965_v61 }
 0x2f3   : > { %v9200_v25 = vpack.c.bf16 %v2131_v58, %v8969_v42  ;;  %v6945_v5 = vunpack.i.h.bf16 %v9194_v33  ;;  %v6944_v28 = vunpack.i.l.bf16 %v9194_v33  ;;  %v2135_v40 = vsel %vm1947_vm7, %v2099_v6, %v8651_v12 }
 0x2f4   : > { %v2133_v14 = vsel %vm1947_vm7, %v2095_v0, %v8629_v7  ;;  %v11226_v15 = vunpack.i.h.bf16 %v9066_v36  ;;  %v11227_v61 = vunpack.i.l.bf16 %v9066_v36  ;;  %v9226_v36 = vpack.c.bf16 %v2066_v45, %v8844_v23  ;;  %v11228_v0 = vld [vmem:[#allocation14_spill] sm:$0xff] }
 0x2f5   : > { %v2107_v7 = vmax.f32 %v8700_v19, %v6945_v5  ;;  %v2103_v12 = vmax.f32 %v8678_v4, %v6944_v28  ;;  %v6920_v11 = vunpack.i.h.bf16 %v6918_v20  ;;  %v6919_v29 = vunpack.i.l.bf16 %v6918_v20  ;;  %v6928_v60 = vpop.permute.xlu1 %6927  ;;  %v11230_v45 = vld [vmem:[#allocation34_spill] sm:$0xff]  ;;  %v11231_v20 = vld [vmem:[#allocation32_spill] sm:$0xff] }
 0x2f6   : > { %v1963_v38 = vsel %vm1947_vm7, %v6910_v26, %v11226_v15  ;;  %v1961_v55 = vsel %vm1947_vm7, %v6909_v53, %v11227_v61  ;;  %v9233_v43 = vpack.c.bf16 %v2062_v27, %v8841_v37  ;;  %v9236_v59 = vpack.c.bf16 %v2133_v14, %v8987_v52 }
 0x2f7   : > { %v2074_v42 = vmax.f32 %v8504_v47, %v1963_v38  ;;  %v2070_v8 = vmax.f32 %v8484_v49, %v1961_v55  ;;  %v2210_v47 = vshll.u32 %v9048_v63, 16  ;;  %v7196_v49 = vld [vmem:[%s10984_s3 + $0x214] ss:$8 sps:$4 sm:$0xff]   ;;  %v9239_v58 = vpack.c.bf16 %v2135_v40, %v8991_v31 }
 0x2f8   : > { %v2137_v23 = vsel %vm1947_vm7, %v2103_v12, %v8678_v4  ;;  %v1967_v6 = vsel %vm1947_vm7, %v6920_v11, %v6915_v9  ;;  %v1965_v37 = vsel %vm1947_vm7, %v6919_v29, %v6914_v41  ;;  %4026 = vmatmul.mubr.bf16.vlgmr.msra.gmra.mrb[0].mxu0 %v6089_v24  ;;  %v2208_v52 = vshrl.u32 %v9048_v63, 16  ;;  %v11229_v41 = vld [vmem:[#allocation35_spill] sm:$0xff]  ;;  %v11233_v12 = vld [vmem:[#allocation2_spill] sm:$0xff] }
 0x2f9   : > { %v9244_v34 = vpack.c.bf16 %v2074_v42, %v8890_v22  ;;  %v9254_v31 = vpack.c.bf16 %v2070_v8, %v11228_v0  ;;  %v2139_v4 = vsel %vm1947_vm7, %v2107_v7, %v8700_v19  ;;  %v9259_v22 = vpack.c.bf16 %v2137_v23, %v9085_v48  ;;  %4107 = vmatpush1.bf16.msra.mxu0 %v7191_v62  ;;  %v7199_v19 = vld [vmem:[%s10984_s3 + $0x224] ss:$8 sps:$4 sm:$0xff]   ;;  %v6938_v48 = vpop.permute.xlu1 %6937  ;;  %v11232_v62 = vld [vmem:[#allocation5_spill] sm:$0xff]  ;;  %v7197_v29 = vld [vmem:[%s10984_s3 + $0x220] ss:$8 sps:$4 sm:$0xff]  }
 0x2fa   : > { %v2212_v9 = vrot.slane %v2210_v47, 1  ;;  %v2082_v24 = vmax.f32 %v11229_v41, %v1967_v6  ;;  %v11104_v27 = vshll.u32 %v11230_v45, 16  ;;  %4108 = vmatprep.subr.bf16.mxu0 %v7196_v49  ;;  %v6930_v26 = vunpack.i.h.bf16 %v6928_v60  ;;  %v7202_v6 = vld [vmem:[%s10984_s3 + $0x234] ss:$8 sps:$4 sm:$0xff]   ;;  %v11235_v0 = vld [vmem:[#allocation15_spill] sm:$0xff] }
 0x2fb   : > { %v6929_v53 = vunpack.i.l.bf16 %v6928_v60  ;;  %v2078_v40 = vmax.f32 %v11231_v20, %v1965_v37  ;;  %v11105_v15 = vshrl.u32 %v11230_v45, 16  ;;  %v6940_v38 = vunpack.i.h.bf16 %v6938_v48  ;;  %v11239_v20 = vld [vmem:[#allocation8_spill] sm:$0xff] }
 0x2fc   : > { %v2213_v14 = vor.u32 %v2212_v9, %v2208_v52  ;;  %v2226_v61 = vrot.slane %v11104_v27, 1  ;;  %v1971_v55 = vsel %vm1947_vm7, %v6930_v26, %v6925_v17  ;;  %v6939_v8 = vunpack.i.l.bf16 %v6938_v48  ;;  %v11238_v48 = vld [vmem:[#allocation18_spill] sm:$0xff] }
 0x2fd   : > { %v1969_v42 = vsel %vm1947_vm7, %v6929_v53, %v6924_v2  ;;  %v2090_v7 = vmax.f32 %v11232_v62, %v1971_v55  ;;  %4109 = vmatpush1.bf16.msra.mxu0 %v7194_v3  ;;  %v1975_v49 = vsel %vm1947_vm7, %v6940_v38, %v6935_v39  ;;  %v11102_v17 = vshll.u32 %v9184_v21, 16  ;;  %v11234_v39 = vld [vmem:[#allocation16_spill] sm:$0xff]  ;;  %v6948_v51 = vpop.permute.xlu1 %6947 }
 0x2fe   : > { %v2086_v11 = vmax.f32 %v11233_v12, %v1969_v42  ;;  %v9293_v10 = vpack.c.bf16 %v2139_v4, %v9089_v13  ;;  %v2227_v2 = vor.u32 %v2226_v61, %v11105_v15  ;;  %4110 = vmatprep.subr.bf16.mxu0 %v7199_v19  ;;  %v1973_v60 = vsel %vm1947_vm7, %v6939_v8, %v6934_v32  ;;  %v11236_v4 = vld [vmem:[#allocation11_spill] sm:$0xff] }
 0x2ff   : > { %v11103_v23 = vshrl.u32 %v9184_v21, 16  ;;  %v9305_v37 = vpack.c.bf16 %v2082_v24, %v11234_v39  ;;  %v9308_v13 = vpack.c.bf16 %v2078_v40, %v11235_v0  ;;  %v2098_v9 = vmax.f32 %v11236_v4, %v1975_v49  ;;  %v11237_v32 = vld [vmem:[#allocation19_spill] sm:$0xff]  ;;  %v11241_v4 = vld [vmem:[#allocation21_spill] sm:$0xff] }
 0x300   : > { %v2205_v3 = vrot.slane %v11102_v17, 1  ;;  %v6100_v41 = vcombine.low %v2213_v14, %v2227_v2  ;;  %v9314_v26 = vpack.c.bf16 %v2090_v7, %v11237_v32  ;;  %v11101_v53 = vshrl.u32 %v9177_v54, 16  ;;  %v11240_v61 = vld [vmem:[#allocation31_spill] sm:$0xff]  ;;  %v7200_v14 = vld [vmem:[%s10984_s3 + $0x230] ss:$8 sps:$4 sm:$0xff]  }
 0x301   : > { %v11100_v19 = vshll.u32 %v9177_v54, 16  ;;  %v9319_v24 = vpack.c.bf16 %v2086_v11, %v11238_v48  ;;  %v2094_v40 = vmax.f32 %v11239_v20, %v1973_v60  ;;  %4111 = vmatpush1.bf16.msra.mxu0 %v7197_v29  ;;  %v11098_v55 = vshll.u32 %v11240_v61, 16  ;;  %v7205_v12 = vld [vmem:[%s10984_s3 + $0x244] ss:$8 sps:$4 sm:$0xff]   ;;  %v7203_v48 = vld [vmem:[%s10984_s3 + $0x240] ss:$8 sps:$4 sm:$0xff]  }
 0x302   : > { %v2206_v38 = vor.u32 %v2205_v3, %v11103_v23  ;;  %4035 = vmatprep.mubr.bf16.mxu0 %v6100_v41  ;;  %v11077_v8 = vshll.u32 %v9111_v35, 16  ;;  %4112 = vmatprep.subr.bf16.mxu0 %v7202_v6  ;;  %v6950_v62 = vunpack.i.h.bf16 %v6948_v51  ;;  %v6949_v7 = vunpack.i.l.bf16 %v6948_v51  ;;  %v11242_v41 = vld [vmem:[#allocation12_spill] sm:$0xff] }
 0x303   : > { %v2219_v42 = vrot.slane %v11100_v19, 1  ;;  %v11099_v11 = vshrl.u32 %v11240_v61, 16  ;;  %v2240_v29 = vrot.slane %v11098_v55, 1  ;;  %v11097_v49 = vshrl.u32 %v9111_v35, 16  ;;  %v11243_v20 = vld [vmem:[#allocation20_spill] sm:$0xff] }
 0x304   : > { %v11060_v2 = vshll.u32 %v9233_v43, 16  ;;  %v2254_v6 = vrot.slane %v11077_v8, 1  ;;  %v1979_v39 = vsel %vm1947_vm7, %v6950_v62, %v6945_v5  ;;  %v1977_v0 = vsel %vm1947_vm7, %v6949_v7, %v6944_v28  ;;  %v11244_v62 = vld [vmem:[#allocation13_spill] sm:$0xff] }
 0x305   : > { %v2220_v60 = vor.u32 %v2219_v42, %v11101_v53  ;;  %v9350_v3 = vpack.c.bf16 %v2098_v9, %v11241_v4  ;;  %v2241_v51 = vor.u32 %v2240_v29, %v11099_v11  ;;  %v2102_v32 = vmax.f32 %v11242_v41, %v1977_v0  ;;  %4113 = vmatpush1.bf16.msra.mxu0 %v7200_v14  ;;  %v7208_v14 = vld [vmem:[%s10984_s3 + $0x254] ss:$8 sps:$4 sm:$0xff]  }
 0x306   : > { %v2233_v5 = vrot.slane %v11060_v2, 1  ;;  %v9361_v33 = vpack.c.bf16 %v2094_v40, %v11243_v20  ;;  %v2255_v9 = vor.u32 %v2254_v6, %v11097_v49  ;;  %4114 = vmatprep.subr.bf16.mxu0 %v7205_v12  ;;  %v11054_v42 = vshll.u32 %v9226_v36, 16 }
 0x307   : > { %v6099_v28 = vcombine.low %v2206_v38, %v2220_v60  ;;  %v2106_v7 = vmax.f32 %v11244_v62, %v1979_v39  ;;  %v11072_v29 = vshrl.u32 %v9233_v43, 16  ;;  %v11058_v0 = vshrl.u32 %v9226_v36, 16 }
 0x308   : > { %v11053_v40 = vshll.u32 %v9135_v44, 16  ;;  %v6110_v38 = vcombine.low %v2241_v51, %v2255_v9  ;;  %v2247_v60 = vrot.slane %v11054_v42, 1  ;;  %v11056_v12 = vshrl.u32 %v9135_v44, 16  ;;  %v7206_v51 = vld [vmem:[%s10984_s3 + $0x250] ss:$8 sps:$4 sm:$0xff]  }
 0x309   : > { %4036 = vmatmul.mubr.bf16.gmra.mrb[4].mxu0 %v6099_v28  ;;  %v11052_v6 = vshll.u32 %v9138_v46, 16  ;;  %v9378_v4 = vpack.c.bf16 %v2102_v32, %v9129_v16  ;;  %v2234_v39 = vor.u32 %v2233_v5, %v11072_v29  ;;  %v11055_v20 = vshll.u32 %v9254_v31, 16 }
 0x30a   : > { %4115 = vmatpush1.bf16.msra.mxu0 %v7203_v48  ;;  %v2268_v41 = vrot.slane %v11053_v40, 1  ;;  %4045 = vmatprep.mubr.bf16.mxu0 %v6110_v38  ;;  %v2248_v28 = vor.u32 %v2247_v60, %v11058_v0  ;;  %v11057_v16 = vshrl.u32 %v9138_v46, 16  ;;  %v7211_v48 = vld [vmem:[%s10984_s3 + $0x264] ss:$8 sps:$4 sm:$0xff]   ;;  %v11059_v5 = vshll.u32 %v9244_v34, 16 }
 0x30b   : > { %v2282_v32 = vrot.slane %v11052_v6, 1  ;;  %4116 = vmatprep.subr.bf16.mxu0 %v7208_v14  ;;  %v11061_v62 = vshrl.u32 %v9254_v31, 16  ;;  %v2261_v38 = vrot.slane %v11055_v20, 1  ;;  %v11062_v60 = vshll.u32 %v9153_v18, 16 }
 0x30c   : > { %v2269_v9 = vor.u32 %v2268_v41, %v11056_v12  ;;  %v11064_v14 = vshrl.u32 %v9244_v34, 16  ;;  %v2275_v40 = vrot.slane %v11059_v5, 1  ;;  %v11063_v42 = vshll.u32 %v9174_v1, 16  ;;  %v7209_v41 = vld [vmem:[%s10984_s3 + $0x260] ss:$8 sps:$4 sm:$0xff]  }
 0x30d   : > { %v2283_v6 = vor.u32 %v2282_v32, %v11057_v16  ;;  %v2262_v20 = vor.u32 %v2261_v38, %v11061_v62  ;;  %v11067_v12 = vshrl.u32 %v9153_v18, 16  ;;  %v2296_v32 = vrot.slane %v11062_v60, 1  ;;  %v7214_v38 = vld [vmem:[%s10984_s3 + $0x274] ss:$8 sps:$4 sm:$0xff]  }
 0x30e   : > { %4117 = vmatpush1.bf16.msra.mxu0 %v7206_v51  ;;  %v11065_v16 = vshll.u32 %v9308_v13, 16  ;;  %v6109_v0 = vcombine.low %v2234_v39, %v2248_v28  ;;  %v2276_v5 = vor.u32 %v2275_v40, %v11064_v14  ;;  %v11066_v51 = vshrl.u32 %v9174_v1, 16 }
 0x30f   : > { %4118 = vmatprep.subr.bf16.mxu0 %v7211_v48  ;;  %v2310_v2 = vrot.slane %v11063_v42, 1  ;;  %v9427_v62 = vpack.c.bf16 %v2106_v7, %v9132_v57  ;;  %v6120_v60 = vcombine.low %v2269_v9, %v2283_v6  ;;  %v11070_v28 = vshll.u32 %v9305_v37, 16  ;;  %v7212_v7 = vld [vmem:[%s10984_s3 + $0x270] ss:$8 sps:$4 sm:$0xff]  }
 0x310   : > { %v2289_v39 = vrot.slane %v11065_v16, 1  ;;  %v2297_v40 = vor.u32 %v2296_v32, %v11067_v12  ;;  %v11069_v42 = vshrl.u32 %v9308_v13, 16  ;;  %v11068_v14 = vshll.u32 %v9197_v56, 16 }
 0x311   : > { %4046 = vmatmul.mubr.bf16.gmra.mrb[8].mxu0 %v6109_v0  ;;  %v2311_v48 = vor.u32 %v2310_v2, %v11066_v51  ;;  %v6119_v57 = vcombine.low %v2262_v20, %v2276_v5  ;;  %v11096_v6 = vshrl.u32 %v9305_v37, 16  ;;  %v11075_v0 = vshrl.u32 %v9197_v56, 16  ;;  %v7217_v2 = vld [vmem:[%s10984_s3 + $0x284] ss:$8 sps:$4 sm:$0xff]  }
 0x312   : > { %4055 = vmatprep.mubr.bf16.mxu0 %v6120_v60  ;;  %4119 = vmatpush1.bf16.msra.mxu0 %v7209_v41  ;;  %v11071_v9 = vshll.u32 %v9200_v25, 16  ;;  %v9449_v60 = vor.u32 %v2289_v39, %v11069_v42  ;;  %v2324_v20 = vrot.slane %v11068_v14, 1  ;;  %v11074_v5 = vshrl.u32 %v9200_v25, 16 }
 0x313   : > { %4120 = vmatprep.subr.bf16.mxu0 %v7214_v38  ;;  %v11073_v41 = vshll.u32 %v9319_v24, 16  ;;  %v2303_v32 = vrot.slane %v11070_v28, 1  ;;  %v11078_v16 = vshrl.u32 %v9319_v24, 16  ;;  %v11076_v51 = vshll.u32 %v9314_v26, 16  ;;  %v7215_v28 = vld [vmem:[%s10984_s3 + $0x280] ss:$8 sps:$4 sm:$0xff]  }
 0x314   : > { %v2338_v38 = vrot.slane %v11071_v9, 1  ;;  %v6130_v12 = vcombine.low %v2297_v40, %v2311_v48  ;;  %v2325_v39 = vor.u32 %v2324_v20, %v11075_v0  ;;  %v11079_v42 = vshll.u32 %v9236_v59, 16  ;;  %v7220_v20 = vld [vmem:[%s10984_s3 + $0x294] ss:$8 sps:$4 sm:$0xff]  }
 0x315   : > { %v2317_v14 = vrot.slane %v11073_v41, 1  ;;  %v11094_v29 = vshrl.u32 %v9314_v26, 16  ;;  %v2331_v40 = vrot.slane %v11076_v51, 1  ;;  %v11080_v48 = vshll.u32 %v9239_v58, 16 }
 0x316   : > { %4121 = vmatpush1.bf16.msra.mxu0 %v7212_v7  ;;  %v2339_v9 = vor.u32 %v2338_v38, %v11074_v5  ;;  %v11085_v41 = vshrl.u32 %v9236_v59, 16  ;;  %v2352_v38 = vrot.slane %v11079_v42, 1  ;;  %v11081_v5 = vshll.u32 %v9361_v33, 16 }
 0x317   : > { %4122 = vmatprep.subr.bf16.mxu0 %v7217_v2  ;;  %v9480_v7 = vor.u32 %v2317_v14, %v11078_v16  ;;  %v9488_v51 = vor.u32 %v2331_v40, %v11094_v29  ;;  %v11082_v2 = vshrl.u32 %v9239_v58, 16  ;;  %v2366_v8 = vrot.slane %v11080_v48, 1 }
 0x318   : > { %v6140_v0 = vcombine.low %v2325_v39, %v2339_v9  ;;  %v9495_v14 = vor.u32 %v2352_v38, %v11085_v41  ;;  %v11083_v16 = vshrl.u32 %v9361_v33, 16  ;;  %v2345_v42 = vrot.slane %v11081_v5, 1 }
 0x319   : > { %4056 = vmatmul.mubr.bf16.gmra.mrb[12].mxu0 %v6119_v57  ;;  %v11084_v9 = vshll.u32 %v9350_v3, 16  ;;  %v2304_v39 = vor.u32 %v2303_v32, %v11096_v6  ;;  %v7218_v57 = vld [vmem:[%s10984_s3 + $0x290] ss:$8 sps:$4 sm:$0xff]   ;;  %v6139_v40 = vcombine.low %v9480_v7, %v9488_v51  ;;  %v2367_v38 = vor.u32 %v2366_v8, %v11082_v2 }
 0x31a   : > { %4065 = vmatprep.mubr.bf16.mxu0 %v6130_v12  ;;  %4123 = vmatpush1.bf16.msra.mxu0 %v7215_v28  ;;  %v11086_v48 = vshll.u32 %v9259_v22, 16  ;;  %v7223_v12 = vld [vmem:[%s10984_s3 + $0x2a4] ss:$8 sps:$4 sm:$0xff]   ;;  %v9516_v28 = vor.u32 %v2345_v42, %v11083_v16  ;;  %v11087_v32 = vshrl.u32 %v9350_v3, 16  ;;  %v11088_v51 = vshll.u32 %v9293_v10, 16 }
 0x31b   : > { %4124 = vmatprep.subr.bf16.mxu0 %v7220_v20  ;;  %v2359_v5 = vrot.slane %v11084_v9, 1  ;;  %v6150_v8 = vcombine.low %v9495_v14, %v2367_v38  ;;  %v11090_v7 = vshrl.u32 %v9259_v22, 16  ;;  %v11089_v2 = vshll.u32 %v9378_v4, 16  ;;  %v7221_v38 = vld [vmem:[%s10984_s3 + $0x2a0] ss:$8 sps:$4 sm:$0xff]  }
 0x31c   : > { %v2380_v20 = vrot.slane %v11086_v48, 1  ;;  %v11093_v16 = vshrl.u32 %v9293_v10, 16  ;;  %v2394_v9 = vrot.slane %v11088_v51, 1  ;;  %v11091_v41 = vshll.u32 %v9427_v62, 16  ;;  %v7226_v51 = vld [vmem:[%s10984_s3 + $0x2b4] ss:$8 sps:$4 sm:$0xff]  }
 0x31d   : > { %v9529_v42 = vor.u32 %v2359_v5, %v11087_v32  ;;  %v6129_v14 = vcombine.low %v9449_v60, %v2304_v39  ;;  %v11092_v5 = vshrl.u32 %v9378_v4, 16  ;;  %v2373_v32 = vrot.slane %v11089_v2, 1 }
 0x31e   : > { %4125 = vmatpush1.bf16.msra.mxu0 %v7218_v57  ;;  %v9541_v48 = vor.u32 %v2380_v20, %v11090_v7  ;;  %v9553_v39 = vor.u32 %v2394_v9, %v11093_v16  ;;  %v11095_v57 = vshrl.u32 %v9427_v62, 16  ;;  %v2387_v20 = vrot.slane %v11091_v41, 1  ;;  %v7224_v9 = vld [vmem:[%s10984_s3 + $0x2b0] ss:$8 sps:$4 sm:$0xff]   ;;  %v11245_v41 = vld [vmem:[#allocation22_spill] sm:$0xff] }
 0x31f   : > { %4126 = vmatprep.subr.bf16.mxu0 %v7223_v12  ;;  %v9560_v2 = vor.u32 %v2373_v32, %v11092_v5  ;;  %v7229_v32 = vld [vmem:[%s10984_s3 + $0x2c4] ss:$8 sps:$4 sm:$0xff]   ;;  %v2429_v5 = vrot.slane %v11245_v41, 1  ;;  %v11246_v16 = vld [vmem:[#allocation29_spill] sm:$0xff]  ;;  %v2451_v6 = vrot.slane %v9200_v25, 1  ;;  %v2430_v49 = vrot.slane %v9023_v50, 1 }
 0x320   : > { %v9566_v7 = vor.u32 %v2387_v20, %v11095_v57  ;;  %v2431_v29 = vrot.slane %v11246_v16, 1  ;;  %v2444_v20 = vrot.slane %v9308_v13, 1  ;;  %v2449_v57 = vrot.slane %v9197_v56, 1 }
 0x321   : > { %4066 = vmatmul.mubr.bf16.gmra.mrb[16].mxu0 %v6129_v14  ;;  %v7232_v14 = vld [vmem:[%s10984_s3 + $0x2d4] ss:$8 sps:$4 sm:$0xff]   ;;  %v2450_v55 = vrot.slane %v9314_v26, 1  ;;  %v2453_v12 = vrot.slane %v9236_v59, 1  ;;  %v2455_v19 = vrot.slane %v9239_v58, 1  ;;  %v2454_v17 = vrot.slane %v9350_v3, 1 }
 0x322   : > { %4075 = vmatprep.mubr.bf16.mxu0 %v6140_v0  ;;  %4127 = vmatpush1.bf16.msra.mxu0 %v7221_v38  ;;  %v7227_v0 = vld [vmem:[%s10984_s3 + $0x2c0] ss:$8 sps:$4 sm:$0xff]   ;;  %v2446_v38 = vrot.slane %v9305_v37, 1  ;;  %v9595_v60 = vcombine.low %v2449_v57, %v2451_v6  ;;  %v2457_v23 = vrot.slane %v9259_v22, 1  ;;  %v2459_v27 = vrot.slane %v9293_v10, 1 }
 0x323   : > { %4128 = vmatprep.subr.bf16.mxu0 %v7226_v51  ;;  %v2428_v51 = vrot.slane %v9020_v30, 1  ;;  %v7230_v6 = vld [vmem:[%s10984_s3 + $0x2d0] ss:$8 sps:$4 sm:$0xff]   ;;  %v9607_v57 = vcombine.low %v2453_v12, %v2455_v19  ;;  %v9622_v19 = vcombine.low %v2429_v5, %v2431_v29  ;;  %v11248_v29 = vshrl.u32 %v11230_v45, 16 }
 0x324   : > { %v9593_v11 = vcombine.low %v2444_v20, %v2446_v38  ;;  %v2456_v20 = vrot.slane %v9378_v4, 1  ;;  %v11255_v30 = vshrl.u32 %v11240_v61, 16 }
 0x325   : > { %v9624_v12 = vcombine.low %v2428_v51, %v2430_v49  ;;  %v2481_v5 = vrot.slane %v11248_v29, 1  ;;  %v11249_v51 = vshll.u32 %v11230_v45, 16  ;;  %v11254_v49 = vcombine.low %v9516_v28, %v9529_v42 }
 0x326   : > { %4129 = vmatpush1.bf16.msra.mxu0 %v7224_v9  ;;  %v2448_v9 = vrot.slane %v9319_v24, 1  ;;  %v11257_v28 = vshll.u32 %v11240_v61, 16 }
 0x327   : > { %4130 = vmatprep.subr.bf16.mxu0 %v7229_v32  ;;  %v2452_v32 = vrot.slane %v9361_v33, 1 }
 0x328   : > { %v9599_v53 = vcombine.low %v2448_v9, %v2450_v55  ;;  %v7235_v55 = vld [vmem:[%s10984_s3 + $0x2e4] ss:$8 sps:$4 sm:$0xff]   ;;  %v9616_v9 = vcombine.low %v2457_v23, %v2459_v27  ;;  %v11251_v27 = vshll.u32 %v9184_v21, 16  ;;  %v2488_v42 = vrot.slane %v11257_v28, 2 }
 0x329   : > { %4076 = vmatmul.mubr.bf16.gmra.mrb[20].mxu0 %v6139_v40  ;;  %v2458_v40 = vrot.slane %v9427_v62, 1  ;;  %v9614_v38 = vcombine.low %v2452_v32, %v2454_v17  ;;  %v7233_v17 = vld [vmem:[%s10984_s3 + $0x2e0] ss:$8 sps:$4 sm:$0xff]   ;;  %v2476_v32 = vrot.slane %v2210_v47, 2 }
 0x32a   : > { %4085 = vmatprep.mubr.bf16.mxu0 %v6150_v8  ;;  %4131 = vmatpush1.bf16.msra.mxu0 %v7227_v0  ;;  %v2433_v8 = vrot.slane %v9048_v63, 1  ;;  %v2435_v0 = vrot.slane %v11230_v45, 1  ;;  %v2473_v23 = vrot.slane %v11251_v27, 2  ;;  %v2487_v27 = vrot.slane %v11255_v30, 1  ;;  %v7241_v30 = vld [vmem:[%s10984_s3 + $0x304] ss:$8 sps:$4 sm:$0xff]  }
 0x32b   : > { %4132 = vmatprep.subr.bf16.mxu0 %v7232_v14  ;;  %v9620_v15 = vcombine.low %v2456_v20, %v2458_v40  ;;  %v2475_v14 = vrot.slane %v2208_v52, 1  ;;  %v7238_v52 = vld [vmem:[%s10984_s3 + $0x2f4] ss:$8 sps:$4 sm:$0xff]   ;;  %v11250_v20 = vshrl.u32 %v9184_v21, 16 }
 0x32c   : > { %v9647_v47 = vcombine.low %v2433_v8, %v2435_v0  ;;  %v11256_v8 = vcombine.low %v9541_v48, %v9553_v39  ;;  %v11261_v39 = vshrl.u32 %v9233_v43, 16 }
 0x32d   : > { %11247 = vst [vmem:[#allocation30_spill] sm:$0xff] %v9620_v15  ;;  %v2472_v40 = vrot.slane %v11250_v20, 1  ;;  %v2477_v63 = vor.u32 %v2476_v32, %v2475_v14  ;;  %v11253_v15 = vshll.u32 %v9177_v54, 16  ;;  %v11258_v14 = vshrl.u32 %v9111_v35, 16 }
 0x32e   : > { %4133 = vmatpush1.bf16.msra.mxu0 %v7230_v6  ;;  %v2482_v6 = vrot.slane %v11249_v51, 2  ;;  %v11267_v51 = vshrl.u32 %v9138_v46, 16 }
 0x32f   : > { %4134 = vmatprep.subr.bf16.mxu0 %v7235_v55  ;;  %v11252_v55 = vshrl.u32 %v9177_v54, 16  ;;  %v2479_v50 = vrot.slane %v11253_v15, 2  ;;  %v2474_v20 = vor.u32 %v2473_v23, %v2472_v40  ;;  %v7236_v15 = vld [vmem:[%s10984_s3 + $0x2f0] ss:$8 sps:$4 sm:$0xff]   ;;  %v2493_v32 = vrot.slane %v11258_v14, 1 }
 0x330   : > { %v2483_v45 = vor.u32 %v2482_v6, %v2481_v5  ;;  %v11259_v23 = vshll.u32 %v9111_v35, 16  ;;  %v11263_v6 = vshrl.u32 %v9226_v36, 16 }
 0x331   : > { %v2478_v29 = vrot.slane %v11252_v55, 1  ;;  %4086 = vmatmul.mubr.bf16.gmra.mrb[24].mxu0 %v11254_v49 }
 0x332   : > { %4095 = vmatprep.mubr.bf16.mxu0 %v11256_v8  ;;  %4135 = vmatpush1.bf16.msra.mxu0 %v7233_v17  ;;  %v2494_v5 = vrot.slane %v11259_v23, 2  ;;  %v9674_v48 = vcombine.low %v2477_v63, %v2483_v45  ;;  %v2484_v17 = vrot.slane %v11261_v39, 1  ;;  %v2490_v40 = vrot.slane %v11263_v6, 1 }
 0x333   : > { %v2480_v0 = vor.u32 %v2479_v50, %v2478_v29  ;;  %4136 = vmatprep.subr.bf16.mxu0 %v7238_v52  ;;  %v11262_v50 = vshll.u32 %v9233_v43, 16  ;;  %v2489_v29 = vor.u32 %v2488_v42, %v2487_v27  ;;  %v11264_v52 = vshll.u32 %v9226_v36, 16 }
 0x334   : > { %11260 = vst [vmem:[#allocation33_spill] sm:$0xff] %v9674_v48  ;;  %v2495_v8 = vor.u32 %v2494_v5, %v2493_v32  ;;  %v11265_v63 = vshrl.u32 %v9135_v44, 16  ;;  %v11266_v23 = vshll.u32 %v9135_v44, 16  ;;  %v11268_v27 = vshll.u32 %v9138_v46, 16 }
 0x335   : > { %v2485_v49 = vrot.slane %v11262_v50, 2  ;;  %v9682_v55 = vcombine.low %v2474_v20, %v2480_v0  ;;  %v2491_v28 = vrot.slane %v11264_v52, 2  ;;  %v2505_v50 = vrot.slane %v11267_v51, 1 }
 0x336   : > { %v2499_v45 = vrot.slane %v11265_v63, 1  ;;  %v2500_v39 = vrot.slane %v11266_v23, 2  ;;  %4137 = vmatpush1.bf16.msra.mxu0 %v7236_v15  ;;  %v9692_v48 = vcombine.low %v2489_v29, %v2495_v8  ;;  %v2506_v0 = vrot.slane %v11268_v27, 2 }
 0x337   : > { %v2486_v14 = vor.u32 %v2485_v49, %v2484_v17  ;;  %v2492_v20 = vor.u32 %v2491_v28, %v2490_v40  ;;  %v11269_v42 = vshrl.u32 %v9254_v31, 16  ;;  %4219 = vmatprep.subr.bf16.mxu0 %v7241_v30  ;;  %v11270_v17 = vshll.u32 %v9254_v31, 16 }
 0x338   : > { %v2501_v5 = vor.u32 %v2500_v39, %v2499_v45  ;;  %v11271_v6 = vshrl.u32 %v9244_v34, 16  ;;  %v11272_v51 = vshll.u32 %v9244_v34, 16  ;;  %v2507_v40 = vor.u32 %v2506_v0, %v2505_v50 }
 0x339   : > { %v2496_v32 = vrot.slane %v11269_v42, 1  ;;  %v2497_v49 = vrot.slane %v11270_v17, 2  ;;  %v9704_v29 = vcombine.low %v2486_v14, %v2492_v20  ;;  %v11273_v8 = vshrl.u32 %v9153_v18, 16 }
 0x33a   : > { %v2502_v52 = vrot.slane %v11271_v6, 1  ;;  %v2503_v15 = vrot.slane %v11272_v51, 2  ;;  %v11274_v63 = vshll.u32 %v9153_v18, 16  ;;  %v11275_v30 = vcombine.low %v9560_v2, %v9566_v7 }
 0x33b   : > { %v2511_v28 = vrot.slane %v11273_v8, 1  ;;  %v2498_v45 = vor.u32 %v2497_v49, %v2496_v32  ;;  %v11276_v27 = vshrl.u32 %v9174_v1, 16  ;;  %v11277_v17 = vshll.u32 %v9174_v1, 16 }
 0x33c   : > { %v2512_v23 = vrot.slane %v11274_v63, 2  ;;  %4096 = vmatmul.mubr.bf16.gmra.mrb[28].mxu0 %v11275_v30  ;;  %v2504_v39 = vor.u32 %v2503_v15, %v2502_v52  ;;  %v9718_v50 = vcombine.low %v2501_v5, %v2507_v40  ;;  %v11278_v0 = vshrl.u32 %v9308_v13, 16 }
 0x33d   : > { %v2517_v42 = vrot.slane %v11276_v27, 1  ;;  %v2518_v14 = vrot.slane %v11277_v17, 2  ;;  %4138 = vmatprep.mubr.bf16.mxu0 %v9622_v19  ;;  %v11279_v51 = vshll.u32 %v9308_v13, 16  ;;  %v11281_v49 = vshrl.u32 %v9305_v37, 16 }
 0x33e   : > { %v2513_v20 = vor.u32 %v2512_v23, %v2511_v28  ;;  %v2508_v6 = vrot.slane %v11278_v0, 1  ;;  %v9724_v7 = vcombine.low %v2498_v45, %v2504_v39  ;;  %v11282_v15 = vshll.u32 %v9305_v37, 16  ;;  %v7239_v0 = vld [vmem:[%s10984_s3 + $0x300] ss:$8 sps:$4 sm:$0xff]  }
 0x33f   : > { %v2509_v2 = vrot.slane %v11279_v51, 2  ;;  %v2519_v32 = vor.u32 %v2518_v14, %v2517_v42  ;;  %v2514_v52 = vrot.slane %v11281_v49, 1  ;;  %v11283_v19 = vshrl.u32 %v9197_v56, 16 }
 0x340   : > { %11280 = vst [vmem:[#allocation4_spill] sm:$0xff] %v9724_v7  ;;  %v2515_v8 = vrot.slane %v11282_v15, 2  ;;  %v11284_v40 = vshll.u32 %v9197_v56, 16  ;;  %v11285_v23 = vshrl.u32 %v9200_v25, 16  ;;  %v11287_v39 = vshll.u32 %v9200_v25, 16 }
 0x341   : > { %v2510_v63 = vor.u32 %v2509_v2, %v2508_v6  ;;  %v2523_v5 = vrot.slane %v11283_v19, 1  ;;  %v9736_v27 = vcombine.low %v2513_v20, %v2519_v32  ;;  %v11288_v17 = vshrl.u32 %v9319_v24, 16 }
 0x342   : > { %v2524_v28 = vrot.slane %v11284_v40, 2  ;;  %v2529_v30 = vrot.slane %v11285_v23, 1  ;;  %v2516_v45 = vor.u32 %v2515_v8, %v2514_v52  ;;  %v2530_v42 = vrot.slane %v11287_v39, 2  ;;  %v7244_v52 = vld [vmem:[%s10984_s3 + $0x314] ss:$8 sps:$4 sm:$0xff]  }
 0x343   : > { %11286 = vst [vmem:[#allocation37_spill] sm:$0xff] %v9736_v27  ;;  %v2520_v14 = vrot.slane %v11288_v17, 1  ;;  %v11289_v51 = vshll.u32 %v9319_v24, 16  ;;  %v11290_v49 = vshrl.u32 %v9314_v26, 16  ;;  %v11291_v20 = vshll.u32 %v9314_v26, 16 }
 0x344   : > { %v2525_v6 = vor.u32 %v2524_v28, %v2523_v5  ;;  %v9754_v8 = vcombine.low %v2510_v63, %v2516_v45  ;;  %v2531_v19 = vor.u32 %v2530_v42, %v2529_v30  ;;  %v11292_v40 = vshrl.u32 %v9236_v59, 16  ;;  %4139 = vmatmul.mubr.bf16.vlgmr.msra.gmra.mrb[0].mxu0 %v9624_v12 }
 0x345   : > { %v2521_v2 = vrot.slane %v11289_v51, 2  ;;  %v2526_v15 = vrot.slane %v11290_v49, 1  ;;  %v2527_v32 = vrot.slane %v11291_v20, 2  ;;  %v11293_v5 = vshll.u32 %v9236_v59, 16  ;;  %4220 = vmatpush1.bf16.msra.mxu0 %v7239_v0  ;;  %4148 = vmatprep.mubr.bf16.mxu0 %v9647_v47  ;;  %v7247_v0 = vld [vmem:[%s10984_s3 + $0x324] ss:$8 sps:$4 sm:$0xff]  }
 0x346   : > { %v2535_v23 = vrot.slane %v11292_v40, 1  ;;  %v11294_v51 = vshrl.u32 %v9239_v58, 16  ;;  %v11295_v20 = vshll.u32 %v9239_v58, 16  ;;  %v9765_v7 = vcombine.low %v2525_v6, %v2531_v19  ;;  %4221 = vmatprep.subr.bf16.mxu0 %v7244_v52 }
 0x347   : > { %v2536_v28 = vrot.slane %v11293_v5, 2  ;;  %v2522_v39 = vor.u32 %v2521_v2, %v2520_v14  ;;  %v2528_v17 = vor.u32 %v2527_v32, %v2526_v15  ;;  %v11296_v30 = vshrl.u32 %v9361_v33, 16  ;;  %v7242_v14 = vld [vmem:[%s10984_s3 + $0x310] ss:$8 sps:$4 sm:$0xff]  }
 0x348   : > { %v2541_v49 = vrot.slane %v11294_v51, 1  ;;  %v2542_v27 = vrot.slane %v11295_v20, 2  ;;  %v11297_v42 = vshll.u32 %v9361_v33, 16  ;;  %v11299_v12 = vshrl.u32 %v9350_v3, 16 }
 0x349   : > { %v2537_v63 = vor.u32 %v2536_v28, %v2535_v23  ;;  %v2532_v45 = vrot.slane %v11296_v30, 1  ;;  %v9775_v2 = vcombine.low %v2522_v39, %v2528_v17  ;;  %v11300_v32 = vshll.u32 %v9350_v3, 16  ;;  %4222 = vmatpush1.bf16.msra.mxu0 %v7242_v14 }
 0x34a   : > { %v2533_v40 = vrot.slane %v11297_v42, 2  ;;  %v2543_v15 = vor.u32 %v2542_v27, %v2541_v49  ;;  %v2538_v6 = vrot.slane %v11299_v12, 1  ;;  %v11301_v47 = vshrl.u32 %v9259_v22, 16  ;;  %4223 = vmatprep.subr.bf16.mxu0 %v7247_v0 }
 0x34b   : > { %11298 = vst [vmem:[#allocation36_spill] sm:$0xff] %v9775_v2  ;;  %v2539_v19 = vrot.slane %v11300_v32, 2  ;;  %v11302_v28 = vshll.u32 %v9259_v22, 16  ;;  %v11303_v27 = vshrl.u32 %v9293_v10, 16  ;;  %v11304_v20 = vshll.u32 %v9293_v10, 16 }
 0x34c   : > { %v2534_v23 = vor.u32 %v2533_v40, %v2532_v45  ;;  %v2547_v5 = vrot.slane %v11301_v47, 1  ;;  %v9790_v51 = vcombine.low %v2537_v63, %v2543_v15  ;;  %v11305_v30 = vshrl.u32 %v9378_v4, 16  ;;  %v7245_v63 = vld [vmem:[%s10984_s3 + $0x320] ss:$8 sps:$4 sm:$0xff]  }
 0x34d   : > { %v2548_v39 = vrot.slane %v11302_v28, 2  ;;  %v2553_v17 = vrot.slane %v11303_v27, 1  ;;  %v2540_v49 = vor.u32 %v2539_v19, %v2538_v6  ;;  %v2554_v52 = vrot.slane %v11304_v20, 2  ;;  %v7250_v27 = vld [vmem:[%s10984_s3 + $0x334] ss:$8 sps:$4 sm:$0xff]   ;;  %4224 = vmatpush1.bf16.msra.mxu0 %v7245_v63 }
 0x34e   : > { %v2544_v42 = vrot.slane %v11305_v30, 1  ;;  %v11306_v45 = vshll.u32 %v9378_v4, 16  ;;  %v11307_v32 = vshrl.u32 %v9427_v62, 16  ;;  %v11308_v28 = vshll.u32 %v9427_v62, 16  ;;  %4225 = vmatprep.subr.bf16.mxu0 %v7250_v27 }
 0x34f   : > { %v2549_v12 = vor.u32 %v2548_v39, %v2547_v5  ;;  %v9805_v15 = vcombine.low %v2534_v23, %v2540_v49  ;;  %v2555_v6 = vor.u32 %v2554_v52, %v2553_v17  ;;  %v11309_v19 = vrot.slane %v9177_v54, 1  ;;  %v7248_v17 = vld [vmem:[%s10984_s3 + $0x330] ss:$8 sps:$4 sm:$0xff]   ;;  %v7253_v52 = vld [vmem:[%s10984_s3 + $0x344] ss:$8 sps:$4 sm:$0xff]  }
 0x350   : > { %v2545_v40 = vrot.slane %v11306_v45, 2  ;;  %v2550_v47 = vrot.slane %v11307_v32, 1  ;;  %v2551_v2 = vrot.slane %v11308_v28, 2  ;;  %v11310_v5 = vrot.slane %v9184_v21, 1 }
 0x351   : > { %v11311_v14 = vrot.slane %v9111_v35, 1  ;;  %v11312_v45 = vrot.slane %v11240_v61, 1  ;;  %v9818_v23 = vcombine.low %v2549_v12, %v2555_v6  ;;  %v2436_v49 = vrot.slane %v9233_v43, 1  ;;  %4226 = vmatpush1.bf16.msra.mxu0 %v7248_v17 }
 0x352   : > { %v6101_v39 = vcombine.low %v11310_v5, %v11309_v19  ;;  %v2546_v20 = vor.u32 %v2545_v40, %v2544_v42  ;;  %v2552_v30 = vor.u32 %v2551_v2, %v2550_v47  ;;  %v2438_v2 = vrot.slane %v9226_v36, 1  ;;  %v7251_v47 = vld [vmem:[%s10984_s3 + $0x340] ss:$8 sps:$4 sm:$0xff]   ;;  %4227 = vmatprep.subr.bf16.mxu0 %v7253_v52 }
 0x353   : > { %v6112_v32 = vcombine.low %v11312_v45, %v11311_v14  ;;  %v2441_v42 = vrot.slane %v9135_v44, 1  ;;  %v2443_v12 = vrot.slane %v9138_v46, 1  ;;  %v2572_v40 = vrot.slane %v9308_v13, 2 }
 0x354   : > { %4149 = vmatmul.mubr.bf16.gmra.mrb[4].mxu0 %v6101_v39  ;;  %v9820_v0 = vcombine.low %v2546_v20, %v2552_v30  ;;  %v6111_v28 = vcombine.low %v2436_v49, %v2438_v2  ;;  %v2574_v63 = vrot.slane %v9305_v37, 2  ;;  %v2577_v6 = vrot.slane %v9197_v56, 2  ;;  %v7256_v39 = vld [vmem:[%s10984_s3 + $0x354] ss:$8 sps:$4 sm:$0xff]  }
 0x355   : > { %4158 = vmatprep.mubr.bf16.mxu0 %v6112_v32  ;;  %v2579_v19 = vrot.slane %v9200_v25, 2  ;;  %v6122_v5 = vcombine.low %v2441_v42, %v2443_v12  ;;  %v2576_v13 = vrot.slane %v9319_v24, 2  ;;  %v2578_v27 = vrot.slane %v9314_v26, 2  ;;  %4228 = vmatpush1.bf16.msra.mxu0 %v7251_v47  ;;  %v7262_v12 = vld [vmem:[%s10984_s3 + $0x374] ss:$8 sps:$4 sm:$0xff]  }
 0x356   : > { %v2581_v20 = vrot.slane %v9236_v59, 2  ;;  %v9845_v30 = vcombine.low %v2572_v40, %v2574_v63  ;;  %v2583_v56 = vrot.slane %v9239_v58, 2  ;;  %v2580_v25 = vrot.slane %v9361_v33, 2  ;;  %v7254_v59 = vld [vmem:[%s10984_s3 + $0x350] ss:$8 sps:$4 sm:$0xff]   ;;  %4229 = vmatprep.subr.bf16.mxu0 %v7256_v39 }
 0x357   : > { %v9847_v14 = vcombine.low %v2577_v6, %v2579_v19  ;;  %v9851_v37 = vcombine.low %v2576_v13, %v2578_v27  ;;  %v2582_v45 = vrot.slane %v9350_v3, 2  ;;  %v2585_v32 = vrot.slane %v9259_v22, 2  ;;  %v7259_v3 = vld [vmem:[%s10984_s3 + $0x364] ss:$8 sps:$4 sm:$0xff]   ;;  %v7260_v47 = vld [vmem:[%s10984_s3 + $0x370] ss:$8 sps:$4 sm:$0xff]  }
 0x358   : > { %v2587_v24 = vrot.slane %v9293_v10, 2  ;;  %v9859_v26 = vcombine.low %v2581_v20, %v2583_v56  ;;  %v2584_v58 = vrot.slane %v9378_v4, 2  ;;  %v2586_v33 = vrot.slane %v9427_v62, 2  ;;  %v7257_v62 = vld [vmem:[%s10984_s3 + $0x360] ss:$8 sps:$4 sm:$0xff]  }
 0x359   : > { %v2440_v22 = vrot.slane %v9254_v31, 1  ;;  %v2442_v10 = vrot.slane %v9244_v34, 1  ;;  %v9868_v17 = vcombine.low %v2580_v25, %v2582_v45  ;;  %v2445_v2 = vrot.slane %v9153_v18, 1  ;;  %4230 = vmatpush1.bf16.msra.mxu0 %v7254_v59  ;;  %v7263_v63 = vld [vmem:[%s10984_s3 + $0x380] ss:$8 sps:$4 sm:$0xff]  }
 0x35a   : > { %v9870_v49 = vcombine.low %v2585_v32, %v2587_v24  ;;  %v2447_v52 = vrot.slane %v9174_v1, 1  ;;  %v9874_v4 = vcombine.low %v2584_v58, %v2586_v33  ;;  %4231 = vmatprep.subr.bf16.mxu0 %v7259_v3  ;;  %v7268_v6 = vld [vmem:[%s10984_s3 + $0x394] ss:$8 sps:$4 sm:$0xff]   ;;  %v7266_v19 = vld [vmem:[%s10984_s3 + $0x390] ss:$8 sps:$4 sm:$0xff]   ;;  %v11314_v56 = vshll.u32 %v11245_v41, 16 }
 0x35b   : > { %v6121_v42 = vcombine.low %v2440_v22, %v2442_v10  ;;  %v7269_v39 = vld [vmem:[%s10984_s3 + $0x3a0] ss:$8 sps:$4 sm:$0xff]   ;;  %v7277_v13 = vld [vmem:[%s10984_s3 + $0x3c4] ss:$8 sps:$4 sm:$0xff]   ;;  %v11315_v45 = vshrl.u32 %v11246_v16, 16  ;;  %v11316_v24 = vshll.u32 %v11246_v16, 16 }
 0x35c   : > { %4159 = vmatmul.mubr.bf16.gmra.mrb[8].mxu0 %v6111_v28  ;;  %v6132_v40 = vcombine.low %v2445_v2, %v2447_v52  ;;  %v7265_v28 = vld [vmem:[%s10984_s3 + $0x384] ss:$8 sps:$4 sm:$0xff]   ;;  %v7275_v27 = vld [vmem:[%s10984_s3 + $0x3c0] ss:$8 sps:$4 sm:$0xff]   ;;  %v2464_v25 = vrot.slane %v11314_v56, 2 }
 0x35d   : > { %4168 = vmatprep.mubr.bf16.mxu0 %v6122_v5  ;;  %4232 = vmatpush1.bf16.msra.mxu0 %v7257_v62  ;;  %v7271_v5 = vld [vmem:[%s10984_s3 + $0x3a4] ss:$8 sps:$4 sm:$0xff]   ;;  %v2469_v32 = vrot.slane %v11315_v45, 1  ;;  %v2470_v59 = vrot.slane %v11316_v24, 2  ;;  %v7278_v58 = vld [vmem:[%s10984_s3 + $0x3d0] ss:$8 sps:$4 sm:$0xff]  }
 0x35e   : > { %4233 = vmatprep.subr.bf16.mxu0 %v7262_v12  ;;  %v7283_v33 = vld [vmem:[%s10984_s3 + $0x3e4] ss:$8 sps:$4 sm:$0xff]   ;;  %v7281_v10 = vld [vmem:[%s10984_s3 + $0x3e0] ss:$8 sps:$4 sm:$0xff]   ;;  %v7298_v45 = vld [vmem:[%s10984_s3 + $0x434] ss:$8 sps:$4 sm:$0xff]  }
 0x35f   : > { %v2471_v22 = vor.u32 %v2470_v59, %v2469_v32  ;;  %v11320_v12 = vld [vmem:[#allocation26_spill] sm:$0xff]  ;;  %v7296_v32 = vld [vmem:[%s10984_s3 + $0x430] ss:$8 sps:$4 sm:$0xff]  }
 0x360   : > { %v7295_v56 = vld [vmem:[%s10984_s3 + $0x424] ss:$8 sps:$4 sm:$0xff]   ;;  %v7299_v59 = vld [vmem:[%s10984_s3 + $0x440] ss:$8 sps:$4 sm:$0xff]  }
 0x361   : > { %4234 = vmatpush1.bf16.msra.mxu0 %v7260_v47  ;;  %v7301_v24 = vld [vmem:[%s10984_s3 + $0x444] ss:$8 sps:$4 sm:$0xff]  }
 0x362   : > { %4235 = vmatprep.subr.bf16.mxu0 %v7265_v28  ;;  %v11322_v28 = vshll.u32 %v11320_v12, 16 }
 0x364   : > { %4169 = vmatmul.mubr.bf16.gmra.mrb[12].mxu0 %v6121_v42 }
 0x365   : > { %4178 = vmatprep.mubr.bf16.mxu0 %v6132_v40  ;;  %4236 = vmatpush1.bf16.msra.mxu0 %v7263_v63  ;;  %v11321_v40 = vshrl.u32 %v11320_v12, 16  ;;  %v2467_v63 = vrot.slane %v11322_v28, 2  ;;  %v7323_v28 = vld [vmem:[%s10984_s3 + $0x4c0] ss:$8 sps:$4 sm:$0xff]  }
 0x366   : > { %4237 = vmatprep.subr.bf16.mxu0 %v7268_v6 }
 0x367   : > { %v2466_v47 = vrot.slane %v11321_v40, 1  ;;  %v7320_v40 = vld [vmem:[%s10984_s3 + $0x4b0] ss:$8 sps:$4 sm:$0xff]  }
 0x369   : > { %4238 = vmatpush1.bf16.msra.mxu0 %v7266_v19  ;;  %v11323_v19 = vld [vmem:[#allocation30_spill] sm:$0xff] }
 0x36a   : > { %4239 = vmatprep.subr.bf16.mxu0 %v7271_v5  ;;  %v7284_v5 = vld [vmem:[%s10984_s3 + $0x3f0] ss:$8 sps:$4 sm:$0xff]  }
 0x36c   : > { %4179 = vmatmul.mubr.bf16.gmra.mrb[16].mxu0 %v9593_v11  ;;  %v7274_v11 = vld [vmem:[%s10984_s3 + $0x3b4] ss:$8 sps:$4 sm:$0xff]  }
 0x36d   : > { %4188 = vmatprep.mubr.bf16.mxu0 %v9595_v60  ;;  %4240 = vmatpush1.bf16.msra.mxu0 %v7269_v39  ;;  %v7272_v60 = vld [vmem:[%s10984_s3 + $0x3b0] ss:$8 sps:$4 sm:$0xff]   ;;  %v7289_v39 = vld [vmem:[%s10984_s3 + $0x404] ss:$8 sps:$4 sm:$0xff]  }
 0x36e   : > { %4241 = vmatprep.subr.bf16.mxu0 %v7274_v11 }
 0x371   : > { %4242 = vmatpush1.bf16.msra.mxu0 %v7272_v60  ;;  %v2468_v60 = vor.u32 %v2467_v63, %v2466_v47  ;;  %v7325_v47 = vld [vmem:[%s10984_s3 + $0x4c4] ss:$8 sps:$4 sm:$0xff]   ;;  %v7328_v63 = vld [vmem:[%s10984_s3 + $0x4d4] ss:$8 sps:$4 sm:$0xff]  }
 0x372   : > { %4243 = vmatprep.subr.bf16.mxu0 %v7277_v13  ;;  %v7287_v13 = vld [vmem:[%s10984_s3 + $0x400] ss:$8 sps:$4 sm:$0xff]  }
 0x374   : > { %4189 = vmatmul.mubr.bf16.gmra.mrb[20].mxu0 %v9599_v53  ;;  %v7280_v53 = vld [vmem:[%s10984_s3 + $0x3d4] ss:$8 sps:$4 sm:$0xff]  }
 0x375   : > { %4198 = vmatprep.mubr.bf16.mxu0 %v9607_v57  ;;  %v11313_v57 = vshrl.u32 %v11245_v41, 16  ;;  %4244 = vmatpush1.bf16.msra.mxu0 %v7275_v27 }
 0x376   : > { %4245 = vmatprep.subr.bf16.mxu0 %v7280_v53  ;;  %v7292_v53 = vld [vmem:[%s10984_s3 + $0x414] ss:$8 sps:$4 sm:$0xff]  }
 0x377   : > { %v2463_v20 = vrot.slane %v11313_v57, 1  ;;  %v11324_v57 = vld [vmem:[#allocation33_spill] sm:$0xff] }
 0x379   : > { %v2465_v3 = vor.u32 %v2464_v25, %v2463_v20  ;;  %4246 = vmatpush1.bf16.msra.mxu0 %v7278_v58  ;;  %v7290_v20 = vld [vmem:[%s10984_s3 + $0x410] ss:$8 sps:$4 sm:$0xff]   ;;  %v7293_v25 = vld [vmem:[%s10984_s3 + $0x420] ss:$8 sps:$4 sm:$0xff]   ;;  %v7307_v58 = vld [vmem:[%s10984_s3 + $0x464] ss:$8 sps:$4 sm:$0xff]  }
 0x37a   : > { %4247 = vmatprep.subr.bf16.mxu0 %v7283_v33  ;;  %v7305_v33 = vld [vmem:[%s10984_s3 + $0x460] ss:$8 sps:$4 sm:$0xff]  }
 0x37b   : > { %v6094_v6 = vcombine.low %v2465_v3, %v2471_v22  ;;  %v11326_v3 = vld [vmem:[#allocation37_spill] sm:$0xff] }
 0x37c   : > { %4199 = vmatmul.mubr.bf16.gmra.mrb[24].mxu0 %v9614_v38  ;;  %v7286_v38 = vld [vmem:[%s10984_s3 + $0x3f4] ss:$8 sps:$4 sm:$0xff]   ;;  %v7308_v22 = vld [vmem:[%s10984_s3 + $0x470] ss:$8 sps:$4 sm:$0xff]  }
 0x37d   : > { %4208 = vmatprep.mubr.bf16.mxu0 %v9616_v9  ;;  %v11317_v9 = vld [vmem:[#allocation27_spill] sm:$0xff]  ;;  %4248 = vmatpush1.bf16.msra.mxu0 %v7281_v10 }
 0x37e   : > { %v11318_v2 = vshrl.u32 %v11317_v9, 16  ;;  %v11319_v62 = vshll.u32 %v11317_v9, 16  ;;  %4249 = vmatprep.subr.bf16.mxu0 %v7286_v38  ;;  %v7313_v10 = vld [vmem:[%s10984_s3 + $0x484] ss:$8 sps:$4 sm:$0xff]   ;;  %v7311_v38 = vld [vmem:[%s10984_s3 + $0x480] ss:$8 sps:$4 sm:$0xff]  }
 0x380   : > { %v2460_v52 = vrot.slane %v11318_v2, 1  ;;  %v2461_v42 = vrot.slane %v11319_v62, 2  ;;  %v7316_v2 = vld [vmem:[%s10984_s3 + $0x494] ss:$8 sps:$4 sm:$0xff]   ;;  %v7319_v62 = vld [vmem:[%s10984_s3 + $0x4a4] ss:$8 sps:$4 sm:$0xff]  }
 0x381   : > { %4250 = vmatpush1.bf16.msra.mxu0 %v7284_v5  ;;  %v2559_v5 = vrot.slane %v11246_v16, 2  ;;  %v2556_v16 = vrot.slane %v11317_v9, 2 }
 0x382   : > { %v2462_v11 = vor.u32 %v2461_v42, %v2460_v52  ;;  %4332 = vmatprep.subr.bf16.mxu0 %v7289_v39  ;;  %v7314_v52 = vld [vmem:[%s10984_s3 + $0x490] ss:$8 sps:$4 sm:$0xff]   ;;  %v7317_v42 = vld [vmem:[%s10984_s3 + $0x4a0] ss:$8 sps:$4 sm:$0xff]  }
 0x384   : > { %4209 = vmatmul.mubr.bf16.gmra.mrb[28].mxu0 %v11323_v19  ;;  %v6093_v27 = vcombine.low %v2462_v11, %v2468_v60  ;;  %v2557_v19 = vrot.slane %v11245_v41, 2  ;;  %v7332_v41 = vld [vmem:[%s10984_s3 + $0x4f0] ss:$8 sps:$4 sm:$0xff]   ;;  %v2558_v11 = vrot.slane %v11320_v12, 2  ;;  %v2564_v12 = vrot.slane %v9233_v43, 2 }
 0x385   : > { %4251 = vmatprep.mubr.bf16.mxu0 %v6094_v6  ;;  %v7331_v6 = vld [vmem:[%s10984_s3 + $0x4e4] ss:$8 sps:$4 sm:$0xff]   ;;  %v11328_v60 = vld [vmem:[#allocation28_spill] sm:$0xff] }
 0x386   : > { %v6096_v39 = vcombine.low %v2557_v19, %v2559_v5 }
 0x38c   : > { %4252 = vmatmul.mubr.bf16.vlgmr.msra.gmra.mrb[0].mxu0 %v6093_v27  ;;  %v11329_v27 = vld [vmem:[#allocation34_spill] sm:$0xff] }
 0x38d   : > { %4333 = vmatpush1.bf16.msra.mxu0 %v7287_v13  ;;  %4261 = vmatprep.mubr.bf16.mxu0 %v11324_v57  ;;  %v2561_v13 = vrot.slane %v11328_v60, 2  ;;  %v6095_v57 = vcombine.low %v2556_v16, %v2558_v11 }
 0x38e   : > { %4334 = vmatprep.subr.bf16.mxu0 %v7292_v53  ;;  %v2563_v53 = vrot.slane %v11329_v27, 2 }
 0x391   : > { %4335 = vmatpush1.bf16.msra.mxu0 %v7290_v20  ;;  %v6106_v20 = vcombine.low %v2561_v13, %v2563_v53 }
 0x392   : > { %4336 = vmatprep.subr.bf16.mxu0 %v7295_v56  ;;  %v2562_v56 = vrot.slane %v9177_v54, 2  ;;  %v2568_v54 = vrot.slane %v9254_v31, 2  ;;  %v7341_v31 = vld [vmem:[%s10986_s5 + $0xd8] sm:$0xff]  }
 0x394   : > { %4262 = vmatmul.mubr.bf16.gmra.mrb[4].mxu0 %v9682_v55  ;;  %v7304_v55 = vld [vmem:[%s10984_s3 + $0x454] ss:$8 sps:$4 sm:$0xff]  }
 0x395   : > { %4337 = vmatpush1.bf16.msra.mxu0 %v7293_v25  ;;  %4271 = vmatprep.mubr.bf16.mxu0 %v9692_v48  ;;  %v7302_v48 = vld [vmem:[%s10984_s3 + $0x450] ss:$8 sps:$4 sm:$0xff]   ;;  %v2565_v25 = vrot.slane %v11240_v61, 2  ;;  %v2573_v61 = vrot.slane %v9153_v18, 2  ;;  %v7337_v18 = vld [vmem:[%s10986_s5 + $0xc8] sm:$0xff]  }
 0x396   : > { %4338 = vmatprep.subr.bf16.mxu0 %v7298_v45  ;;  %v2567_v45 = vrot.slane %v9111_v35, 2  ;;  %v2570_v35 = vrot.slane %v9244_v34, 2  ;;  %v7340_v34 = vld [vmem:[%s10986_s5 + $0x90] sm:$0xff]  }
 0x399   : > { %4339 = vmatpush1.bf16.msra.mxu0 %v7296_v32  ;;  %v6116_v32 = vcombine.low %v2565_v25, %v2567_v45 }
 0x39a   : > { %4340 = vmatprep.subr.bf16.mxu0 %v7301_v24  ;;  %v2566_v24 = vrot.slane %v9226_v36, 2  ;;  %v7339_v36 = vld [vmem:[%s10986_s5 + $0xd0] sm:$0xff]  }
 0x39c   : > { %4272 = vmatmul.mubr.bf16.gmra.mrb[8].mxu0 %v9704_v29  ;;  %v7310_v29 = vld [vmem:[%s10984_s3 + $0x474] ss:$8 sps:$4 sm:$0xff]  }
 0x39d   : > { %4341 = vmatpush1.bf16.msra.mxu0 %v7299_v59  ;;  %4281 = vmatprep.mubr.bf16.mxu0 %v9718_v50  ;;  %v11325_v50 = vld [vmem:[#allocation4_spill] sm:$0xff]  ;;  %v2569_v59 = vrot.slane %v9135_v44, 2  ;;  %v7335_v44 = vld [vmem:[%s10986_s5 + $0xc0] sm:$0xff]  }
 0x39e   : > { %4342 = vmatprep.subr.bf16.mxu0 %v7304_v55  ;;  %v2571_v55 = vrot.slane %v9138_v46, 2  ;;  %v7336_v46 = vld [vmem:[%s10986_s5 + $0x80] sm:$0xff]   ;;  %6534 = vmatprep.subr.bf16.mxu1 %v7335_v44 }
 0x39f   : > { %6535 = vmatpush3.bf16.msra.mxu1 %v7336_v46 }
 0x3a0   : > { %6536 = vmatprep.subr.bf16.mxu1 %v7337_v18 }
 0x3a1   : > { %4343 = vmatpush1.bf16.msra.mxu0 %v7302_v48  ;;  %v6115_v48 = vcombine.low %v2564_v12, %v2566_v24 }
 0x3a2   : > { %4344 = vmatprep.subr.bf16.mxu0 %v7307_v58  ;;  %v2575_v58 = vrot.slane %v9174_v1, 2  ;;  %v7338_v1 = vld [vmem:[%s10986_s5 + $0x88] sm:$0xff]  }
 0x3a3   : > { %6537 = vmatpush3.bf16.msra.mxu1 %v7338_v1 }
 0x3a4   : > { %4282 = vmatmul.mubr.bf16.gmra.mrb[12].mxu0 %v11325_v50  ;;  %v6136_v43 = vcombine.low %v2573_v61, %v2575_v58  ;;  %6538 = vmatprep.subr.bf16.mxu1 %v7339_v36  ;;  %v7343_v61 = vld [vmem:[%s10986_s5 + $0xe0] sm:$0xff]  }
 0x3a5   : > { %4345 = vmatpush1.bf16.msra.mxu0 %v7305_v33  ;;  %4291 = vmatprep.mubr.bf16.mxu0 %v11326_v3  ;;  %v6125_v33 = vcombine.low %v2568_v54, %v2570_v35  ;;  %v7344_v58 = vld [vmem:[%s10986_s5 + $0xa0] sm:$0xff]  }
 0x3a6   : > { %4346 = vmatprep.subr.bf16.mxu0 %v7310_v29 }
 0x3a7   : > { %6539 = vmatpush3.bf16.msra.mxu1 %v7340_v34 }
 0x3a8   : > { %6540 = vmatprep.subr.bf16.mxu1 %v7341_v31 }
 0x3a9   : > { %4347 = vmatpush1.bf16.msra.mxu0 %v7308_v22 }
 0x3aa   : > { %4348 = vmatprep.subr.bf16.mxu0 %v7313_v10 }
 0x3ac   : > { %4292 = vmatmul.mubr.bf16.gmra.mrb[16].mxu0 %v9754_v8  ;;  %v7322_v8 = vld [vmem:[%s10984_s3 + $0x4b4] ss:$8 sps:$4 sm:$0xff]  }
 0x3ad   : > { %4349 = vmatpush1.bf16.msra.mxu0 %v7311_v38  ;;  %4301 = vmatprep.mubr.bf16.mxu0 %v9765_v7  ;;  %v11327_v7 = vld [vmem:[#allocation36_spill] sm:$0xff] }
 0x3ae   : > { %4350 = vmatprep.subr.bf16.mxu0 %v7316_v2 }
 0x3b1   : > { %4351 = vmatpush1.bf16.msra.mxu0 %v7314_v52 }
 0x3b2   : > { %4352 = vmatprep.subr.bf16.mxu0 %v7319_v62 }
 0x3b4   : > { %4302 = vmatmul.mubr.bf16.gmra.mrb[20].mxu0 %v11327_v7 }
 0x3b5   : > { %4353 = vmatpush1.bf16.msra.mxu0 %v7317_v42  ;;  %4311 = vmatprep.mubr.bf16.mxu0 %v9790_v51  ;;  %v7326_v51 = vld [vmem:[%s10984_s3 + $0x4d0] ss:$8 sps:$4 sm:$0xff]  }
 0x3b6   : > { %4354 = vmatprep.subr.bf16.mxu0 %v7322_v8 }
 0x3b9   : > { %4355 = vmatpush1.bf16.msra.mxu0 %v7320_v40 }
 0x3ba   : > { %4356 = vmatprep.subr.bf16.mxu0 %v7325_v47 }
 0x3bc   : > { %4312 = vmatmul.mubr.bf16.gmra.mrb[24].mxu0 %v9805_v15  ;;  %v7329_v15 = vld [vmem:[%s10984_s3 + $0x4e0] ss:$8 sps:$4 sm:$0xff]  }
 0x3bd   : > { %4357 = vmatpush1.bf16.msra.mxu0 %v7323_v28  ;;  %4321 = vmatprep.mubr.bf16.mxu0 %v9818_v23  ;;  %v7334_v23 = vld [vmem:[%s10984_s3 + $0x4f4] ss:$8 sps:$4 sm:$0xff]  }
 0x3be   : > { %4358 = vmatprep.subr.bf16.mxu0 %v7328_v63 }
 0x3c1   : > { %4359 = vmatpush1.bf16.msra.mxu0 %v7326_v51 }
 0x3c2   : > { %4360 = vmatprep.subr.bf16.mxu0 %v7331_v6 }
 0x3c4   : > { %4322 = vmatmul.mubr.bf16.gmra.mrb[28].mxu0 %v9820_v0  ;;  %v2560_v0 = vrot.slane %v9184_v21, 2  ;;  %v6126_v21 = vcombine.low %v2569_v59, %v2571_v55 }
 0x3c5   : > { %4361 = vmatpush1.bf16.msra.mxu0 %v7329_v15  ;;  %4364 = vmatprep.mubr.bf16.mxu0 %v6096_v39 }
 0x3c6   : > { %4362 = vmatprep.subr.bf16.mxu0 %v7334_v23  ;;  %v6105_v9 = vcombine.low %v2560_v0, %v2562_v56 }
 0x3c9   : > { %4363 = vmatpush1.bf16.msra.mxu0 %v7332_v41 }
 0x3cc   : > { %4365 = vmatmul.mubr.bf16.vlgmr.msra.gmra.mrb[0].mxu0 %v6095_v57 }
 0x3cd   : > { %4374 = vmatprep.mubr.bf16.mxu0 %v6106_v20 }
 0x3d4   : > { %4375 = vmatmul.mubr.bf16.gmra.mrb[4].mxu0 %v6105_v9 }
 0x3d5   : > { %4384 = vmatprep.mubr.bf16.mxu0 %v6116_v32 }
 0x3dc   : > { %4385 = vmatmul.mubr.bf16.gmra.mrb[8].mxu0 %v6115_v48 }
 0x3dd   : > { %4394 = vmatprep.mubr.bf16.mxu0 %v6126_v21 }
 0x3e4   : > { %4395 = vmatmul.mubr.bf16.gmra.mrb[12].mxu0 %v6125_v33 }
 0x3e5   : > { %4404 = vmatprep.mubr.bf16.mxu0 %v6136_v43 }
 0x3ec   : > { %4405 = vmatmul.mubr.bf16.gmra.mrb[16].mxu0 %v9845_v30  ;;  %v7342_v30 = vld [vmem:[%s10986_s5 + $0x98] sm:$0xff]  }
 0x3ed   : > { %4414 = vmatprep.mubr.bf16.mxu0 %v9847_v14  ;;  %6541 = vmatpush3.bf16.msra.mxu1 %v7342_v30  ;;  %v2908_v14 = vld [vmem:[%s10985_s4] sm:$0x3] }
 0x3ee   : > { %6542 = vmatprep.subr.bf16.mxu1 %v7343_v61 }
 0x3f1   : > { %6543 = vmatpush3.bf16.msra.mxu1 %v7344_v58 }
 0x3f4   : > { %4415 = vmatmul.mubr.bf16.gmra.mrb[20].mxu0 %v9851_v37  ;;  %v11330_v37 = vld [vmem:[#allocation17_spill] sm:$0xff] }
 0x3f5   : > { %4424 = vmatprep.mubr.bf16.mxu0 %v9859_v26  ;;  %v11331_v26 = vsub.s32 0, %v11330_v37 }
 0x3fc   : > { %4425 = vmatmul.mubr.bf16.gmra.mrb[24].mxu0 %v9868_v17  ;;  %v10120_v17 = vrot.slane %v2908_v14, %v11331_v26 }
 0x3fd   : > { %4434 = vmatprep.mubr.bf16.mxu0 %v9870_v49  ;;  %v11332_v49 = vsub.s32 1, %v11330_v37 }
 0x404   : > { %4435 = vmatmul.mubr.bf16.gmra.mrb[28].mxu0 %v9874_v4  ;;  %v10124_v4 = vrot.slane %v2908_v14, %v11332_v49 }
 0x49f   : > { %v4366_v29 = vpop.f32.mrb[0].mxu0 }
 0x4a0   : > { %v6617_v50 = vadd.f32 %v4366_v29, %v10120_v17  ;;  %v4368_v3 = vpop.f32.mrb[1].mxu0 }
 0x4a1   : > { %v6618_v22 = vadd.f32 %v4368_v3, %v10124_v4  ;;  %v4370_v10 = vpop.f32.mrb[2].mxu0  ;;  %v7345_v3 = vld [vmem:[%s10986_s5 + $0xe8] sm:$0xff]  }
 0x4a2   : > { %v4445_v38 = vmax.f32 %v6617_v50, 0.0  ;;  %v6619_v2 = vadd.f32 %v4370_v10, %v10120_v17  ;;  %v4372_v52 = vpop.f32.mrb[3].mxu0  ;;  %6544 = vmatprep.subr.bf16.mxu1 %v7345_v3 }
 0x4a3   : > { %v6620_v62 = vadd.f32 %v4372_v52, %v10124_v4  ;;  %v4446_v8 = vmax.f32 %v6618_v22, 0.0  ;;  %v7346_v22 = vld [vmem:[%s10986_s5 + $0xa8] sm:$0xff]  }
 0x4a4   : > { %v4509_v42 = vrot.slane %v4445_v38, 1  ;;  %v4447_v7 = vmax.f32 %v6619_v2, 0.0  ;;  %6545 = vmatpush3.bf16.msra.mxu1 %v7346_v22 }
 0x4a5   : > { %v4448_v40 = vmax.f32 %v6620_v62, 0.0  ;;  %v4510_v6 = vrot.slane %v4446_v8, 1 }
 0x4a6   : > { %v4511_v47 = vrot.slane %v4447_v7, 1  ;;  %v10130_v51 = vmax.f32 %v4445_v38, %v4509_v42 }
 0x4a7   : > { %v4512_v28 = vrot.slane %v4448_v40, 1  ;;  %v4376_v63 = vpop.f32.mrb[4].mxu0  ;;  %v10143_v27 = vmax.f32 %v4446_v8, %v4510_v6 }
 0x4a8   : > { %v10132_v19 = vmax.f32 %v4447_v7, %v4511_v47  ;;  %v4378_v5 = vpop.f32.mrb[5].mxu0  ;;  %v6621_v41 = vadd.f32 %v4376_v63, %v10120_v17 }
 0x4a9   : > { %v6622_v15 = vadd.f32 %v4378_v5, %v10124_v4  ;;  %v4380_v23 = vpop.f32.mrb[6].mxu0  ;;  %v10135_v39 = vmax.f32 %v4448_v40, %v4512_v28 }
 0x4aa   : > { %v6623_v16 = vadd.f32 %v4380_v23, %v10120_v17  ;;  %v10139_v11 = vpop.f32.mrb[7].mxu0  ;;  %v6951_v60 = vpack.i.bf16 %v10132_v19, %v10130_v51  ;;  %v4449_v20 = vmax.f32 %v6621_v41, 0.0 }
 0x4ab   : > { %v4450_v13 = vmax.f32 %v6622_v15, 0.0  ;;  %v6956_v56 = vpack.i.bf16 %v10135_v39, %v10143_v27 }
 0x4ac   : > { %v4451_v53 = vmax.f32 %v6623_v16, 0.0  ;;  %6952 = vrot.lane.b32.xlu0 %v6951_v60, %s7421_s19  ;;  %v4513_v59 = vrot.slane %v4449_v20, 1 }
 0x4ad   : > { %v4514_v57 = vrot.slane %v4450_v13, 1 }
 0x4ae   : > { %v4515_v0 = vrot.slane %v4451_v53, 1  ;;  %v10164_v33 = vmax.f32 %v4449_v20, %v4513_v59 }
 0x4af   : > { %v10148_v25 = vmax.f32 %v4450_v13, %v4514_v57  ;;  %v4386_v45 = vpop.f32.mrb[8].mxu0 }
 0x4b0   : > { %v10150_v9 = vmax.f32 %v4451_v53, %v4515_v0  ;;  %v6625_v32 = vadd.f32 %v4386_v45, %v10120_v17  ;;  %v4388_v12 = vpop.f32.mrb[9].mxu0  ;;  %6957 = vrot.lane.b32.xlu0 %v6956_v56, %s7421_s19  ;;  %v6624_v0 = vadd.f32 %v10139_v11, %v10124_v4 }
 0x4b1   : > { %v4390_v24 = vpop.f32.mrb[10].mxu0  ;;  %v6626_v15 = vadd.f32 %v4388_v12, %v10124_v4 }
 0x4b2   : > { %v4453_v55 = vmax.f32 %v6625_v32, 0.0  ;;  %v4392_v48 = vpop.f32.mrb[11].mxu0  ;;  %v6961_v21 = vpack.i.bf16 %v10150_v9, %v10148_v25  ;;  %v6627_v54 = vadd.f32 %v4390_v24, %v10120_v17  ;;  %v4452_v58 = vmax.f32 %v6624_v0, 0.0 }
 0x4b3   : > { %v6628_v23 = vadd.f32 %v4392_v48, %v10124_v4  ;;  %v4454_v45 = vmax.f32 %v6626_v15, 0.0 }
 0x4b4   : > { %v4517_v35 = vrot.slane %v4453_v55, 1  ;;  %6962 = vrot.lane.b32.xlu1 %v6961_v21, %s7421_s19  ;;  %v4455_v44 = vmax.f32 %v6627_v54, 0.0 }
 0x4b5   : > { %v4456_v32 = vmax.f32 %v6628_v23, 0.0 }
 0x4b6   : > { %v10166_v43 = vmax.f32 %v4453_v55, %v4517_v35  ;;  %v4519_v14 = vrot.slane %v4455_v44, 1 }
 0x4b7   : > { %v4396_v46 = vpop.f32.mrb[12].mxu0 }
 0x4b8   : > { %v6629_v18 = vadd.f32 %v4396_v46, %v10120_v17  ;;  %v4398_v1 = vpop.f32.mrb[13].mxu0  ;;  %v6966_v36 = vpack.i.bf16 %v10166_v43, %v10164_v33  ;;  %v10182_v10 = vmax.f32 %v4455_v44, %v4519_v14  ;;  %v4520_v14 = vrot.slane %v4456_v32, 1 }
 0x4b9   : > { %v6630_v34 = vadd.f32 %v4398_v1, %v10124_v4  ;;  %v10172_v31 = vpop.f32.mrb[14].mxu0  ;;  %v4518_v1 = vrot.slane %v4454_v45, 1 }
 0x4ba   : > { %v4402_v30 = vpop.f32.mrb[15].mxu0  ;;  %6967 = vrot.lane.b32.xlu0 %v6966_v36, %s7421_s19  ;;  %v4457_v37 = vmax.f32 %v6629_v18, 0.0 }
 0x4bb   : > { %v4458_v26 = vmax.f32 %v6630_v34, 0.0  ;;  %v6632_v49 = vadd.f32 %v4402_v30, %v10124_v4 }
 0x4bc   : > { %v4521_v38 = vrot.slane %v4457_v37, 1 }
 0x4bd   : > { %v4522_v29 = vrot.slane %v4458_v26, 1  ;;  %v4460_v50 = vmax.f32 %v6632_v49, 0.0 }
 0x4be   : > { %v10195_v41 = vmax.f32 %v4457_v37, %v4521_v38  ;;  %v10223_v38 = vmax.f32 %v4454_v45, %v4518_v1 }
 0x4bf   : > { %v10184_v2 = vmax.f32 %v4458_v26, %v4522_v29  ;;  %v4524_v52 = vrot.slane %v4460_v50, 1  ;;  %v4406_v62 = vpop.f32.mrb[16].mxu0 }
 0x4c0   : > { %v6633_v42 = vadd.f32 %v4406_v62, %v10120_v17  ;;  %v4408_v8 = vpop.f32.mrb[17].mxu0 }
 0x4c1   : > { %v10187_v7 = vmax.f32 %v4460_v50, %v4524_v52  ;;  %v6634_v40 = vadd.f32 %v4408_v8, %v10124_v4  ;;  %v4410_v47 = vpop.f32.mrb[18].mxu0  ;;  %v6971_v28 = vpack.i.bf16 %v10184_v2, %v10182_v10  ;;  %v4516_v50 = vrot.slane %v4452_v58, 1 }
 0x4c2   : > { %v4461_v63 = vmax.f32 %v6633_v42, 0.0  ;;  %v6635_v6 = vadd.f32 %v4410_v47, %v10120_v17  ;;  %v4412_v5 = vpop.f32.mrb[19].mxu0 }
 0x4c3   : > { %v6636_v16 = vadd.f32 %v4412_v5, %v10124_v4  ;;  %6972 = vrot.lane.b32.xlu1 %v6971_v28, %s7421_s19  ;;  %v4462_v13 = vmax.f32 %v6634_v40, 0.0  ;;  %v6976_v20 = vpack.i.bf16 %v10187_v7, %v10195_v41  ;;  %v10227_v40 = vmax.f32 %v4456_v32, %v4520_v14 }
 0x4c4   : > { %v4525_v60 = vrot.slane %v4461_v63, 1  ;;  %v4463_v53 = vmax.f32 %v6635_v6, 0.0 }
 0x4c5   : > { %v4464_v57 = vmax.f32 %v6636_v16, 0.0  ;;  %v4526_v55 = vrot.slane %v4462_v13, 1 }
 0x4c6   : > { %v4527_v56 = vrot.slane %v4463_v53, 1  ;;  %v10204_v59 = vmax.f32 %v4461_v63, %v4525_v60 }
 0x4c7   : > { %v4528_v12 = vrot.slane %v4464_v57, 1  ;;  %v4416_v24 = vpop.f32.mrb[20].mxu0  ;;  %6977 = vrot.lane.b32.xlu1 %v6976_v20, %s7421_s19  ;;  %v10216_v37 = vmax.f32 %v4462_v13, %v4526_v55 }
 0x4c8   : > { %v10206_v48 = vmax.f32 %v4463_v53, %v4527_v56  ;;  %v6637_v21 = vadd.f32 %v4416_v24, %v10120_v17  ;;  %v4418_v54 = vpop.f32.mrb[21].mxu0  ;;  %v10239_v53 = vmax.f32 %v4452_v58, %v4516_v50  ;;  %v6631_v56 = vadd.f32 %v10172_v31, %v10120_v17  ;;  %v7349_v50 = vld [vmem:[%s10986_s5 + $0xb0] sm:$0xff]  }
 0x4c9   : > { %v6638_v35 = vadd.f32 %v4418_v54, %v10124_v4  ;;  %v4420_v61 = vpop.f32.mrb[22].mxu0  ;;  %v10210_v11 = vmax.f32 %v4464_v57, %v4528_v12 }
 0x4ca   : > { %v4465_v44 = vmax.f32 %v6637_v21, 0.0  ;;  %v4422_v46 = vpop.f32.mrb[23].mxu0  ;;  %v6981_v18 = vpack.i.bf16 %v10206_v48, %v10204_v59  ;;  %v6639_v34 = vadd.f32 %v4420_v61, %v10120_v17  ;;  %v4459_v58 = vmax.f32 %v6631_v56, 0.0 }
 0x4cb   : > { %v4466_v36 = vmax.f32 %v6638_v35, 0.0  ;;  %v6640_v30 = vadd.f32 %v4422_v46, %v10124_v4  ;;  %v6986_v22 = vpack.i.bf16 %v10210_v11, %v10216_v37 }
 0x4cc   : > { %v4529_v26 = vrot.slane %v4465_v44, 1  ;;  %6982 = vrot.lane.b32.xlu1 %v6981_v18, %s7421_s19  ;;  %v4467_v62 = vmax.f32 %v6639_v34, 0.0 }
 0x4cd   : > { %v4530_v49 = vrot.slane %v4466_v36, 1  ;;  %v4468_v29 = vmax.f32 %v6640_v30, 0.0 }
 0x4ce   : > { %v10219_v3 = vmax.f32 %v4465_v44, %v4529_v26  ;;  %v4531_v57 = vrot.slane %v4467_v62, 1 }
 0x4cf   : > { %v10225_v52 = vmax.f32 %v4466_v36, %v4530_v49  ;;  %v4532_v42 = vrot.slane %v4468_v29, 1  ;;  %v4426_v8 = vpop.f32.mrb[24].mxu0  ;;  %v7347_v49 = vld [vmem:[%s10986_s5 + $0xf0] sm:$0xff]  }
 0x4d0   : > { %v6641_v47 = vadd.f32 %v4426_v8, %v10120_v17  ;;  %v4428_v28 = vpop.f32.mrb[25].mxu0  ;;  %6987 = vrot.lane.b32.xlu1 %v6986_v22, %s7421_s19  ;;  %v6991_v13 = vpack.i.bf16 %v10219_v3, %v10227_v40  ;;  %v10248_v21 = vmax.f32 %v4467_v62, %v4531_v57  ;;  %v4523_v8 = vrot.slane %v4459_v58, 1  ;;  %6546 = vmatprep.subr.bf16.mxu1 %v7347_v49  ;;  %v7365_v49 = vld [vmem:[%s10986_s5 + $0x78] sm:$0xff]  }
 0x4d1   : > { %v10231_v63 = vmax.f32 %v4468_v29, %v4532_v42  ;;  %v6642_v6 = vadd.f32 %v4428_v28, %v10124_v4  ;;  %v4430_v5 = vpop.f32.mrb[26].mxu0  ;;  %v6996_v15 = vpack.i.bf16 %v10225_v52, %v10223_v38  ;;  %v7348_v29 = vld [vmem:[%s10986_s5 + $0x40] sm:$0xff]   ;;  %6547 = vmatpush3.bf16.msra.mxu1 %v7349_v50  ;;  %v7366_v50 = vld [vmem:[%s10986_s5 + $0x38] sm:$0xff]  }
 0x4d2   : > { %v4469_v23 = vmax.f32 %v6641_v47, 0.0  ;;  %v6643_v16 = vadd.f32 %v4430_v5, %v10120_v17  ;;  %v4432_v60 = vpop.f32.mrb[27].mxu0  ;;  %6512 = vmatprep.subr.bf16.mxu0 %v7348_v29  ;;  %v7367_v29 = vld [vmem:[%s10986_s5 + $0x140] sm:$0xff]  }
 0x4d3   : > { %v4470_v20 = vmax.f32 %v6642_v6, 0.0  ;;  %v6644_v0 = vadd.f32 %v4432_v60, %v10124_v4  ;;  %6997 = vrot.lane.b32.xlu0 %v6996_v15, %s7421_s19  ;;  %v7001_v24 = vpack.i.bf16 %v10231_v63, %v10239_v53  ;;  %v10280_v60 = vmax.f32 %v4459_v58, %v4523_v8  ;;  %v7356_v58 = vld [vmem:[%s10986_s5 + $0x18] sm:$0xff]  }
 0x4d4   : > { %6992 = vrot.lane.b32.xlu1 %v6991_v13, %s7421_s19  ;;  %v4533_v45 = vrot.slane %v4469_v23, 1  ;;  %v4471_v55 = vmax.f32 %v6643_v16, 0.0 }
 0x4d5   : > { %v4534_v32 = vrot.slane %v4470_v20, 1  ;;  %v4472_v12 = vmax.f32 %v6644_v0, 0.0 }
 0x4d6   : > { %v10254_v46 = vmax.f32 %v4469_v23, %v4533_v45  ;;  %v4535_v30 = vrot.slane %v4471_v55, 1  ;;  %v7350_v45 = vld [vmem:[%s10986_s5] sm:$0xff]  }
 0x4d7   : > { %v10250_v54 = vmax.f32 %v4470_v20, %v4534_v32  ;;  %v4536_v35 = vrot.slane %v4472_v12, 1  ;;  %v4436_v61 = vpop.f32.mrb[28].mxu0  ;;  %7002 = vrot.lane.b32.xlu0 %v7001_v24, %s7421_s19  ;;  %v7351_v32 = vld [vmem:[%s10986_s5 + $0x48] sm:$0xff]   ;;  %6513 = vmatpush3.bf16.msra.mxu0 %v7350_v45 }
 0x4d8   : > { %v6645_v31 = vadd.f32 %v4436_v61, %v10120_v17  ;;  %v4438_v44 = vpop.f32.mrb[29].mxu0  ;;  %v10276_v15 = vmax.f32 %v4471_v55, %v4535_v30  ;;  %6514 = vmatprep.subr.bf16.mxu0 %v7351_v32  ;;  %v7352_v24 = vld [vmem:[%s10986_s5 + $0x8] sm:$0xff]   ;;  %v7353_v55 = vld [vmem:[%s10986_s5 + $0x50] sm:$0xff]   ;;  %v7355_v61 = vld [vmem:[%s10986_s5 + $0x58] sm:$0xff]  }
 0x4d9   : > { %v10256_v18 = vmax.f32 %v4472_v12, %v4536_v35  ;;  %v6646_v1 = vadd.f32 %v4438_v44, %v10124_v4  ;;  %v4440_v36 = vpop.f32.mrb[30].mxu0  ;;  %v7006_v34 = vpack.i.bf16 %v10250_v54, %v10248_v21  ;;  %v7354_v35 = vld [vmem:[%s10986_s5 + $0x10] sm:$0xff]   ;;  %v7358_v44 = vld [vmem:[%s10986_s5 + $0x60] sm:$0xff]   ;;  %v7362_v30 = vld [vmem:[%s10986_s5 + $0x28] sm:$0xff]  }
 0x4da   : > { %v6647_v14 = vadd.f32 %v4440_v36, %v10120_v17  ;;  %v4442_v26 = vpop.f32.mrb[31].mxu0  ;;  %v4473_v22 = vmax.f32 %v6645_v31, 0.0  ;;  %v7357_v31 = vld [vmem:[%s10986_s5 + $0xf8] sm:$0xff]   ;;  %v7360_v36 = vld [vmem:[%s10986_s5 + $0x20] sm:$0xff]  }
 0x4db   : > { %v4474_v62 = vmax.f32 %v6646_v1, 0.0  ;;  %v6648_v42 = vadd.f32 %v4442_v26, %v10124_v4  ;;  %7007 = vrot.lane.b32.xlu1 %v7006_v34, %s7421_s19  ;;  %v7011_v17 = vpack.i.bf16 %v10256_v18, %v10254_v46  ;;  %6515 = vmatpush3.bf16.msra.mxu0 %v7352_v24  ;;  %v7359_v1 = vld [vmem:[%s10986_s5 + $0xb8] sm:$0xff]   ;;  %v7361_v34 = vld [vmem:[%s10986_s5 + $0x68] sm:$0xff]   ;;  %v7364_v26 = vld [vmem:[%s10986_s5 + $0x30] sm:$0xff]  }
 0x4dc   : > { %v4475_v47 = vmax.f32 %v6647_v14, 0.0  ;;  %v4537_v23 = vrot.slane %v4473_v22, 1  ;;  %6516 = vmatprep.subr.bf16.mxu0 %v7353_v55  ;;  %6548 = vmatprep.subr.bf16.mxu1 %v7357_v31  ;;  %v7363_v14 = vld [vmem:[%s10986_s5 + $0x70] sm:$0xff]  }
 0x4dd   : > { %v4538_v28 = vrot.slane %v4474_v62, 1  ;;  %v4476_v6 = vmax.f32 %v6648_v42, 0.0  ;;  %7012 = vrot.lane.b32.xlu0 %v7011_v17, %s7421_s19  ;;  %6549 = vmatpush3.bf16.msra.mxu1 %v7359_v1 }
 0x4de   : > { %v4539_v5 = vrot.slane %v4475_v47, 1  ;;  %v10290_v56 = vmax.f32 %v4473_v22, %v4537_v23  ;;  %6556 = vmatprep.subr.bf16.mxu1 %v7367_v29 }
 0x4df   : > { %v10278_v16 = vmax.f32 %v4474_v62, %v4538_v28  ;;  %v4540_v4 = vrot.slane %v4476_v6, 1  ;;  %6517 = vmatpush3.bf16.msra.mxu0 %v7354_v35 }
 0x4e0   : > { %v10282_v13 = vmax.f32 %v4475_v47, %v4539_v5  ;;  %6518 = vmatprep.subr.bf16.mxu0 %v7355_v61 }
 0x4e1   : > { %v10284_v57 = vmax.f32 %v4476_v6, %v4540_v4  ;;  %v7016_v20 = vpack.i.bf16 %v10278_v16, %v10276_v15 }
 0x4e2   : > { %v7026_v0 = vpack.i.bf16 %v10282_v13, %v10280_v60 }
 0x4e3   : > { %7017 = vrot.lane.b32.xlu0 %v7016_v20, %s7421_s19  ;;  %v7021_v12 = vpack.i.bf16 %v10284_v57, %v10290_v56  ;;  %6519 = vmatpush3.bf16.msra.mxu0 %v7356_v58 }
 0x4e4   : > { %7027 = vrot.lane.b32.xlu1 %v7026_v0, %s7421_s19  ;;  %6520 = vmatprep.subr.bf16.mxu0 %v7358_v44 }
 0x4e7   : > { %7022 = vrot.lane.b32.xlu0 %v7021_v12, %s7421_s19  ;;  %6521 = vmatpush3.bf16.msra.mxu0 %v7360_v36 }
 0x4e8   : > { %6522 = vmatprep.subr.bf16.mxu0 %v7361_v34 }
 0x4eb   : > { %6523 = vmatpush3.bf16.msra.mxu0 %v7362_v30 }
 0x4ec   : > { %6524 = vmatprep.subr.bf16.mxu0 %v7363_v14 }
 0x4ef   : > { %6525 = vmatpush3.bf16.msra.mxu0 %v7364_v26 }
 0x4f0   : > { %6526 = vmatprep.subr.bf16.mxu0 %v7365_v49 }
 0x4f3   : > { %6527 = vmatpush3.bf16.msra.mxu0 %v7366_v50 }
 0x51e   : > { %v6953_v22 = vpop.permute.xlu0 %6952 }
 0x51f   : > { %v6955_v42 = vunpack.i.h.bf16 %v6953_v22  ;;  %v6954_v17 = vunpack.i.l.bf16 %v6953_v22 }
 0x522   : > { %v6958_v62 = vpop.permute.xlu0 %6957 }
 0x523   : > { %v6960_v8 = vunpack.i.h.bf16 %v6958_v62  ;;  %v6959_v47 = vunpack.i.l.bf16 %v6958_v62 }
 0x525   : > { %v4701_v28 = vsel %vm1947_vm7, %v6954_v17, %v6959_v47  ;;  %v4702_v6 = vsel %vm1947_vm7, %v6955_v42, %v6960_v8  ;;  %v4752_v24 = vmax.f32 %v10135_v39, %v6960_v8  ;;  %v4750_v55 = vmax.f32 %v10143_v27, %v6959_v47 }
 0x526   : > { %v4749_v5 = vmax.f32 %v10130_v51, %v4701_v28  ;;  %v4751_v23 = vmax.f32 %v10132_v19, %v4702_v6  ;;  %v10359_v32 = vpop.permute.xlu1 %6962 }
 0x527   : > { %v6964_v19 = vunpack.i.l.bf16 %v10359_v32  ;;  %v4782_v31 = vsel %vm1947_vm7, %v4752_v24, %v10135_v39  ;;  %v4781_v44 = vsel %vm1947_vm7, %v4750_v55, %v10143_v27 }
 0x528   : > { %v4797_v4 = vpack.c.bf16 %v4749_v5, %v4749_v5  ;;  %v4799_v20 = vpack.c.bf16 %v4751_v23, %v4751_v23  ;;  %v4800_v34 = vpack.c.bf16 %v4782_v31, %v4782_v31  ;;  %v4798_v30 = vpack.c.bf16 %v4781_v44, %v4781_v44 }
 0x529   : > { %v4754_v14 = vmax.f32 %v10148_v25, %v6964_v19 }
 0x52a   : > { %v10355_v0 = vunpack.c.l.b16 %v4797_v4  ;;  %v10357_v45 = vunpack.c.l.b16 %v4799_v20  ;;  %v10381_v50 = vunpack.c.l.b16 %v4800_v34  ;;  %v10383_v22 = vunpack.c.l.b16 %v4798_v30 }
 0x52b   : > { %v4783_v39 = vsel %vm1947_vm7, %v4754_v14, %v10148_v25 }
 0x52c   : > { %v10361_v12 = vpop.permute.xlu0 %6967  ;;  %v5635_v35 = vrot.slane %v10355_v0, 6  ;;  %v5636_v51 = vrot.slane %v10357_v45, 5  ;;  %v4802_v8 = vpack.c.bf16 %v4783_v39, %v4783_v39  ;;  %v4947_v47 = vrot.slane %v10381_v50, 7 }
 0x52d   : > { %v6969_v61 = vunpack.i.l.bf16 %v10361_v12  ;;  %v5186_v28 = vrot.slane %v10381_v50, 1  ;;  %v4926_v6 = vrot.slane %v10357_v45, 7  ;;  %v5185_v25 = vrot.slane %v10383_v22, 2 }
 0x52e   : > { %v5637_v58 = vsel %vm4927_vm8, %v5636_v51, %v5635_v35  ;;  %v5171_v5 = vrot.slane %v10355_v0, 2  ;;  %v5172_v23 = vrot.slane %v10357_v45, 1  ;;  %v5418_v35 = vrot.slane %v10381_v50, 3 }
 0x52f   : > { %v4703_v1 = vsel %vm1947_vm7, %v6969_v61, %v6964_v19  ;;  %v5417_v51 = vrot.slane %v10383_v22, 4  ;;  %v6965_v19 = vunpack.i.h.bf16 %v10359_v32  ;;  %v10407_v61 = vunpack.c.l.b16 %v4802_v8 }
 0x530   : > { %v4753_v36 = vmax.f32 %v10164_v33, %v4703_v1  ;;  %v4948_v31 = vsel %vm4927_vm8, %v4947_v47, %v10383_v22  ;;  %v6970_v44 = vunpack.i.h.bf16 %v10361_v12  ;;  %v5187_v1 = vsel %vm4927_vm8, %v5186_v28, %v5185_v25 }
 0x531   : > { %v4949_v12 = vrot.slane %v10407_v61, 6  ;;  %v5420_v8 = vrot.slane %v10407_v61, 2  ;;  %v10426_v47 = vsel %vm4930_vm9, %v10407_v61, %v5187_v1 }
 0x532   : > { %v4801_v26 = vpack.c.bf16 %v4753_v36, %v4753_v36  ;;  %v5173_v36 = vsel %vm4927_vm8, %v5172_v23, %v5171_v5 }
 0x534   : > { %v10379_v29 = vunpack.c.l.b16 %v4801_v26 }
 0x535   : > { %v10377_v49 = vpop.permute.xlu1 %6972 }
 0x536   : > { %v5638_v27 = vrot.slane %v10379_v29, 4  ;;  %v6975_v33 = vunpack.i.h.bf16 %v10377_v49  ;;  %v6974_v1 = vunpack.i.l.bf16 %v10377_v49  ;;  %v10445_v49 = vsel %vm4930_vm9, %v4949_v12, %v4948_v31 }
 0x538   : > { %v10393_v17 = vsel %vm4930_vm9, %v5638_v27, %v5637_v58  ;;  %v4762_v4 = vmax.f32 %v10184_v2, %v6975_v33  ;;  %v4928_v58 = vsel %vm4927_vm8, %v4926_v6, %v10355_v0 }
 0x539   : > { %v10388_v62 = vpop.permute.xlu1 %6977 }
 0x53a   : > { %v6979_v42 = vunpack.i.l.bf16 %v10388_v62  ;;  %v6980_v20 = vunpack.i.h.bf16 %v10388_v62  ;;  %v4787_v34 = vsel %vm1947_vm7, %v4762_v4, %v10184_v2  ;;  %v5419_v2 = vsel %vm4927_vm8, %v5418_v35, %v5417_v51 }
 0x53b   : > { %v4810_v28 = vpack.c.bf16 %v4787_v34, %v4787_v34 }
 0x53c   : > { %v4707_v55 = vsel %vm1947_vm7, %v6979_v42, %v6975_v33  ;;  %v4764_v30 = vmax.f32 %v10187_v7, %v6980_v20 }
 0x53d   : > { %v4761_v14 = vmax.f32 %v10195_v41, %v4707_v55 }
 0x53e   : > { %v6983_v24 = vpop.permute.xlu1 %6982  ;;  %v4788_v35 = vsel %vm1947_vm7, %v4764_v30, %v10187_v7 }
 0x53f   : > { %v6985_v39 = vunpack.i.h.bf16 %v6983_v24  ;;  %v6984_v27 = vunpack.i.l.bf16 %v6983_v24  ;;  %v4809_v51 = vpack.c.bf16 %v4761_v14, %v4761_v14  ;;  %v10454_v14 = vsel %vm4930_vm9, %v10379_v29, %v5173_v36 }
 0x542   : > { %v6988_v26 = vpop.permute.xlu1 %6987 }
 0x543   : > { %v6990_v33 = vunpack.i.h.bf16 %v6988_v26  ;;  %v6989_v42 = vunpack.i.l.bf16 %v6988_v26 }
 0x545   : > { %v4768_v6 = vmax.f32 %v10210_v11, %v6990_v33  ;;  %v4709_v41 = vsel %vm1947_vm7, %v6984_v27, %v6989_v42  ;;  %v4710_v25 = vsel %vm1947_vm7, %v6985_v39, %v6990_v33  ;;  %v6998_v5 = vpop.permute.xlu0 %6997  ;;  %v4766_v4 = vmax.f32 %v10216_v37, %v6989_v42 }
 0x546   : > { %v4765_v23 = vmax.f32 %v10204_v59, %v4709_v41  ;;  %v4767_v24 = vmax.f32 %v10206_v48, %v4710_v25  ;;  %v7000_v55 = vunpack.i.h.bf16 %v6998_v5  ;;  %v6993_v26 = vpop.permute.xlu1 %6992  ;;  %v4929_v39 = vrot.slane %v10379_v29, 6 }
 0x547   : > { %v4790_v34 = vsel %vm1947_vm7, %v4768_v6, %v10210_v11  ;;  %v6999_v59 = vunpack.i.l.bf16 %v6998_v5  ;;  %v10441_v41 = vunpack.c.l.b16 %v4810_v28  ;;  %v4812_v25 = vpack.c.bf16 %v4788_v35, %v4788_v35 }
 0x548   : > { %v4813_v27 = vpack.c.bf16 %v4765_v23, %v4765_v23  ;;  %v4815_v33 = vpack.c.bf16 %v4767_v24, %v4767_v24  ;;  %v4816_v42 = vpack.c.bf16 %v4790_v34, %v4790_v34  ;;  %v4770_v48 = vmax.f32 %v10225_v52, %v7000_v55 }
 0x549   : > { %v4789_v7 = vsel %vm1947_vm7, %v4766_v4, %v10216_v37  ;;  %v6995_v30 = vunpack.i.h.bf16 %v6993_v26  ;;  %v10450_v11 = vsel %vm4930_vm9, %v5420_v8, %v5419_v2  ;;  %v10456_v28 = vunpack.c.l.b16 %v4809_v51 }
 0x54a   : > { %v10458_v6 = vunpack.c.l.b16 %v4813_v27  ;;  %v10460_v5 = vunpack.c.l.b16 %v4815_v33  ;;  %v10463_v31 = vsel %vm4930_vm9, %v4929_v39, %v4928_v58  ;;  %v4705_v12 = vsel %vm1947_vm7, %v6970_v44, %v6999_v59 }
 0x54b   : > { %v4758_v37 = vmax.f32 %v10223_v38, %v6999_v59  ;;  %v6994_v23 = vunpack.i.l.bf16 %v6993_v26  ;;  %v10467_v8 = vunpack.c.l.b16 %v4816_v42  ;;  %v4814_v2 = vpack.c.bf16 %v4789_v7, %v4789_v7  ;;  %v7003_v59 = vpop.permute.xlu0 %7002 }
 0x54c   : > { %11333 = vst [vmem:[#allocation3_spill] sm:$0xff] %v10458_v6  ;;  %11334 = vst [vmem:[#allocation10_spill] sm:$0xff] %v10460_v5  ;;  %v4791_v36 = vsel %vm1947_vm7, %v4770_v48, %v10225_v52  ;;  %v10472_v24 = vunpack.c.l.b16 %v4812_v25  ;;  %v4711_v35 = vsel %vm1947_vm7, %v6995_v30, %v7000_v55  ;;  %v5663_v34 = vrot.slane %v10458_v6, 6 }
 0x54d   : > { %v5664_v26 = vrot.slane %v10460_v5, 5  ;;  %v4757_v39 = vmax.f32 %v10166_v43, %v4705_v12  ;;  %v4818_v27 = vpack.c.bf16 %v4791_v36, %v4791_v36  ;;  %v4785_v33 = vsel %vm1947_vm7, %v4758_v37, %v10223_v38 }
 0x54e   : > { %v4706_v55 = vsel %vm1947_vm7, %v6974_v1, %v6994_v23  ;;  %v4975_v42 = vrot.slane %v10467_v8, 7  ;;  %v10486_v48 = vunpack.c.l.b16 %v4814_v2  ;;  %v4769_v7 = vmax.f32 %v10219_v3, %v4711_v35  ;;  %v7008_v2 = vpop.permute.xlu1 %7007 }
 0x54f   : > { %v10489_v25 = vsel %vm4927_vm8, %v5664_v26, %v5663_v34  ;;  %v4961_v30 = vrot.slane %v10460_v5, 7  ;;  %v4805_v37 = vpack.c.bf16 %v4757_v39, %v4757_v39  ;;  %v4806_v1 = vpack.c.bf16 %v4785_v33, %v4785_v33  ;;  %v7013_v39 = vpop.permute.xlu0 %7012 }
 0x550   : > { %v4760_v36 = vmax.f32 %v10227_v40, %v6994_v23  ;;  %v7005_v51 = vunpack.i.h.bf16 %v7003_v59  ;;  %v5199_v52 = vrot.slane %v10458_v6, 2  ;;  %v5200_v34 = vrot.slane %v10460_v5, 1 }
 0x551   : > { %v10499_v26 = vunpack.c.l.b16 %v4818_v27  ;;  %v4759_v3 = vmax.f32 %v10182_v10, %v4706_v55  ;;  %v10505_v44 = vsel %vm4927_vm8, %v4975_v42, %v10486_v48  ;;  %v4817_v33 = vpack.c.bf16 %v4769_v7, %v4769_v7 }
 0x552   : > { %v4772_v38 = vmax.f32 %v10231_v63, %v7005_v51  ;;  %v7004_v58 = vunpack.i.l.bf16 %v7003_v59  ;;  %v7010_v43 = vunpack.i.h.bf16 %v7008_v2  ;;  %v4962_v27 = vsel %vm4927_vm8, %v4961_v30, %v10458_v6 }
 0x553   : > { %v10512_v12 = vunpack.c.l.b16 %v4805_v37  ;;  %v10514_v10 = vunpack.c.l.b16 %v4806_v1  ;;  %v4786_v55 = vsel %vm1947_vm7, %v4760_v36, %v10227_v40  ;;  %v4807_v35 = vpack.c.bf16 %v4759_v3, %v4759_v3 }
 0x554   : > { %v5201_v23 = vsel %vm4927_vm8, %v5200_v34, %v5199_v52  ;;  %v10521_v59 = vunpack.c.l.b16 %v4817_v33  ;;  %v4792_v30 = vsel %vm1947_vm7, %v4772_v38, %v10231_v63  ;;  %v4704_v37 = vsel %vm1947_vm7, %v6965_v19, %v7004_v58 }
 0x555   : > { %v4756_v1 = vmax.f32 %v10239_v53, %v7004_v58  ;;  %v4808_v40 = vpack.c.bf16 %v4786_v55, %v4786_v55  ;;  %v4820_v36 = vpack.c.bf16 %v4792_v30, %v4792_v30  ;;  %v4755_v4 = vmax.f32 %v10150_v9, %v4704_v37 }
 0x556   : > { %v4774_v3 = vmax.f32 %v10250_v54, %v7010_v43  ;;  %v7009_v34 = vunpack.i.l.bf16 %v7008_v2  ;;  %v7015_v33 = vunpack.i.h.bf16 %v7013_v39  ;;  %v7014_v7 = vunpack.i.l.bf16 %v7013_v39 }
 0x557   : > { %v4784_v52 = vsel %vm1947_vm7, %v4756_v1, %v10239_v53  ;;  %v10533_v42 = vunpack.c.l.b16 %v4807_v35  ;;  %v4803_v63 = vpack.c.bf16 %v4755_v4, %v4755_v4  ;;  %v4963_v58 = vrot.slane %v10521_v59, 6  ;;  %v10541_v53 = vpop.permute.xlu0 %7017 }
 0x558   : > { %v4804_v32 = vpack.c.bf16 %v4784_v52, %v4784_v52  ;;  %v4793_v19 = vsel %vm1947_vm7, %v4774_v3, %v10250_v54  ;;  %v4712_v9 = vsel %vm1947_vm7, %v7009_v34, %v7005_v51  ;;  %v4776_v38 = vmax.f32 %v10256_v18, %v7015_v33 }
 0x559   : > { %v4713_v55 = vsel %vm1947_vm7, %v7014_v7, %v7010_v43  ;;  %v10545_v39 = vunpack.c.l.b16 %v4820_v36  ;;  %v4822_v4 = vpack.c.bf16 %v4793_v19, %v4793_v19  ;;  %v10547_v30 = vunpack.c.l.b16 %v4808_v40  ;;  %v7028_v19 = vpop.permute.xlu1 %7027 }
 0x55a   : > { %v10549_v54 = vunpack.c.l.b16 %v4803_v63  ;;  %v10551_v37 = vunpack.c.l.b16 %v4804_v32  ;;  %v4771_v51 = vmax.f32 %v10248_v21, %v4712_v9  ;;  %v4773_v43 = vmax.f32 %v10254_v46, %v4713_v55 }
 0x55b   : > { %v7020_v7 = vunpack.i.h.bf16 %v10541_v53  ;;  %v7019_v3 = vunpack.i.l.bf16 %v10541_v53  ;;  %v4964_v36 = vsel %vm4930_vm9, %v4963_v58, %v4962_v27  ;;  %v5202_v40 = vsel %vm4930_vm9, %v10521_v59, %v5201_v23  ;;  %v7023_v23 = vpop.permute.xlu0 %7022 }
 0x55c   : > { %v4794_v34 = vsel %vm1947_vm7, %v4776_v38, %v10256_v18  ;;  %v4979_v21 = vrot.slane %v10545_v39, 5  ;;  %v10567_v32 = vunpack.c.l.b16 %v4822_v4  ;;  %v4932_v9 = vrot.slane %v10549_v54, 5 }
 0x55d   : > { %v4951_v27 = vrot.slane %v10551_v37, 5  ;;  %v5175_v58 = vrot.slane %v10549_v54, 7  ;;  %v4819_v55 = vpack.c.bf16 %v4771_v51, %v4771_v51  ;;  %v4824_v53 = vpack.c.bf16 %v4794_v34, %v4794_v34 }
 0x55e   : > { %v4821_v52 = vpack.c.bf16 %v4773_v43, %v4773_v43  ;;  %v4778_v18 = vmax.f32 %v10278_v16, %v7020_v7  ;;  %v4714_v38 = vsel %vm1947_vm7, %v7019_v3, %v7015_v33  ;;  %v5189_v46 = vrot.slane %v10551_v37, 7 }
 0x55f   : > { %v10575_v4 = vunpack.c.l.b16 %v4819_v55  ;;  %v4775_v35 = vmax.f32 %v10276_v15, %v4714_v38  ;;  %v7029_v1 = vunpack.i.l.bf16 %v7028_v19  ;;  %v7025_v43 = vunpack.i.h.bf16 %v7023_v23 }
 0x560   : > { %v10579_v63 = vunpack.c.l.b16 %v4821_v52  ;;  %v4795_v51 = vsel %vm1947_vm7, %v4778_v18, %v10278_v16  ;;  %v10585_v33 = vsel %vm4933_vm10, %v4932_v9, %v10463_v31  ;;  %v7024_v55 = vunpack.i.l.bf16 %v7023_v23 }
 0x561   : > { %v4965_v3 = vrot.slane %v10575_v4, 5  ;;  %v5203_v34 = vrot.slane %v10575_v4, 7  ;;  %v10591_v15 = vsel %vm4933_vm10, %v5175_v58, %v10454_v14  ;;  %v10593_v52 = vunpack.c.l.b16 %v4824_v53 }
 0x562   : > { %v7030_v18 = vunpack.i.h.bf16 %v7028_v19  ;;  %v4826_v31 = vpack.c.bf16 %v4795_v51, %v4795_v51  ;;  %v4823_v9 = vpack.c.bf16 %v4775_v35, %v4775_v35  ;;  %v4708_v2 = vsel %vm1947_vm7, %v7029_v1, %v6980_v20 }
 0x563   : > { %v10601_v23 = vsel %vm4933_vm10, %v4965_v3, %v4964_v36  ;;  %v4763_v14 = vmax.f32 %v10280_v60, %v4708_v2  ;;  %v4780_v53 = vmax.f32 %v10284_v57, %v7025_v43  ;;  %v10607_v19 = vsel %vm4933_vm10, %v5203_v34, %v5202_v40 }
 0x564   : > { %v4716_v58 = vsel %vm1947_vm7, %v7030_v18, %v7025_v43  ;;  %v10609_v16 = vunpack.c.l.b16 %v4823_v9  ;;  %v4715_v62 = vsel %vm1947_vm7, %v7024_v55, %v7020_v7  ;;  %v4952_v60 = vsel %vm4933_vm10, %v4951_v27, %v10445_v49 }
 0x565   : > { %v4779_v35 = vmax.f32 %v10282_v13, %v4716_v58  ;;  %v4811_v51 = vpack.c.bf16 %v4763_v14, %v4763_v14  ;;  %v4796_v20 = vsel %vm1947_vm7, %v4780_v53, %v10284_v57  ;;  %v4777_v1 = vmax.f32 %v10290_v56, %v4715_v62 }
 0x566   : > { %v10618_v2 = vunpack.c.l.b16 %v4826_v31  ;;  %v4969_v36 = vrot.slane %v10609_v16, 3  ;;  %v4953_v43 = vrot.slane %v10514_v10, 4  ;;  %v4828_v3 = vpack.c.bf16 %v4796_v20, %v4796_v20 }
 0x567   : > { %v10623_v13 = vunpack.c.l.b16 %v4811_v51  ;;  %v4827_v7 = vpack.c.bf16 %v4779_v35, %v4779_v35  ;;  %v4825_v34 = vpack.c.bf16 %v4777_v1, %v4777_v1  ;;  %v4955_v56 = vrot.slane %v10547_v30, 3 }
 0x568   : > { %v4954_v57 = vsel %vm4936_vm11, %v4953_v43, %v4952_v60  ;;  %v11335_v49 = vrot.slane %v10499_v26, 6  ;;  %v4981_v55 = vrot.slane %v10567_v32, 4  ;;  %v10636_v14 = vunpack.c.l.b16 %v4828_v3 }
 0x569   : > { %v4944_v18 = vrot.slane %v10623_v13, 1  ;;  %v5183_v31 = vrot.slane %v10623_v13, 3  ;;  %v10634_v9 = vunpack.c.l.b16 %v4827_v7  ;;  %v10638_v58 = vunpack.c.l.b16 %v4825_v34 }
 0x56a   : > { %v4978_v27 = vsel %vm4930_vm9, %v11335_v49, %v10505_v44  ;;  %v4956_v53 = vsel %vm4939_vm12, %v4955_v56, %v4954_v57  ;;  %v4983_v44 = vrot.slane %v10593_v52, 3  ;;  %v11336_v20 = vrot.slane %v10441_v41, 2 }
 0x56b   : > { %v4980_v35 = vsel %vm4933_vm10, %v4979_v21, %v4978_v27  ;;  %v4973_v62 = vrot.slane %v10634_v9, 1  ;;  %v5211_v51 = vrot.slane %v10634_v9, 3  ;;  %v4971_v43 = vrot.slane %v10638_v58, 2 }
 0x56c   : > { %v4958_v1 = vsel %vm4942_vm13, %v11336_v20, %v4956_v53  ;;  %v4982_v60 = vsel %vm4936_vm11, %v4981_v55, %v4980_v35  ;;  %v5209_v7 = vrot.slane %v10638_v58, 4  ;;  %v11337_v3 = vrot.slane %v10472_v24, 1 }
 0x56d   : > { %v4984_v34 = vsel %vm4939_vm12, %v4983_v44, %v4982_v60  ;;  %v4985_v57 = vrot.slane %v10618_v2, 2  ;;  %v4987_v56 = vrot.slane %v10636_v14, 1  ;;  %v5190_v49 = vsel %vm4933_vm10, %v5189_v46, %v10426_v47 }
 0x56e   : > { %v4960_v21 = vsel %vm4945_vm14, %v11337_v3, %v4958_v1  ;;  %v5191_v27 = vrot.slane %v10514_v10, 6  ;;  %v5193_v55 = vrot.slane %v10547_v30, 5  ;;  %v11338_v53 = vrot.slane %v10486_v48, 2 }
 0x56f   : > { %v11339_v35 = vrot.slane %v10467_v8, 1  ;;  %v5219_v44 = vrot.slane %v10567_v32, 6  ;;  %v5221_v1 = vrot.slane %v10593_v52, 5  ;;  %v4986_v60 = vsel %vm4942_vm13, %v4985_v57, %v4984_v34 }
 0x570   : > { %v5192_v3 = vsel %vm4936_vm11, %v5191_v27, %v5190_v49  ;;  %v5223_v46 = vrot.slane %v10618_v2, 4  ;;  %v4988_v40 = vsel %vm4945_vm14, %v4987_v56, %v4986_v60  ;;  %v11340_v5 = vrot.slane %v10545_v39, 7 }
 0x571   : > { %v5215_v20 = vsel %vm4927_vm8, %v11339_v35, %v11338_v53  ;;  %v5194_v38 = vsel %vm4939_vm12, %v5193_v55, %v5192_v3  ;;  %v5225_v35 = vrot.slane %v10636_v14, 3  ;;  %v4990_v6 = vpack.c.b16 %v4988_v40, %v4960_v21 }
 0x572   : > { %v5216_v47 = vsel %vm4930_vm9, %v10499_v26, %v5215_v20  ;;  %v11341_v34 = vrot.slane %v10441_v41, 4  ;;  %v11342_v27 = vrot.slane %v10512_v12, 4  ;;  %v11343_v55 = vrot.slane %v10472_v24, 3 }
 0x573   : > { %v5218_v53 = vsel %vm4933_vm10, %v11340_v5, %v5216_v47  ;;  %v11344_v60 = vrot.slane %v10533_v42, 3  ;;  %5121 = vmatprep.mubr.bf16.mxu0 %v4990_v6  ;;  %v11348_v6 = vrot.slane %v10533_v42, 5 }
 0x574   : > { %v5196_v57 = vsel %vm4942_vm13, %v11341_v34, %v5194_v38  ;;  %v5220_v49 = vsel %vm4936_vm11, %v5219_v44, %v5218_v53  ;;  %v4937_v56 = vsel %vm4936_vm11, %v11342_v27, %v10585_v33  ;;  %v11345_v38 = vrot.slane %v10579_v63, 4 }
 0x575   : > { %v5198_v20 = vsel %vm4945_vm14, %v11343_v55, %v5196_v57  ;;  %v5222_v5 = vsel %vm4939_vm12, %v5221_v1, %v5220_v49  ;;  %v4940_v40 = vsel %vm4939_vm12, %v11344_v60, %v4937_v56  ;;  %v11346_v33 = vrot.slane %v10456_v28, 2 }
 0x576   : > { %v4968_v21 = vsel %vm4936_vm11, %v11345_v38, %v10601_v23  ;;  %v5224_v44 = vsel %vm4942_vm13, %v5223_v46, %v5222_v5  ;;  %v11347_v1 = vrot.slane %v10512_v12, 6  ;;  %v11353_v38 = vrot.slane %v10486_v48, 4 }
 0x577   : > { %v4943_v3 = vsel %vm4942_vm13, %v11346_v33, %v4940_v40  ;;  %v4970_v47 = vsel %vm4939_vm12, %v4969_v36, %v4968_v21  ;;  %v5226_v34 = vsel %vm4945_vm14, %v5225_v35, %v5224_v44  ;;  %v11349_v36 = vrot.slane %v10456_v28, 4 }
 0x578   : > { %v5178_v53 = vsel %vm4936_vm11, %v11347_v1, %v10591_v15  ;;  %v4946_v57 = vsel %vm4945_vm14, %v4944_v18, %v4943_v3  ;;  %v4972_v23 = vsel %vm4942_vm13, %v4971_v43, %v4970_v47  ;;  %v5228_v49 = vpack.c.b16 %v5226_v34, %v5198_v20 }
 0x579   : > { %v5180_v46 = vsel %vm4939_vm12, %v11348_v6, %v5178_v53  ;;  %v4974_v27 = vsel %vm4945_vm14, %v4973_v62, %v4972_v23  ;;  %v11350_v15 = vrot.slane %v10579_v63, 6  ;;  %v11351_v43 = vrot.slane %v10609_v16, 5  ;;  %v7369_v23 = vld [vmem:[%s10986_s5 + $0x148] sm:$0xff]  }
 0x57a   : > { %v5182_v56 = vsel %vm4942_vm13, %v11349_v36, %v5180_v46  ;;  %v4989_v55 = vpack.c.b16 %v4974_v27, %v4946_v57  ;;  %v11352_v20 = vrot.slane %v10551_v37, 1  ;;  %5359 = vmatprep.mubr.bf16.mxu1 %v5228_v49  ;;  %v5453_v3 = vrot.slane %v10593_v52, 7 }
 0x57b   : > { %v5206_v35 = vsel %vm4936_vm11, %v11350_v15, %v10607_v19  ;;  %v5184_v18 = vsel %vm4945_vm14, %v5183_v31, %v5182_v56  ;;  %v5425_v19 = vrot.slane %v10547_v30, 7  ;;  %v11354_v31 = vrot.slane %v10467_v8, 3  ;;  %v7370_v15 = vld [vmem:[%s10986_s5 + $0x108] sm:$0xff]  }
 0x57c   : > { %v5208_v5 = vsel %vm4939_vm12, %v11351_v43, %v5206_v35  ;;  %v5423_v62 = vsel %vm4933_vm10, %v11352_v20, %v10450_v11  ;;  %5122 = vmatmul.mubr.bf16.vlgmr.msra.gmra.mrb[32].mxu0 %v4989_v55  ;;  %v7368_v11 = vld [vmem:[%s10986_s5 + $0x100] sm:$0xff]   ;;  %v5455_v47 = vrot.slane %v10618_v2, 6  ;;  %v11356_v34 = vrot.slane %v10545_v39, 1 }
 0x57d   : > { %v5210_v60 = vsel %vm4942_vm13, %v5209_v7, %v5208_v5  ;;  %v5424_v40 = vsel %vm4936_vm11, %v10514_v10, %v5423_v62  ;;  %v5447_v21 = vsel %vm4927_vm8, %v11354_v31, %v11353_v38  ;;  %v11355_v7 = vrot.slane %v10499_v26, 2  ;;  %v7373_v38 = vld [vmem:[%s10986_s5 + $0x158] sm:$0xff]  }
 0x57e   : > { %v5212_v44 = vsel %vm4945_vm14, %v5211_v51, %v5210_v60  ;;  %v5426_v53 = vsel %vm4939_vm12, %v5425_v19, %v5424_v40  ;;  %v5457_v51 = vrot.slane %v10636_v14, 5  ;;  %v11357_v6 = vrot.slane %v10441_v41, 6  ;;  %v7372_v60 = vld [vmem:[%s10986_s5 + $0x110] sm:$0xff]  }
 0x57f   : > { %v5449_v33 = vsel %vm4930_vm9, %v11355_v7, %v5447_v21  ;;  %v5227_v1 = vpack.c.b16 %v5212_v44, %v5184_v18  ;;  %v5429_v27 = vrot.slane %v10472_v24, 5  ;;  %v7371_v18 = vld [vmem:[%s10986_s5 + $0x150] sm:$0xff]   ;;  %v5640_v43 = vrot.slane %v10549_v54, 3 }
 0x580   : > { %v5451_v57 = vsel %vm4933_vm10, %v11356_v34, %v5449_v33  ;;  %v5428_v46 = vsel %vm4942_vm13, %v11357_v6, %v5426_v53  ;;  %v5666_v20 = vrot.slane %v10521_v59, 4  ;;  %v5668_v62 = vrot.slane %v10575_v4, 3 }
 0x581   : > { %v5452_v49 = vsel %vm4936_vm11, %v10567_v32, %v5451_v57  ;;  %5360 = vmatmul.mubr.bf16.vlgmr.msra.gmra.mrb[128].mxu1 %v5227_v1  ;;  %v5430_v35 = vsel %vm4945_vm14, %v5429_v27, %v5428_v46  ;;  %v5642_v40 = vrot.slane %v10512_v12, 2  ;;  %v5670_v19 = vrot.slane %v10579_v63, 2 }
 0x582   : > { %v5454_v36 = vsel %vm4939_vm12, %v5453_v3, %v5452_v49  ;;  %6557 = vmatpush3.bf16.msra.mxu1 %v7368_v11  ;;  %v5644_v31 = vrot.slane %v10533_v42, 1  ;;  %v5672_v21 = vrot.slane %v10609_v16, 1  ;;  %v5641_v44 = vsel %vm4933_vm10, %v5640_v43, %v10393_v17  ;;  %v7374_v3 = vld [vmem:[%s10986_s5 + $0x118] sm:$0xff]   ;;  %v7375_v17 = vld [vmem:[%s10986_s5 + $0x160] sm:$0xff]  }
 0x583   : > { %v5456_v56 = vsel %vm4942_vm13, %v5455_v47, %v5454_v36  ;;  %6558 = vmatprep.subr.bf16.mxu1 %v7369_v23  ;;  %v5647_v11 = vrot.slane %v10623_v13, 7  ;;  %v5643_v7 = vsel %vm4936_vm11, %v5642_v40, %v5641_v44  ;;  %v5667_v33 = vsel %vm4930_vm9, %v5666_v20, %v10489_v25  ;;  %v7378_v40 = vld [vmem:[%s10986_s5 + $0x128] sm:$0xff]  }
 0x584   : > { %v5458_v55 = vsel %vm4945_vm14, %v5457_v51, %v5456_v56  ;;  %v5645_v47 = vsel %vm4939_vm12, %v5644_v31, %v5643_v7  ;;  %v5669_v1 = vsel %vm4933_vm10, %v5668_v62, %v5667_v33  ;;  %v5675_v25 = vrot.slane %v10634_v9, 7 }
 0x585   : > { %v5460_v5 = vpack.c.b16 %v5458_v55, %v5430_v35  ;;  %v5646_v53 = vsel %vm4942_vm13, %v10456_v28, %v5645_v47  ;;  %v5671_v34 = vsel %vm4936_vm11, %v5670_v19, %v5669_v1  ;;  %v5650_v57 = vrot.slane %v10381_v50, 5  ;;  %v11359_v35 = vld [vmem:[#allocation10_spill] sm:$0xff] }
 0x586   : > { %6559 = vmatpush3.bf16.msra.mxu1 %v7370_v15  ;;  %v5403_v51 = vrot.slane %v10355_v0, 4  ;;  %v10809_v23 = vsel %vm4945_vm14, %v5647_v11, %v5646_v53  ;;  %v5673_v6 = vsel %vm4939_vm12, %v5672_v21, %v5671_v34  ;;  %v5404_v46 = vrot.slane %v10357_v45, 3  ;;  %v11358_v15 = vld [vmem:[#allocation3_spill] sm:$0xff]  ;;  %v7376_v55 = vld [vmem:[%s10986_s5 + $0x120] sm:$0xff]  }
 0x587   : > { %5591 = vmatprep.mubr.bf16.mxu1 %v5460_v5  ;;  %6560 = vmatprep.subr.bf16.mxu1 %v7371_v18  ;;  %v5649_v49 = vrot.slane %v10383_v22, 6  ;;  %v5652_v27 = vrot.slane %v10407_v61, 4  ;;  %v5674_v36 = vsel %vm4942_vm13, %v10638_v58, %v5673_v6  ;;  %v5406_v56 = vrot.slane %v10379_v29, 2  ;;  %v7377_v29 = vld [vmem:[%s10986_s5 + $0x168] sm:$0xff]  }
 0x588   : > { %v5431_v50 = vrot.slane %v11358_v15, 4  ;;  %v5432_v0 = vrot.slane %v11359_v35, 3  ;;  %v10824_v45 = vsel %vm4945_vm14, %v5675_v25, %v5674_v36  ;;  %v5434_v22 = vrot.slane %v10521_v59, 2 }
 0x589   : > { %v5408_v61 = vrot.slane %v10549_v54, 1  ;;  %v5654_v18 = vrot.slane %v10551_v37, 3  ;;  %v5691_v43 = vpack.c.b16 %v10824_v45, %v10809_v23  ;;  %v5436_v5 = vrot.slane %v10575_v4, 1  ;;  %v7402_v23 = vld [vmem:[%s10988_s7 + $0x18] ss:$0 sps:$4 sm:$0x11]  }
 0x58a   : > { %6561 = vmatpush3.bf16.msra.mxu1 %v7372_v60  ;;  %v5405_v20 = vsel %vm4927_vm8, %v5404_v46, %v5403_v51  ;;  %v5678_v62 = vrot.slane %v10467_v8, 5  ;;  %v5677_v59 = vrot.slane %v10486_v48, 6  ;;  %v5651_v54 = vsel %vm4927_vm8, %v5650_v57, %v5649_v49  ;;  %v7379_v8 = vld [vmem:[%s10986_s5 + $0x170] sm:$0xff]   ;;  %v7383_v46 = vld [vmem:[%s10986_s5 + $0x1c0] sm:$0xff]  }
 0x58b   : > { %6562 = vmatprep.subr.bf16.mxu1 %v7373_v38  ;;  %v5433_v37 = vsel %vm4927_vm8, %v5432_v0, %v5431_v50  ;;  %v5680_v60 = vrot.slane %v10499_v26, 4  ;;  %v5407_v19 = vsel %vm4930_vm9, %v5406_v56, %v5405_v20  ;;  %v5653_v4 = vsel %vm4930_vm9, %v5652_v27, %v5651_v54  ;;  %v7384_v50 = vld [vmem:[%s10986_s5 + $0x180] sm:$0xff]   ;;  %v7393_v20 = vld [vmem:[%s10986_s5 + $0x1e8] sm:$0xff]   ;;  %v7396_v54 = vld [vmem:[%s10986_s5 + $0x1b0] sm:$0xff]  }
 0x58c   : > { %v5682_v38 = vrot.slane %v10545_v39, 3  ;;  %v5409_v48 = vsel %vm4933_vm10, %v5408_v61, %v5407_v19  ;;  %v5435_v26 = vsel %vm4930_vm9, %v5434_v22, %v5433_v37  ;;  %v5655_v31 = vsel %vm4933_vm10, %v5654_v18, %v5653_v4  ;;  %v7388_v22 = vld [vmem:[%s10986_s5 + $0x190] sm:$0xff]   ;;  %v7389_v61 = vld [vmem:[%s10986_s5 + $0x1d8] sm:$0xff]   ;;  %v7400_v4 = vld [vmem:[%s10988_s7 + $0x8] sm:$0xff]  }
 0x58d   : > { %v5439_v21 = vrot.slane %v10609_v16, 7  ;;  %v5437_v44 = vsel %vm4933_vm10, %v5436_v5, %v5435_v26  ;;  %v5656_v11 = vrot.slane %v10514_v10, 2  ;;  %v5684_v7 = vrot.slane %v10567_v32, 2  ;;  %v7381_v10 = vld [vmem:[%s10986_s5 + $0x178] sm:$0xff]   ;;  %v7392_v5 = vld [vmem:[%s10986_s5 + $0x1a0] sm:$0xff]  }
 0x58e   : > { %6563 = vmatpush3.bf16.msra.mxu1 %v7374_v3  ;;  %v5441_v39 = vrot.slane %v10638_v58, 6  ;;  %v5679_v33 = vsel %vm4927_vm8, %v5678_v62, %v5677_v59  ;;  %v7380_v3 = vld [vmem:[%s10986_s5 + $0x130] sm:$0xff]   ;;  %v5410_v47 = vsel %vm4936_vm11, %v10512_v12, %v5409_v48  ;;  %v5438_v32 = vsel %vm4936_vm11, %v10579_v63, %v5437_v44  ;;  %v7390_v18 = vld [vmem:[%s10986_s5 + $0x198] sm:$0xff]   ;;  %v7394_v62 = vld [vmem:[%s10986_s5 + $0x1a8] sm:$0xff]  }
 0x58f   : > { %6564 = vmatprep.subr.bf16.mxu1 %v7375_v17  ;;  %v5657_v16 = vsel %vm4936_vm11, %v5656_v11, %v5655_v31  ;;  %v5681_v1 = vsel %vm4930_vm9, %v5680_v60, %v5679_v33  ;;  %v5658_v58 = vrot.slane %v10547_v30, 1  ;;  %v5686_v53 = vrot.slane %v10593_v52, 1  ;;  %v7382_v30 = vld [vmem:[%s10986_s5 + $0x138] sm:$0xff]   ;;  %v7395_v59 = vld [vmem:[%s10986_s5 + $0x1f0] sm:$0xff]  }
 0x590   : > { %v5683_v17 = vsel %vm4933_vm10, %v5682_v38, %v5681_v1  ;;  %v5411_v12 = vrot.slane %v10533_v42, 7  ;;  %v5440_v34 = vsel %vm4939_vm12, %v5439_v21, %v5438_v32  ;;  %v5443_v25 = vrot.slane %v10634_v9, 5  ;;  %v7397_v37 = vld [vmem:[%s10986_s5 + $0x1f8] sm:$0xff]   ;;  %v7401_v38 = vld [vmem:[%s10988_s7 + $0x10] sm:$0xff]  }
 0x591   : > { %v5685_v57 = vsel %vm4936_vm11, %v5684_v7, %v5683_v17  ;;  %v5442_v51 = vsel %vm4942_vm13, %v5441_v39, %v5440_v34  ;;  %v5659_v6 = vsel %vm4939_vm12, %v5658_v58, %v5657_v16  ;;  %v5689_v63 = vrot.slane %v10636_v14, 7  ;;  %v7398_v60 = vld [vmem:[%s10986_s5 + $0x1b8] sm:$0xff]  }
 0x592   : > { %6565 = vmatpush3.bf16.msra.mxu1 %v7376_v55  ;;  %v5412_v52 = vsel %vm4939_vm12, %v5411_v12, %v5410_v47  ;;  %v5415_v42 = vrot.slane %v10623_v13, 5  ;;  %v5413_v9 = vrot.slane %v10456_v28, 6  ;;  %v5687_v49 = vsel %vm4939_vm12, %v5686_v53, %v5685_v57  ;;  %v7387_v55 = vld [vmem:[%s10986_s5 + $0x1d0] sm:$0xff]  }
 0x593   : > { %6566 = vmatprep.subr.bf16.mxu1 %v7377_v29  ;;  %v5444_v14 = vsel %vm4945_vm14, %v5443_v25, %v5442_v51  ;;  %v5660_v27 = vsel %vm4942_vm13, %v10441_v41, %v5659_v6  ;;  %v5688_v36 = vsel %vm4942_vm13, %v10618_v2, %v5687_v49  ;;  %v5661_v13 = vrot.slane %v10472_v24, 7  ;;  %v7385_v2 = vld [vmem:[%s10986_s5 + $0x1c8] sm:$0xff]   ;;  %v7391_v29 = vld [vmem:[%s10986_s5 + $0x1e0] sm:$0xff]  }
 0x594   : > { %v5414_v56 = vsel %vm4942_vm13, %v5413_v9, %v5412_v52  ;;  %v5690_v28 = vsel %vm4945_vm14, %v5689_v63, %v5688_v36  ;;  %v7386_v24 = vld [vmem:[%s10986_s5 + $0x188] sm:$0xff]   ;;  %v7422_v19 = vmov 0.0   ;;  %v5876_v45 = vsel %vm5874_vm15, %v7402_v23, 0 }
 0x595   : > { %v5416_v15 = vsel %vm4945_vm14, %v5415_v42, %v5414_v56  ;;  %v5662_v41 = vsel %vm4945_vm14, %v5661_v13, %v5660_v27  ;;  %v6488_v27 = vld [vmem:[%s10989_s8] ss:$0 sm:$0xff] }
 0x596   : > { %6567 = vmatpush3.bf16.msra.mxu1 %v7378_v40  ;;  %v5459_v35 = vpack.c.b16 %v5444_v14, %v5416_v15  ;;  %v5692_v0 = vpack.c.b16 %v5690_v28, %v5662_v41  ;;  %v7399_v40 = vld [vmem:[%s10988_s7] sm:$0xff]  }
 0x597   : > { %6568 = vmatprep.subr.bf16.mxu1 %v7379_v8  ;;  %v6343_v8 = vld [vmem:[%s10987_s6] ss:$0 sm:$0xff] }
 0x59a   : > { %6569 = vmatpush3.bf16.msra.mxu1 %v7380_v3 }
 0x59b   : > { %6570 = vmatprep.subr.bf16.mxu1 %v7381_v10 }
 0x59e   : > { %6571 = vmatpush3.bf16.msra.mxu1 %v7382_v30 }
 0x59f   : > { %6578 = vmatprep.subr.bf16.mxu1 %v7383_v46 }
 0x5a1   : > { %5592 = vmatmul.mubr.bf16.vlgmr.msra.gmra.mrb[132].mxu1 %v5459_v35 }
 0x5a2   : > { %6579 = vmatpush3.bf16.msra.mxu1 %v7384_v50  ;;  %5823 = vmatprep.mubr.bf16.mxu1 %v5692_v0 }
 0x5a3   : > { %6580 = vmatprep.subr.bf16.mxu1 %v7385_v2 }
 0x5a6   : > { %6581 = vmatpush3.bf16.msra.mxu1 %v7386_v24 }
 0x5a7   : > { %6582 = vmatprep.subr.bf16.mxu1 %v7387_v55 }
 0x5aa   : > { %6583 = vmatpush3.bf16.msra.mxu1 %v7388_v22 }
 0x5ab   : > { %6584 = vmatprep.subr.bf16.mxu1 %v7389_v61 }
 0x5ae   : > { %6585 = vmatpush3.bf16.msra.mxu1 %v7390_v18 }
 0x5af   : > { %6586 = vmatprep.subr.bf16.mxu1 %v7391_v29 }
 0x5b2   : > { %6587 = vmatpush3.bf16.msra.mxu1 %v7392_v5 }
 0x5b3   : > { %6588 = vmatprep.subr.bf16.mxu1 %v7393_v20 }
 0x5b6   : > { %6589 = vmatpush3.bf16.msra.mxu1 %v7394_v62 }
 0x5b7   : > { %6590 = vmatprep.subr.bf16.mxu1 %v7395_v59 }
 0x5ba   : > { %6591 = vmatpush3.bf16.msra.mxu1 %v7396_v54 }
 0x5bb   : > { %6592 = vmatprep.subr.bf16.mxu1 %v7397_v37 }
 0x5be   : > { %6593 = vmatpush3.bf16.msra.mxu1 %v7398_v60 }
 0x5bf   : > { %6605 = vmatprep.subr.bf16.mxu1 %v7422_v19 }
 0x5c1   : > { %5824 = vmatmul.mubr.bf16.vlgmr.msra.gmra.mrb[136].mxu1 %v5691_v43 }
 0x5c2   : > { %6606 = vmatpush3.bf16.msra.mxu1 %v7399_v40  ;;  %6613 = vmatprep.mubr.msk.bf16.mxu1 %vm7423_vm0, %v7422_v19 }
 0x5c3   : > { %6607 = vmatprep.subr.bf16.mxu1 %v7422_v19 }
 0x5c6   : > { %6608 = vmatpush3.bf16.msra.mxu1 %v7400_v4 }
 0x5c7   : > { %6609 = vmatprep.subr.bf16.mxu1 %v7422_v19 }
 0x5ca   : > { %6610 = vmatpush3.bf16.msra.mxu1 %v7401_v38 }
 0x5cb   : > { %6611 = vmatprep.subr.bf16.mxu1 %v7422_v19 }
 0x5ce   : > { %6612 = vmatpush3.bf16.msra.mxu1 %v5876_v45 }
 0x64f   : > { %v6528_v43 = vpop.f32.mrb[32].mxu0 }
 0x650   : > { %v6529_v48 = vpop.f32.mrb[33].mxu0 }
 0x651   : > { %v6530_v26 = vadd.f32 %v6529_v48, %v6528_v43  ;;  %v6531_v31 = vpop.f32.mrb[34].mxu0 }
 0x652   : > { %v6532_v44 = vpop.f32.mrb[35].mxu0 }
 0x653   : > { %v5136_v11 = vadd.f32 %v6530_v26, %v6343_v8  ;;  %v6533_v39 = vadd.f32 %v6532_v44, %v6531_v31 }
 0x654   : > { %v6550_v21 = vpop.f32.mrb[128].mxu1 }
 0x655   : > { %v6551_v7 = vpop.f32.mrb[129].mxu1  ;;  %v5137_v47 = vadd.f32 %v6533_v39, %v6343_v8 }
 0x656   : > { %v6552_v33 = vadd.f32 %v6551_v7, %v6550_v21  ;;  %v6553_v3 = vpop.f32.mrb[130].mxu1 }
 0x657   : > { %v6554_v16 = vpop.f32.mrb[131].mxu1 }
 0x658   : > { %v5368_v1 = vadd.f32 %v6552_v33, %v5136_v11  ;;  %v6555_v10 = vadd.f32 %v6554_v16, %v6553_v3 }
 0x65a   : > { %v5369_v32 = vadd.f32 %v6555_v10, %v5137_v47 }
 0x674   : > { %v6572_v58 = vpop.f32.mrb[132].mxu1 }
 0x675   : > { %v6573_v17 = vpop.f32.mrb[133].mxu1 }
 0x676   : > { %v6574_v53 = vadd.f32 %v6573_v17, %v6572_v58  ;;  %v6575_v12 = vpop.f32.mrb[134].mxu1 }
 0x677   : > { %v6576_v34 = vpop.f32.mrb[135].mxu1 }
 0x678   : > { %v5600_v25 = vadd.f32 %v6574_v53, %v5368_v1  ;;  %v6577_v57 = vadd.f32 %v6576_v34, %v6575_v12 }
 0x67a   : > { %v5601_v51 = vadd.f32 %v6577_v57, %v5369_v32 }
 0x694   : > { %v6594_v6 = vpop.f32.mrb[136].mxu1 }
 0x695   : > { %v6595_v63 = vpop.f32.mrb[137].mxu1 }
 0x696   : > { %v6596_v30 = vadd.f32 %v6595_v63, %v6594_v6  ;;  %v6597_v52 = vpop.f32.mrb[138].mxu1 }
 0x697   : > { %v6598_v42 = vpop.f32.mrb[139].mxu1 }
 0x698   : > { %v5832_v9 = vadd.f32 %v6596_v30, %v5600_v25  ;;  %v6599_v46 = vadd.f32 %v6598_v42, %v6597_v52 }
 0x69a   : > { %v5833_v49 = vadd.f32 %v6599_v46, %v5601_v51 }
 0x69c   : > { %v5834_v14 = vpack.c.bf16 %v5833_v49, %v5832_v9 }
 0x69e   : > { %6614 = vmatmul.mubr.msk.bf16.vlgmr.msra.gmra.mrb[140].mxu1 %vm5870_vm1, %v5834_v14 }
 0x771   : > { %v5912_v36 = vpop.f32.mrb[140].mxu1 }
 0x772   : > { %v5913_v56 = vadd.f32 %v6488_v27, %v5912_v36  ;;  %v6615_v13 = vpop.f32.mrb[141].mxu1 }
 0x773   : > { %v5915_v28 = vpop.f32.mrb[142].mxu1 }
 0x774   : > { %v5916_v15 = vadd.f32 %v6488_v27, %v5915_v28  ;;  %v6616_v50 = vpop.f32.mrb[143].mxu1  ;;  %v5920_v35 = vsel %vm5919_vm2, %v5913_v56, -inf }
 0x775   : > { %5921 = vmax.xlane.f32.xlu0 %v5920_v35 }
 0x776   : > { %v5923_v41 = vsel %vm5919_vm2, %v5916_v15, -inf }
 0x777   : > { %5924 = vmax.xlane.f32.xlu1 %v5923_v41 }
 0x802   : > { %v5922_v2 = vpop.xlane.xlu0 %5921 }
 0x803   : > { %v5926_v0 = vsub.f32 %v5913_v56, %v5922_v2 }
 0x804   : > { %v5925_v24 = vpop.xlane.xlu1 %5924 }
 0x805   : > { %v5928_v55 = vmul.f32 1.442695, %v5926_v0  ;;  %v5927_v22 = vsub.f32 %v5916_v15, %v5925_v24 }
 0x807   : > { %7403 = vpow2.f32 %v5928_v55  ;;  %v5930_v61 = vmul.f32 1.442695, %v5927_v22 }
 0x809   : > { %7405 = vpow2.f32 %v5930_v61 }
 0x811   : > { %v7404_v18 = vpop.eup %7403 }
 0x812   : > { %v5932_v29 = vsel %vm5919_vm2, %v7404_v18, 0.0 }
 0x813   : > { %v7406_v5 = vpop.eup %7405  ;;  %5933 = vadd.xlane.f32.xlu0 %v5932_v29 }
 0x814   : > { %v5935_v20 = vsel %vm5919_vm2, %v7406_v5, 0.0 }
 0x817   : > { %5936 = vadd.xlane.f32.xlu0 %v5935_v20 }
 0x8a0   : > { %v5934_v62 = vpop.xlane.xlu0 %5933 }
 0x8a1   : > { %7407 = vrcp.f32 %v5934_v62 }
 0x8a4   : > { %v5937_v59 = vpop.xlane.xlu0 %5936 }
 0x8a5   : > { %7409 = vrcp.f32 %v5937_v59 }
 0x8ab   : > { %v7408_v54 = vpop.eup %7407 }
 0x8ac   : > { %v5940_v37 = vmul.f32 %v7408_v54, %v7404_v18 }
 0x8ae   : > { %5942 = vst.msk [vmem:[%s337_s20] sm:$0xff] %vm5919_vm2, %v5940_v37 }
 0x8af   : > { %v7410_v60 = vpop.eup %7409 }
 0x8b0   : > { %v5941_v40 = vmul.f32 %v7410_v60, %v7406_v5 }
 0x8b2   : > { %5943 = vst.msk [vmem:[%s337_s20 + $0x8] sm:$0xff] %vm5919_vm2, %v5941_v40 }
 0x8b3 PF: > { %s19_s30 = sadd.s32 1, %s7417_s30  }
 0x8b4   : > { %p16_p5 = scmp.ge.s32.totalorder %s19_s30, 4  }
 0x8b6   :  { %18 = sbr.rel (!%p16_p5) target bundleno = 1 (0x1), region = 89 }

</bundles_post_ra>
